<compile_context>
chip_gen: v5e
topology: v5e:2x2
jax: 0.10.0
libtpu: 0.0.40
codegen_flags: <defaults>
</compile_context>

<pallas_src>
import jax
import jax.numpy as jnp
from jax.experimental import pallas as pl
from jax.experimental.pallas import tpu as pltpu

LANES = 128            # lane-dense padded channel width for every stage
K1 = 27                # conv1 patch length (3 in-ch * 3 * 3)
NPOS = 9               # conv2 kernel positions (t) == conv2 output cells (j)
ROWS = NPOS * NPOS     # 81 conv1 output cells per sample
TB = 16                # samples per grid step; multiple of 16 keeps bf16 sublane tiles aligned


# ----------------------------- fused Pallas kernel ----------------------------- #
def _fused_kernel(p1_ref, w1_ref, b1_ref, w2_ref, b2_ref, wfc_ref, bfc_ref, o_ref):
    # p1:  (1, 81*TB, 27) bf16, rows ordered (t, j, n)      w1: (27, 128) bf16
    # b1/b2/bfc: (1, 128) f32      w2/wfc: (9, 128, 128) bf16      o: (TB, 128) f32
    tb = o_ref.shape[0]
    g = NPOS * tb                                     # rows per conv2 kernel position

    # conv1: one wide bf16 matmul, bias + ReLU in f32, cast result to bf16 for conv2.
    y1 = jnp.dot(p1_ref[0], w1_ref[...], preferred_element_type=jnp.float32)
    y1 = jnp.maximum(y1 + b1_ref[...], 0.0).astype(jnp.bfloat16)        # (81*TB, 128)

    # conv2: 9 accumulated (9*TB, 128)@(128, 128) matmuls over kernel positions.
    acc2 = jnp.zeros((g, LANES), jnp.float32)
    for t in range(NPOS):
        acc2 = acc2 + jnp.dot(y1[t * g:(t + 1) * g, :], w2_ref[t],
                              preferred_element_type=jnp.float32)
    y2 = jnp.maximum(acc2 + b2_ref[...], 0.0).astype(jnp.bfloat16)      # (9*TB, 128), rows (j, n)

    # fc: 9 accumulated (TB, 128)@(128, 128) matmuls over output cells.
    acc3 = jnp.zeros((tb, LANES), jnp.float32)
    for j in range(NPOS):
        acc3 = acc3 + jnp.dot(y2[j * tb:(j + 1) * tb, :], wfc_ref[j],
                              preferred_element_type=jnp.float32)
    o_ref[...] = acc3 + bfc_ref[...]


# ------------------------------- host-side glue -------------------------------- #
def _pack_conv1_patches(x, tb):
    """x: (NB*tb, 3, 27, 27) NCHW -> (NB, 81*tb, 27) bf16 with rows ordered (t, j, n).
    Patch K ordering is (c, kh1, kw1), matching PyTorch's (OC, IC, KH, KW) weight layout."""
    nb = x.shape[0] // tb
    p = x.reshape(nb, tb, 3, 3, 3, 3, 3, 3, 3)       # (NB, n, c, oh2, kh2, kh1, ow2, kw2, kw1)
    p = p.transpose(0, 4, 7, 3, 6, 1, 2, 5, 8)       # (NB, kh2, kw2, oh2, ow2, n, c, kh1, kw1)
    return p.reshape(nb, ROWS * tb, K1).astype(jnp.bfloat16)


def prepare_params(params):
    """One-time weight permutation + zero-padding to lane-dense (128-wide) bf16 layouts."""
    w1, b1, w2, b2, wfc, bfc = (params["w1"], params["b1"], params["w2"],
                                params["b2"], params["wfc"], params["bfc"])
    w1p = jnp.zeros((K1, LANES), jnp.bfloat16).at[:, :8].set(
        w1.reshape(8, K1).T.astype(jnp.bfloat16))
    b1p = jnp.zeros((1, LANES), jnp.float32).at[0, :8].set(b1)
    w2p = jnp.zeros((NPOS, LANES, LANES), jnp.bfloat16).at[:, :8, :16].set(
        w2.transpose(2, 3, 1, 0).reshape(NPOS, 8, 16).astype(jnp.bfloat16))   # [t, c, oc]
    b2p = jnp.zeros((1, LANES), jnp.float32).at[0, :16].set(b2)
    wfcp = jnp.zeros((NPOS, LANES, LANES), jnp.bfloat16).at[:, :16, :3].set(
        wfc.reshape(3, 16, NPOS).transpose(2, 1, 0).astype(jnp.bfloat16))     # [j, c, oc]
    bfcp = jnp.zeros((1, LANES), jnp.float32).at[0, :3].set(bfc)
    return {"w1": w1p, "b1": b1p, "w2": w2p, "b2": b2p, "wfc": wfcp, "bfc": bfcp}


def tiny_conv_forward(x, packed, tb=TB):
    """x: (N, 3, 27, 27) float32 NCHW; packed: output of prepare_params. Returns {'out': (N, 3)}."""
    n = x.shape[0]
    n_pad = ((n + tb - 1) // tb) * tb
    if n_pad != n:
        x = jnp.pad(x, ((0, n_pad - n), (0, 0), (0, 0), (0, 0)))
    nb = n_pad // tb
    p1 = _pack_conv1_patches(x, tb)                  # (NB, 81*tb, 27) bf16

    flops = 2 * nb * (ROWS * tb * K1 * LANES
                      + NPOS * NPOS * tb * LANES * LANES
                      + NPOS * tb * LANES * LANES)
    bytes_accessed = (2 * p1.size
                      + 2 * (packed["w1"].size + packed["w2"].size + packed["wfc"].size)
                      + 4 * (packed["b1"].size + packed["b2"].size + packed["bfc"].size)
                      + 4 * n_pad * LANES)

    out_padded = pl.pallas_call(
        _fused_kernel,
        out_shape=jax.ShapeDtypeStruct((n_pad, LANES), jnp.float32),
        grid=(nb,),
        in_specs=[
            pl.BlockSpec((1, ROWS * tb, K1), lambda i: (i, 0, 0)),      # per-block patches
            pl.BlockSpec((K1, LANES), lambda i: (0, 0)),                # w1 (resident)
            pl.BlockSpec((1, LANES), lambda i: (0, 0)),                 # b1
            pl.BlockSpec((NPOS, LANES, LANES), lambda i: (0, 0, 0)),    # w2 stack
            pl.BlockSpec((1, LANES), lambda i: (0, 0)),                 # b2
            pl.BlockSpec((NPOS, LANES, LANES), lambda i: (0, 0, 0)),    # wfc stack
            pl.BlockSpec((1, LANES), lambda i: (0, 0)),                 # bfc
        ],
        out_specs=pl.BlockSpec((tb, LANES), lambda i: (i, 0)),          # lane-dense output
        compiler_params=pltpu.CompilerParams(
            dimension_semantics=("parallel",),
            vmem_limit_bytes=32 * 1024 * 1024),
        cost_estimate=pl.CostEstimate(flops=flops, transcendentals=0,
                                      bytes_accessed=bytes_accessed),
    )(p1, packed["w1"], packed["b1"], packed["w2"], packed["b2"],
      packed["wfc"], packed["bfc"])

    return {"out": out_padded[:n, :3]}


# --------------------------------- reference ----------------------------------- #
def _reference_forward(x, params):
    dn = ("NCHW", "OIHW", "NCHW")
    y1 = jax.lax.conv_general_dilated(x, params["w1"], (3, 3), "VALID",
                                      dimension_numbers=dn)
    y1 = jnp.maximum(y1 + params["b1"][None, :, None, None], 0.0)
    y2 = jax.lax.conv_general_dilated(y1, params["w2"], (3, 3), "VALID",
                                      dimension_numbers=dn)
    y2 = jnp.maximum(y2 + params["b2"][None, :, None, None], 0.0)
    flat = y2.reshape(x.shape[0], -1)
    return flat @ params["wfc"].T + params["bfc"]


def init_params(key):
    k1, k2, k3, k4, k5, k6 = jax.random.split(key, 6)
    return {
        "w1": 0.1 * jax.random.normal(k1, (8, 3, 3, 3), jnp.float32),
        "b1": 0.1 * jax.random.normal(k2, (8,), jnp.float32),
        "w2": 0.1 * jax.random.normal(k3, (16, 8, 3, 3), jnp.float32),
        "b2": 0.1 * jax.random.normal(k4, (16,), jnp.float32),
        "wfc": 0.1 * jax.random.normal(k5, (3, 144), jnp.float32),
        "bfc": 0.1 * jax.random.normal(k6, (3,), jnp.float32),
    }


if __name__ == "__main__":
    key = jax.random.PRNGKey(0)
    pkey, xkey = jax.random.split(key)
    params = init_params(pkey)
    packed = prepare_params(params)      # one-time weight permute/pad/bf16-cast (host-side)
    # Spatial must be 27x27 so the fc sees 16*3*3 features, matching the module.
    x = jax.random.normal(xkey, (2, 3, 27, 27), jnp.float32)

    fwd = jax.jit(tiny_conv_forward)
    out = fwd(x, packed)
    jax.block_until_ready(out["out"])
    assert out["out"].shape == (2, 3)

    ref = _reference_forward(x, params)
    assert jnp.allclose(out["out"], ref, atol=3e-2, rtol=3e-2), "mismatch vs reference"
    print("KERNEL_OK")
</pallas_src>

<mosaic_0001>
module attributes {stable_mosaic.version = 11 : i64} {
  func.func @_fused_kernel(%arg0: i32, %arg1: memref<1x1296x27xbf16, #tpu.memory_space<vmem>>, %arg2: memref<27x128xbf16, #tpu.memory_space<vmem>>, %arg3: memref<1x128xf32, #tpu.memory_space<vmem>>, %arg4: memref<9x128x128xbf16, #tpu.memory_space<vmem>>, %arg5: memref<1x128xf32, #tpu.memory_space<vmem>>, %arg6: memref<9x128x128xbf16, #tpu.memory_space<vmem>>, %arg7: memref<1x128xf32, #tpu.memory_space<vmem>>, %arg8: memref<16x128xf32, #tpu.memory_space<vmem>>) attributes {dimension_semantics = [#tpu.dimension_semantics<parallel>], iteration_bounds = array<i64: 1>, scalar_prefetch = 0 : i64, scratch_operands = 0 : i64, tpu.core_type = #tpu.core_type<tc>, window_params = [{transform_indices = @transform_0, window_bounds = array<i64: 1, 1296, 27>}, {pipeline_mode = #tpu.pipeline_mode<synchronous>, transform_indices = @transform_1, window_bounds = array<i64: 27, 128>}, {pipeline_mode = #tpu.pipeline_mode<synchronous>, transform_indices = @transform_2, window_bounds = array<i64: 1, 128>}, {pipeline_mode = #tpu.pipeline_mode<synchronous>, transform_indices = @transform_3, window_bounds = array<i64: 9, 128, 128>}, {pipeline_mode = #tpu.pipeline_mode<synchronous>, transform_indices = @transform_4, window_bounds = array<i64: 1, 128>}, {pipeline_mode = #tpu.pipeline_mode<synchronous>, transform_indices = @transform_5, window_bounds = array<i64: 9, 128, 128>}, {pipeline_mode = #tpu.pipeline_mode<synchronous>, transform_indices = @transform_6, window_bounds = array<i64: 1, 128>}, {transform_indices = @transform_7, window_bounds = array<i64: 16, 128>}]} {
    %c0 = arith.constant 0 : index
    %c0_0 = arith.constant 0 : index
    %c0_1 = arith.constant 0 : index
    %0 = vector.load %arg1[%c0, %c0_0, %c0_1] : memref<1x1296x27xbf16, #tpu.memory_space<vmem>>, vector<1x1296x27xbf16>
    %1 = vector.shape_cast %0 : vector<1x1296x27xbf16> to vector<1296x27xbf16>
    %c0_2 = arith.constant 0 : index
    %c0_3 = arith.constant 0 : index
    %2 = vector.load %arg2[%c0_2, %c0_3] : memref<27x128xbf16, #tpu.memory_space<vmem>>, vector<27x128xbf16>
    %cst = arith.constant dense<0.000000e+00> : vector<1296x128xf32>
    %3 = tpu.matmul %1, %2, %cst {dimension_numbers = #tpu.dot_dimension_numbers<[1], [0], [0], [1], [0, 0, 1, 1], [], []>} : vector<1296x27xbf16>, vector<27x128xbf16>, vector<1296x128xf32> -> vector<1296x128xf32>
    %c0_4 = arith.constant 0 : index
    %c0_5 = arith.constant 0 : index
    %4 = vector.load %arg3[%c0_4, %c0_5] : memref<1x128xf32, #tpu.memory_space<vmem>>, vector<1x128xf32>
    %5 = vector.broadcast %4 : vector<1x128xf32> to vector<1296x128xf32>
    %6 = arith.addf %3, %5 : vector<1296x128xf32>
    %cst_6 = arith.constant 0.000000e+00 : f32
    %7 = vector.broadcast %cst_6 : f32 to vector<1296x128xf32>
    %8 = arith.maximumf %6, %7 : vector<1296x128xf32>
    %9 = arith.truncf %8 : vector<1296x128xf32> to vector<1296x128xbf16>
    %cst_7 = arith.constant 0.000000e+00 : f32
    %10 = vector.broadcast %cst_7 : f32 to vector<144x128xf32>
    %11 = vector.extract_strided_slice %9 {offsets = [0, 0], sizes = [144, 128], strides = [1, 1]} : vector<1296x128xbf16> to vector<144x128xbf16>
    %c0_8 = arith.constant 0 : index
    %c0_9 = arith.constant 0 : index
    %c0_10 = arith.constant 0 : index
    %12 = vector.load %arg4[%c0_8, %c0_9, %c0_10] : memref<9x128x128xbf16, #tpu.memory_space<vmem>>, vector<1x128x128xbf16>
    %13 = vector.shape_cast %12 : vector<1x128x128xbf16> to vector<128x128xbf16>
    %cst_11 = arith.constant dense<0.000000e+00> : vector<144x128xf32>
    %14 = tpu.matmul %11, %13, %cst_11 {dimension_numbers = #tpu.dot_dimension_numbers<[1], [0], [0], [1], [0, 0, 1, 1], [], []>} : vector<144x128xbf16>, vector<128x128xbf16>, vector<144x128xf32> -> vector<144x128xf32>
    %15 = arith.addf %10, %14 : vector<144x128xf32>
    %16 = vector.extract_strided_slice %9 {offsets = [144, 0], sizes = [144, 128], strides = [1, 1]} : vector<1296x128xbf16> to vector<144x128xbf16>
    %c1 = arith.constant 1 : index
    %c0_12 = arith.constant 0 : index
    %c0_13 = arith.constant 0 : index
    %17 = vector.load %arg4[%c1, %c0_12, %c0_13] : memref<9x128x128xbf16, #tpu.memory_space<vmem>>, vector<1x128x128xbf16>
    %18 = vector.shape_cast %17 : vector<1x128x128xbf16> to vector<128x128xbf16>
    %cst_14 = arith.constant dense<0.000000e+00> : vector<144x128xf32>
    %19 = tpu.matmul %16, %18, %cst_14 {dimension_numbers = #tpu.dot_dimension_numbers<[1], [0], [0], [1], [0, 0, 1, 1], [], []>} : vector<144x128xbf16>, vector<128x128xbf16>, vector<144x128xf32> -> vector<144x128xf32>
    %20 = arith.addf %15, %19 : vector<144x128xf32>
    %21 = vector.extract_strided_slice %9 {offsets = [288, 0], sizes = [144, 128], strides = [1, 1]} : vector<1296x128xbf16> to vector<144x128xbf16>
    %c2 = arith.constant 2 : index
    %c0_15 = arith.constant 0 : index
    %c0_16 = arith.constant 0 : index
    %22 = vector.load %arg4[%c2, %c0_15, %c0_16] : memref<9x128x128xbf16, #tpu.memory_space<vmem>>, vector<1x128x128xbf16>
    %23 = vector.shape_cast %22 : vector<1x128x128xbf16> to vector<128x128xbf16>
    %cst_17 = arith.constant dense<0.000000e+00> : vector<144x128xf32>
    %24 = tpu.matmul %21, %23, %cst_17 {dimension_numbers = #tpu.dot_dimension_numbers<[1], [0], [0], [1], [0, 0, 1, 1], [], []>} : vector<144x128xbf16>, vector<128x128xbf16>, vector<144x128xf32> -> vector<144x128xf32>
    %25 = arith.addf %20, %24 : vector<144x128xf32>
    %26 = vector.extract_strided_slice %9 {offsets = [432, 0], sizes = [144, 128], strides = [1, 1]} : vector<1296x128xbf16> to vector<144x128xbf16>
    %c3 = arith.constant 3 : index
    %c0_18 = arith.constant 0 : index
    %c0_19 = arith.constant 0 : index
    %27 = vector.load %arg4[%c3, %c0_18, %c0_19] : memref<9x128x128xbf16, #tpu.memory_space<vmem>>, vector<1x128x128xbf16>
    %28 = vector.shape_cast %27 : vector<1x128x128xbf16> to vector<128x128xbf16>
    %cst_20 = arith.constant dense<0.000000e+00> : vector<144x128xf32>
    %29 = tpu.matmul %26, %28, %cst_20 {dimension_numbers = #tpu.dot_dimension_numbers<[1], [0], [0], [1], [0, 0, 1, 1], [], []>} : vector<144x128xbf16>, vector<128x128xbf16>, vector<144x128xf32> -> vector<144x128xf32>
    %30 = arith.addf %25, %29 : vector<144x128xf32>
    %31 = vector.extract_strided_slice %9 {offsets = [576, 0], sizes = [144, 128], strides = [1, 1]} : vector<1296x128xbf16> to vector<144x128xbf16>
    %c4 = arith.constant 4 : index
    %c0_21 = arith.constant 0 : index
    %c0_22 = arith.constant 0 : index
    %32 = vector.load %arg4[%c4, %c0_21, %c0_22] : memref<9x128x128xbf16, #tpu.memory_space<vmem>>, vector<1x128x128xbf16>
    %33 = vector.shape_cast %32 : vector<1x128x128xbf16> to vector<128x128xbf16>
    %cst_23 = arith.constant dense<0.000000e+00> : vector<144x128xf32>
    %34 = tpu.matmul %31, %33, %cst_23 {dimension_numbers = #tpu.dot_dimension_numbers<[1], [0], [0], [1], [0, 0, 1, 1], [], []>} : vector<144x128xbf16>, vector<128x128xbf16>, vector<144x128xf32> -> vector<144x128xf32>
    %35 = arith.addf %30, %34 : vector<144x128xf32>
    %36 = vector.extract_strided_slice %9 {offsets = [720, 0], sizes = [144, 128], strides = [1, 1]} : vector<1296x128xbf16> to vector<144x128xbf16>
    %c5 = arith.constant 5 : index
    %c0_24 = arith.constant 0 : index
    %c0_25 = arith.constant 0 : index
    %37 = vector.load %arg4[%c5, %c0_24, %c0_25] : memref<9x128x128xbf16, #tpu.memory_space<vmem>>, vector<1x128x128xbf16>
    %38 = vector.shape_cast %37 : vector<1x128x128xbf16> to vector<128x128xbf16>
    %cst_26 = arith.constant dense<0.000000e+00> : vector<144x128xf32>
    %39 = tpu.matmul %36, %38, %cst_26 {dimension_numbers = #tpu.dot_dimension_numbers<[1], [0], [0], [1], [0, 0, 1, 1], [], []>} : vector<144x128xbf16>, vector<128x128xbf16>, vector<144x128xf32> -> vector<144x128xf32>
    %40 = arith.addf %35, %39 : vector<144x128xf32>
    %41 = vector.extract_strided_slice %9 {offsets = [864, 0], sizes = [144, 128], strides = [1, 1]} : vector<1296x128xbf16> to vector<144x128xbf16>
    %c6 = arith.constant 6 : index
    %c0_27 = arith.constant 0 : index
    %c0_28 = arith.constant 0 : index
    %42 = vector.load %arg4[%c6, %c0_27, %c0_28] : memref<9x128x128xbf16, #tpu.memory_space<vmem>>, vector<1x128x128xbf16>
    %43 = vector.shape_cast %42 : vector<1x128x128xbf16> to vector<128x128xbf16>
    %cst_29 = arith.constant dense<0.000000e+00> : vector<144x128xf32>
    %44 = tpu.matmul %41, %43, %cst_29 {dimension_numbers = #tpu.dot_dimension_numbers<[1], [0], [0], [1], [0, 0, 1, 1], [], []>} : vector<144x128xbf16>, vector<128x128xbf16>, vector<144x128xf32> -> vector<144x128xf32>
    %45 = arith.addf %40, %44 : vector<144x128xf32>
    %46 = vector.extract_strided_slice %9 {offsets = [1008, 0], sizes = [144, 128], strides = [1, 1]} : vector<1296x128xbf16> to vector<144x128xbf16>
    %c7 = arith.constant 7 : index
    %c0_30 = arith.constant 0 : index
    %c0_31 = arith.constant 0 : index
    %47 = vector.load %arg4[%c7, %c0_30, %c0_31] : memref<9x128x128xbf16, #tpu.memory_space<vmem>>, vector<1x128x128xbf16>
    %48 = vector.shape_cast %47 : vector<1x128x128xbf16> to vector<128x128xbf16>
    %cst_32 = arith.constant dense<0.000000e+00> : vector<144x128xf32>
    %49 = tpu.matmul %46, %48, %cst_32 {dimension_numbers = #tpu.dot_dimension_numbers<[1], [0], [0], [1], [0, 0, 1, 1], [], []>} : vector<144x128xbf16>, vector<128x128xbf16>, vector<144x128xf32> -> vector<144x128xf32>
    %50 = arith.addf %45, %49 : vector<144x128xf32>
    %51 = vector.extract_strided_slice %9 {offsets = [1152, 0], sizes = [144, 128], strides = [1, 1]} : vector<1296x128xbf16> to vector<144x128xbf16>
    %c8 = arith.constant 8 : index
    %c0_33 = arith.constant 0 : index
    %c0_34 = arith.constant 0 : index
    %52 = vector.load %arg4[%c8, %c0_33, %c0_34] : memref<9x128x128xbf16, #tpu.memory_space<vmem>>, vector<1x128x128xbf16>
    %53 = vector.shape_cast %52 : vector<1x128x128xbf16> to vector<128x128xbf16>
    %cst_35 = arith.constant dense<0.000000e+00> : vector<144x128xf32>
    %54 = tpu.matmul %51, %53, %cst_35 {dimension_numbers = #tpu.dot_dimension_numbers<[1], [0], [0], [1], [0, 0, 1, 1], [], []>} : vector<144x128xbf16>, vector<128x128xbf16>, vector<144x128xf32> -> vector<144x128xf32>
    %55 = arith.addf %50, %54 : vector<144x128xf32>
    %c0_36 = arith.constant 0 : index
    %c0_37 = arith.constant 0 : index
    %56 = vector.load %arg5[%c0_36, %c0_37] : memref<1x128xf32, #tpu.memory_space<vmem>>, vector<1x128xf32>
    %57 = vector.broadcast %56 : vector<1x128xf32> to vector<144x128xf32>
    %58 = arith.addf %55, %57 : vector<144x128xf32>
    %cst_38 = arith.constant 0.000000e+00 : f32
    %59 = vector.broadcast %cst_38 : f32 to vector<144x128xf32>
    %60 = arith.maximumf %58, %59 : vector<144x128xf32>
    %61 = arith.truncf %60 : vector<144x128xf32> to vector<144x128xbf16>
    %cst_39 = arith.constant 0.000000e+00 : f32
    %62 = vector.broadcast %cst_39 : f32 to vector<16x128xf32>
    %63 = vector.extract_strided_slice %61 {offsets = [0, 0], sizes = [16, 128], strides = [1, 1]} : vector<144x128xbf16> to vector<16x128xbf16>
    %c0_40 = arith.constant 0 : index
    %c0_41 = arith.constant 0 : index
    %c0_42 = arith.constant 0 : index
    %64 = vector.load %arg6[%c0_40, %c0_41, %c0_42] : memref<9x128x128xbf16, #tpu.memory_space<vmem>>, vector<1x128x128xbf16>
    %65 = vector.shape_cast %64 : vector<1x128x128xbf16> to vector<128x128xbf16>
    %cst_43 = arith.constant dense<0.000000e+00> : vector<16x128xf32>
    %66 = tpu.matmul %63, %65, %cst_43 {dimension_numbers = #tpu.dot_dimension_numbers<[1], [0], [0], [1], [0, 0, 1, 1], [], []>} : vector<16x128xbf16>, vector<128x128xbf16>, vector<16x128xf32> -> vector<16x128xf32>
    %67 = arith.addf %62, %66 : vector<16x128xf32>
    %68 = vector.extract_strided_slice %61 {offsets = [16, 0], sizes = [16, 128], strides = [1, 1]} : vector<144x128xbf16> to vector<16x128xbf16>
    %c1_44 = arith.constant 1 : index
    %c0_45 = arith.constant 0 : index
    %c0_46 = arith.constant 0 : index
    %69 = vector.load %arg6[%c1_44, %c0_45, %c0_46] : memref<9x128x128xbf16, #tpu.memory_space<vmem>>, vector<1x128x128xbf16>
    %70 = vector.shape_cast %69 : vector<1x128x128xbf16> to vector<128x128xbf16>
    %cst_47 = arith.constant dense<0.000000e+00> : vector<16x128xf32>
    %71 = tpu.matmul %68, %70, %cst_47 {dimension_numbers = #tpu.dot_dimension_numbers<[1], [0], [0], [1], [0, 0, 1, 1], [], []>} : vector<16x128xbf16>, vector<128x128xbf16>, vector<16x128xf32> -> vector<16x128xf32>
    %72 = arith.addf %67, %71 : vector<16x128xf32>
    %73 = vector.extract_strided_slice %61 {offsets = [32, 0], sizes = [16, 128], strides = [1, 1]} : vector<144x128xbf16> to vector<16x128xbf16>
    %c2_48 = arith.constant 2 : index
    %c0_49 = arith.constant 0 : index
    %c0_50 = arith.constant 0 : index
    %74 = vector.load %arg6[%c2_48, %c0_49, %c0_50] : memref<9x128x128xbf16, #tpu.memory_space<vmem>>, vector<1x128x128xbf16>
    %75 = vector.shape_cast %74 : vector<1x128x128xbf16> to vector<128x128xbf16>
    %cst_51 = arith.constant dense<0.000000e+00> : vector<16x128xf32>
    %76 = tpu.matmul %73, %75, %cst_51 {dimension_numbers = #tpu.dot_dimension_numbers<[1], [0], [0], [1], [0, 0, 1, 1], [], []>} : vector<16x128xbf16>, vector<128x128xbf16>, vector<16x128xf32> -> vector<16x128xf32>
    %77 = arith.addf %72, %76 : vector<16x128xf32>
    %78 = vector.extract_strided_slice %61 {offsets = [48, 0], sizes = [16, 128], strides = [1, 1]} : vector<144x128xbf16> to vector<16x128xbf16>
    %c3_52 = arith.constant 3 : index
    %c0_53 = arith.constant 0 : index
    %c0_54 = arith.constant 0 : index
    %79 = vector.load %arg6[%c3_52, %c0_53, %c0_54] : memref<9x128x128xbf16, #tpu.memory_space<vmem>>, vector<1x128x128xbf16>
    %80 = vector.shape_cast %79 : vector<1x128x128xbf16> to vector<128x128xbf16>
    %cst_55 = arith.constant dense<0.000000e+00> : vector<16x128xf32>
    %81 = tpu.matmul %78, %80, %cst_55 {dimension_numbers = #tpu.dot_dimension_numbers<[1], [0], [0], [1], [0, 0, 1, 1], [], []>} : vector<16x128xbf16>, vector<128x128xbf16>, vector<16x128xf32> -> vector<16x128xf32>
    %82 = arith.addf %77, %81 : vector<16x128xf32>
    %83 = vector.extract_strided_slice %61 {offsets = [64, 0], sizes = [16, 128], strides = [1, 1]} : vector<144x128xbf16> to vector<16x128xbf16>
    %c4_56 = arith.constant 4 : index
    %c0_57 = arith.constant 0 : index
    %c0_58 = arith.constant 0 : index
    %84 = vector.load %arg6[%c4_56, %c0_57, %c0_58] : memref<9x128x128xbf16, #tpu.memory_space<vmem>>, vector<1x128x128xbf16>
    %85 = vector.shape_cast %84 : vector<1x128x128xbf16> to vector<128x128xbf16>
    %cst_59 = arith.constant dense<0.000000e+00> : vector<16x128xf32>
    %86 = tpu.matmul %83, %85, %cst_59 {dimension_numbers = #tpu.dot_dimension_numbers<[1], [0], [0], [1], [0, 0, 1, 1], [], []>} : vector<16x128xbf16>, vector<128x128xbf16>, vector<16x128xf32> -> vector<16x128xf32>
    %87 = arith.addf %82, %86 : vector<16x128xf32>
    %88 = vector.extract_strided_slice %61 {offsets = [80, 0], sizes = [16, 128], strides = [1, 1]} : vector<144x128xbf16> to vector<16x128xbf16>
    %c5_60 = arith.constant 5 : index
    %c0_61 = arith.constant 0 : index
    %c0_62 = arith.constant 0 : index
    %89 = vector.load %arg6[%c5_60, %c0_61, %c0_62] : memref<9x128x128xbf16, #tpu.memory_space<vmem>>, vector<1x128x128xbf16>
    %90 = vector.shape_cast %89 : vector<1x128x128xbf16> to vector<128x128xbf16>
    %cst_63 = arith.constant dense<0.000000e+00> : vector<16x128xf32>
    %91 = tpu.matmul %88, %90, %cst_63 {dimension_numbers = #tpu.dot_dimension_numbers<[1], [0], [0], [1], [0, 0, 1, 1], [], []>} : vector<16x128xbf16>, vector<128x128xbf16>, vector<16x128xf32> -> vector<16x128xf32>
    %92 = arith.addf %87, %91 : vector<16x128xf32>
    %93 = vector.extract_strided_slice %61 {offsets = [96, 0], sizes = [16, 128], strides = [1, 1]} : vector<144x128xbf16> to vector<16x128xbf16>
    %c6_64 = arith.constant 6 : index
    %c0_65 = arith.constant 0 : index
    %c0_66 = arith.constant 0 : index
    %94 = vector.load %arg6[%c6_64, %c0_65, %c0_66] : memref<9x128x128xbf16, #tpu.memory_space<vmem>>, vector<1x128x128xbf16>
    %95 = vector.shape_cast %94 : vector<1x128x128xbf16> to vector<128x128xbf16>
    %cst_67 = arith.constant dense<0.000000e+00> : vector<16x128xf32>
    %96 = tpu.matmul %93, %95, %cst_67 {dimension_numbers = #tpu.dot_dimension_numbers<[1], [0], [0], [1], [0, 0, 1, 1], [], []>} : vector<16x128xbf16>, vector<128x128xbf16>, vector<16x128xf32> -> vector<16x128xf32>
    %97 = arith.addf %92, %96 : vector<16x128xf32>
    %98 = vector.extract_strided_slice %61 {offsets = [112, 0], sizes = [16, 128], strides = [1, 1]} : vector<144x128xbf16> to vector<16x128xbf16>
    %c7_68 = arith.constant 7 : index
    %c0_69 = arith.constant 0 : index
    %c0_70 = arith.constant 0 : index
    %99 = vector.load %arg6[%c7_68, %c0_69, %c0_70] : memref<9x128x128xbf16, #tpu.memory_space<vmem>>, vector<1x128x128xbf16>
    %100 = vector.shape_cast %99 : vector<1x128x128xbf16> to vector<128x128xbf16>
    %cst_71 = arith.constant dense<0.000000e+00> : vector<16x128xf32>
    %101 = tpu.matmul %98, %100, %cst_71 {dimension_numbers = #tpu.dot_dimension_numbers<[1], [0], [0], [1], [0, 0, 1, 1], [], []>} : vector<16x128xbf16>, vector<128x128xbf16>, vector<16x128xf32> -> vector<16x128xf32>
    %102 = arith.addf %97, %101 : vector<16x128xf32>
    %103 = vector.extract_strided_slice %61 {offsets = [128, 0], sizes = [16, 128], strides = [1, 1]} : vector<144x128xbf16> to vector<16x128xbf16>
    %c8_72 = arith.constant 8 : index
    %c0_73 = arith.constant 0 : index
    %c0_74 = arith.constant 0 : index
    %104 = vector.load %arg6[%c8_72, %c0_73, %c0_74] : memref<9x128x128xbf16, #tpu.memory_space<vmem>>, vector<1x128x128xbf16>
    %105 = vector.shape_cast %104 : vector<1x128x128xbf16> to vector<128x128xbf16>
    %cst_75 = arith.constant dense<0.000000e+00> : vector<16x128xf32>
    %106 = tpu.matmul %103, %105, %cst_75 {dimension_numbers = #tpu.dot_dimension_numbers<[1], [0], [0], [1], [0, 0, 1, 1], [], []>} : vector<16x128xbf16>, vector<128x128xbf16>, vector<16x128xf32> -> vector<16x128xf32>
    %107 = arith.addf %102, %106 : vector<16x128xf32>
    %c0_76 = arith.constant 0 : index
    %c0_77 = arith.constant 0 : index
    %108 = vector.load %arg7[%c0_76, %c0_77] : memref<1x128xf32, #tpu.memory_space<vmem>>, vector<1x128xf32>
    %109 = vector.broadcast %108 : vector<1x128xf32> to vector<16x128xf32>
    %110 = arith.addf %107, %109 : vector<16x128xf32>
    %c0_78 = arith.constant 0 : index
    %c0_79 = arith.constant 0 : index
    %111 = vector.load %arg8[%c0_78, %c0_79] : memref<16x128xf32, #tpu.memory_space<vmem>>, vector<16x128xf32>
    tpu.vector_store %arg8[%c0_78, %c0_79], %110 {strides = array<i32>} : memref<16x128xf32, #tpu.memory_space<vmem>>, vector<16x128xf32>,
    return
  }
  func.func @transform_0(%arg0: i32) -> (i32, i32, i32) {
    %c0_i32 = arith.constant 0 : i32
    %c0_i32_0 = arith.constant 0 : i32
    %c0_i32_1 = arith.constant 0 : i32
    return %arg0, %c0_i32, %c0_i32_0 : i32, i32, i32
  }
  func.func @transform_1(%arg0: i32) -> (i32, i32) {
    %c0_i32 = arith.constant 0 : i32
    %c0_i32_0 = arith.constant 0 : i32
    %c0_i32_1 = arith.constant 0 : i32
    return %c0_i32, %c0_i32_0 : i32, i32
  }
  func.func @transform_2(%arg0: i32) -> (i32, i32) {
    %c0_i32 = arith.constant 0 : i32
    %c0_i32_0 = arith.constant 0 : i32
    %c0_i32_1 = arith.constant 0 : i32
    return %c0_i32, %c0_i32_0 : i32, i32
  }
  func.func @transform_3(%arg0: i32) -> (i32, i32, i32) {
    %c0_i32 = arith.constant 0 : i32
    %c0_i32_0 = arith.constant 0 : i32
    %c0_i32_1 = arith.constant 0 : i32
    %c0_i32_2 = arith.constant 0 : i32
    return %c0_i32, %c0_i32_0, %c0_i32_1 : i32, i32, i32
  }
  func.func @transform_4(%arg0: i32) -> (i32, i32) {
    %c0_i32 = arith.constant 0 : i32
    %c0_i32_0 = arith.constant 0 : i32
    %c0_i32_1 = arith.constant 0 : i32
    return %c0_i32, %c0_i32_0 : i32, i32
  }
  func.func @transform_5(%arg0: i32) -> (i32, i32, i32) {
    %c0_i32 = arith.constant 0 : i32
    %c0_i32_0 = arith.constant 0 : i32
    %c0_i32_1 = arith.constant 0 : i32
    %c0_i32_2 = arith.constant 0 : i32
    return %c0_i32, %c0_i32_0, %c0_i32_1 : i32, i32, i32
  }
  func.func @transform_6(%arg0: i32) -> (i32, i32) {
    %c0_i32 = arith.constant 0 : i32
    %c0_i32_0 = arith.constant 0 : i32
    %c0_i32_1 = arith.constant 0 : i32
    return %c0_i32, %c0_i32_0 : i32, i32
  }
  func.func @transform_7(%arg0: i32) -> (i32, i32) {
    %c0_i32 = arith.constant 0 : i32
    %c0_i32_0 = arith.constant 0 : i32
    return %arg0, %c0_i32 : i32, i32
  }
}

</mosaic_0001>

<bundles_post_ra>
// kernel: tiny_conv_forward.1
= control target key start
LH: loop header
LB: loop body
LE: loop exit
PB: predicated region body
PF: predicated region fallthrough
CT: control target
= control target key end

     0   :  { %vm857_vm0 = vcmask 1044480   ;;  %vm858_vm1 = vcmask 1045504   ;;  %v5616_v2 = vmov 65535   ;;  %vm613_vm2 = vcmask 220160   ;;  %s7192_s1 = inlined_call_operand.vmem [shape: bf16[27,128], index: 1, kind: input, shape index: {}]   ;;  %s7193_s2 = inlined_call_operand.vmem [shape: f32[1,128], index: 2, kind: input, shape index: {}]   ;;  %s7194_s0 = inlined_call_operand.vmem [shape: bf16[1,1296,27], index: 0, kind: input, shape index: {}]   ;;  %s7195_s3 = inlined_call_operand.vmem [shape: bf16[9,128,128], index: 3, kind: input, shape index: {}]   ;;  %s7196_s4 = inlined_call_operand.vmem [shape: f32[1,128], index: 4, kind: input, shape index: {}]   ;;  %s7197_s5 = inlined_call_operand.vmem [shape: bf16[9,128,128], index: 5, kind: input, shape index: {}]   ;;  %s7198_s6 = inlined_call_operand.vmem [shape: f32[1,128], index: 6, kind: input, shape index: {}]   ;;  %s7199_s7 = inlined_call_operand.vmem [shape: f32[16,128], index: 7, kind: output, shape index: {}]  }
   0x1   :  { %v4462_v0 = vld [vmem:[%s7192_s1 + $0x8] sm:$0xf]  ;;  %v5459_v1 = vld [vmem:[%s7192_s1 + $0x8] sm:$0x30]  ;;  %v859_v3 = vsel %vm857_vm0, 4294967295, %v5616_v2  ;;  %v5458_v7 = vld [vmem:[%s7192_s1] sm:$0xff] }
   0x2   :  { %v4463_v4 = vor.u32 %v5459_v1, %v4462_v0  ;;  %v860_v5 = vsel %vm858_vm1, %v859_v3, 0  ;;  %v5377_v8 = vld [vmem:[%s7194_s0] sm:$0xff]  ;;  %v5435_v9 = vld [vmem:[%s7194_s0 + $0x1d0] sm:$0xff]  ;;  %v5378_v10 = vld [vmem:[%s7194_s0 + $0x8] sm:$0xff] }
   0x3   :  { %v5436_v11 = vld [vmem:[%s7194_s0 + $0x1d8] sm:$0xff]  ;;  %v5379_v12 = vld [vmem:[%s7194_s0 + $0x10] sm:$0xff]  ;;  %v5437_v13 = vld [vmem:[%s7194_s0 + $0x1e0] sm:$0xff] }
   0x4   :  { %v862_v6 = vand.u32 %v4463_v4, %v860_v5  ;;  %v5380_v14 = vld [vmem:[%s7194_s0 + $0x18] sm:$0xff]  ;;  %v5438_v15 = vld [vmem:[%s7194_s0 + $0x1e8] sm:$0xff]  ;;  %v5381_v17 = vld [vmem:[%s7194_s0 + $0x20] sm:$0xff] }
   0x5   :  { %v5422_v16 = vld [vmem:[%s7194_s0 + $0x168] sm:$0xff]  ;;  %v5439_v18 = vld [vmem:[%s7194_s0 + $0x1f0] sm:$0xff]  ;;  %v5440_v21 = vld [vmem:[%s7194_s0 + $0x1f8] sm:$0xff] }
   0x6   :  { %870 = vmatpush.bf16.msra.mxu0 %v862_v6  ;;  %5605 = vmatpush.bf16.msra.mxu2 %v862_v6  ;;  %v5423_v19 = vld [vmem:[%s7194_s0 + $0x170] sm:$0xff]  ;;  %v5382_v20 = vld [vmem:[%s7194_s0 + $0x28] sm:$0xff]  ;;  %v5424_v22 = vld [vmem:[%s7194_s0 + $0x178] sm:$0xff] }
   0x7   :  { %5604 = vmatpush.bf16.msra.mxu1 %v862_v6  ;;  %5606 = vmatpush.bf16.msra.mxu3 %v862_v6  ;;  %v5383_v23 = vld [vmem:[%s7194_s0 + $0x30] sm:$0xff]  ;;  %v5441_v24 = vld [vmem:[%s7194_s0 + $0x200] sm:$0xff]  ;;  %v5384_v26 = vld [vmem:[%s7194_s0 + $0x38] sm:$0xff] }
   0x8   :  { %v5425_v25 = vld [vmem:[%s7194_s0 + $0x180] sm:$0xff]  ;;  %v5442_v27 = vld [vmem:[%s7194_s0 + $0x208] sm:$0xff]  ;;  %v5443_v31 = vld [vmem:[%s7194_s0 + $0x210] sm:$0xff] }
   0x9   :  { %v5426_v28 = vld [vmem:[%s7194_s0 + $0x188] sm:$0xff]  ;;  %v5753_v29 = vld [vmem:[%s7193_s2] ss:$0 sm:$0xff]  ;;  %v5427_v33 = vld [vmem:[%s7194_s0 + $0x190] sm:$0xff] }
   0xa   :  { %871 = vmatpush.bf16.msra.mxu0 %v5458_v7  ;;  %5608 = vmatpush.bf16.msra.mxu2 %v5458_v7  ;;  %v5385_v30 = vld [vmem:[%s7194_s0 + $0x40] sm:$0xff]  ;;  %v5386_v45 = vld [vmem:[%s7194_s0 + $0x48] sm:$0xff]  ;;  %v5444_v46 = vld [vmem:[%s7194_s0 + $0x218] sm:$0xff] }
   0xb   :  { %5607 = vmatpush.bf16.msra.mxu1 %v5458_v7  ;;  %5609 = vmatpush.bf16.msra.mxu3 %v5458_v7  ;;  %v5428_v49 = vld [vmem:[%s7194_s0 + $0x198] sm:$0xff]  ;;  %v5466_v53 = vld [vmem:[%s7195_s3 + $0x30] sm:$0xff]  ;;  %v5465_v57 = vld [vmem:[%s7195_s3 + $0x28] sm:$0xff] }
   0xc   :  { %v5467_v50 = vld [vmem:[%s7195_s3 + $0x38] sm:$0xff]  ;;  %v5464_v62 = vld [vmem:[%s7195_s3 + $0x20] sm:$0xff]  ;;  %v5387_v1 = vld [vmem:[%s7194_s0 + $0x50] sm:$0xff] }
   0xd   :  { %4464 = vmatmul.msk.bf16.vlgmr.msra.gmra.mxu0 %vm613_vm2, %v5377_v8  ;;  %4522 = vmatmul.msk.bf16.vlgmr.msra.gmra.mxu2 %vm613_vm2, %v5435_v9  ;;  %v5445_v2 = vld [vmem:[%s7194_s0 + $0x220] sm:$0xff]  ;;  %v5463_v6 = vld [vmem:[%s7195_s3 + $0x18] sm:$0xff]  ;;  %v5462_v9 = vld [vmem:[%s7195_s3 + $0x10] sm:$0xff] }
   0xe   :  { %4509 = vmatmul.msk.bf16.vlgmr.msra.gmra.mxu1 %vm613_vm2, %v5422_v16  ;;  %1893 = vmatpush.bf16.msrb.mxu2 %v5467_v50  ;;  %v5429_v4 = vld [vmem:[%s7194_s0 + $0x1a0] sm:$0xff] }
  0x12   :  { %1894 = vmatpush.bf16.msrb.mxu2 %v5466_v53 }
  0x16   :  { %1895 = vmatpush.bf16.msrb.mxu2 %v5465_v57 }
  0x1a   :  { %1896 = vmatpush.bf16.msrb.mxu2 %v5464_v62 }
  0x1d   :  { %4465 = vmatmul.msk.bf16.gmra.mxu0 %vm613_vm2, %v5378_v10  ;;  %4523 = vmatmul.msk.bf16.gmra.mxu2 %vm613_vm2, %v5436_v11 }
  0x1e   :  { %4510 = vmatmul.msk.bf16.gmra.mxu1 %vm613_vm2, %v5423_v19  ;;  %1897 = vmatpush.bf16.msrb.mxu2 %v5463_v6 }
  0x22   :  { %1898 = vmatpush.bf16.msrb.mxu2 %v5462_v9 }
  0x2d   :  { %4466 = vmatmul.msk.bf16.gmra.mxu0 %vm613_vm2, %v5379_v12  ;;  %4524 = vmatmul.msk.bf16.gmra.mxu2 %vm613_vm2, %v5437_v13  ;;  %v5461_v13 = vld [vmem:[%s7195_s3 + $0x8] sm:$0xff] }
  0x2e   :  { %4511 = vmatmul.msk.bf16.gmra.mxu1 %vm613_vm2, %v5424_v22  ;;  %1899 = vmatpush.bf16.msrb.mxu2 %v5461_v13  ;;  %v5446_v22 = vld [vmem:[%s7194_s0 + $0x228] sm:$0xff] }
  0x3d   :  { %4467 = vmatmul.msk.bf16.gmra.mxu0 %vm613_vm2, %v5380_v14  ;;  %4525 = vmatmul.msk.bf16.gmra.mxu2 %vm613_vm2, %v5438_v15 }
  0x3e   :  { %4512 = vmatmul.msk.bf16.gmra.mxu1 %vm613_vm2, %v5425_v25 }
  0x4d   :  { %4468 = vmatmul.msk.bf16.gmra.mxu0 %vm613_vm2, %v5381_v17  ;;  %4526 = vmatmul.msk.bf16.gmra.mxu2 %vm613_vm2, %v5439_v18  ;;  %v5460_v18 = vld [vmem:[%s7195_s3] sm:$0xff] }
  0x4e   :  { %4513 = vmatmul.msk.bf16.gmra.mxu1 %vm613_vm2, %v5426_v28  ;;  %1900 = vmatpush.bf16.msrb.mxu2 %v5460_v18 }
  0x5d   :  { %4469 = vmatmul.msk.bf16.gmra.mxu0 %vm613_vm2, %v5382_v20  ;;  %4527 = vmatmul.msk.bf16.gmra.mxu2 %vm613_vm2, %v5440_v21  ;;  %v5388_v21 = vld [vmem:[%s7194_s0 + $0x58] sm:$0xff] }
  0x5e   :  { %4514 = vmatmul.msk.bf16.gmra.mxu1 %vm613_vm2, %v5427_v33 }
  0x6d   :  { %4470 = vmatmul.msk.bf16.gmra.mxu0 %vm613_vm2, %v5383_v23  ;;  %4528 = vmatmul.msk.bf16.gmra.mxu2 %vm613_vm2, %v5441_v24  ;;  %v5430_v24 = vld [vmem:[%s7194_s0 + $0x1a8] sm:$0xff] }
  0x6e   :  { %4515 = vmatmul.msk.bf16.gmra.mxu1 %vm613_vm2, %v5428_v49 }
  0x7d   :  { %4471 = vmatmul.msk.bf16.gmra.mxu0 %vm613_vm2, %v5384_v26  ;;  %4529 = vmatmul.msk.bf16.gmra.mxu2 %vm613_vm2, %v5442_v27 }
  0x7e   :  { %4516 = vmatmul.msk.bf16.gmra.mxu1 %vm613_vm2, %v5429_v4 }
  0x8a   :  { %v873_v32 = vpop.f32.mrf.mxu0 }
  0x8b   :  { %v874_v34 = vadd.f32 %v5753_v29, %v873_v32  ;;  %v1098_v27 = vpop.f32.mrf.mxu1 }
  0x8d   :  { %4472 = vmatmul.msk.bf16.gmra.mxu0 %vm613_vm2, %v5385_v30  ;;  %4530 = vmatmul.msk.bf16.gmra.mxu2 %vm613_vm2, %v5443_v31  ;;  %v1278_v36 = vmax.f32 %v874_v34, 0.0  ;;  %v1099_v31 = vadd.f32 %v5753_v29, %v1098_v27 }
  0x8e   :  { %4517 = vmatmul.msk.bf16.gmra.mxu1 %vm613_vm2, %v5430_v24 }
  0x8f   :  { %v1440_v39 = vpack.c.bf16 %v1278_v36, %v1278_v36 }
  0x90   :  { %v5768_v35 = vpop.f32.mrf.mxu2 }
  0x91   :  { %v1809_v43 = vunpack.c.l.b16 %v1440_v39 }
  0x92   :  { %v875_v37 = vpop.f32.mrf.mxu0 }
  0x93   :  { %v876_v38 = vadd.f32 %v5753_v29, %v875_v37  ;;  %v1368_v37 = vmax.f32 %v1099_v31, 0.0 }
  0x95   :  { %v1279_v40 = vmax.f32 %v876_v38, 0.0 }
  0x97   :  { %v1441_v41 = vpack.c.bf16 %v1279_v40, %v1279_v40  ;;  %v1100_v40 = vpop.f32.mrf.mxu1 }
  0x98   :  { %v5771_v42 = vpop.f32.mrf.mxu2 }
  0x99   :  { %v1810_v44 = vunpack.c.l.b16 %v1441_v41 }
  0x9a   :  { %v878_v47 = vpop.f32.mrf.mxu0 }
  0x9b   :  { %v5779_v48 = vpack.c.b16 %v1810_v44, %v1809_v43  ;;  %v879_v51 = vadd.f32 %v5753_v29, %v878_v47  ;;  %v5389_v44 = vld [vmem:[%s7194_s0 + $0x60] sm:$0xff]  ;;  %v1101_v47 = vadd.f32 %v5753_v29, %v1100_v40 }
  0x9d   :  { %4473 = vmatmul.msk.bf16.gmra.mxu0 %vm613_vm2, %v5386_v45  ;;  %4531 = vmatmul.msk.bf16.gmra.mxu2 %vm613_vm2, %v5444_v46  ;;  %v1280_v54 = vmax.f32 %v879_v51, 0.0  ;;  %v5447_v45 = vld [vmem:[%s7194_s0 + $0x230] sm:$0xff]  ;;  %v1530_v46 = vpack.c.bf16 %v1368_v37, %v1368_v37  ;;  %v1369_v50 = vmax.f32 %v1101_v47, 0.0 }
  0x9e   :  { %v5431_v51 = vld [vmem:[%s7194_s0 + $0x1b0] sm:$0xff] }
  0x9f   :  { %v1442_v58 = vpack.c.bf16 %v1280_v54, %v1280_v54  ;;  %4518 = vmatmul.msk.bf16.gmra.mxu1 %vm613_vm2, %v5431_v51 }
  0xa0   :  { %v5791_v52 = vpop.f32.mrf.mxu2 }
  0xa1   :  { %v1811_v63 = vunpack.c.l.b16 %v1442_v58 }
  0xa2   :  { %v880_v55 = vpop.f32.mrf.mxu0 }
  0xa3   :  { %v881_v56 = vadd.f32 %v5753_v29, %v880_v55  ;;  %v2555_v55 = vunpack.c.l.b16 %v1530_v46 }
  0xa5   :  { %v1281_v59 = vmax.f32 %v881_v56, 0.0  ;;  %v1531_v56 = vpack.c.bf16 %v1369_v50, %v1369_v50 }
  0xa7   :  { %v1443_v60 = vpack.c.bf16 %v1281_v59, %v1281_v59  ;;  %v2556_v57 = vunpack.c.l.b16 %v1531_v56 }
  0xa8   :  { %v5800_v61 = vpop.f32.mrf.mxu2 }
  0xa9   :  { %v1812_v0 = vunpack.c.l.b16 %v1443_v60  ;;  %v5876_v60 = vpack.c.b16 %v2556_v57, %v2555_v55  ;;  %v5392_v57 = vld [vmem:[%s7194_s0 + $0x78] sm:$0xff] }
  0xaa   :  { %v883_v3 = vpop.f32.mrf.mxu0 }
  0xab   :  { %v5814_v5 = vpack.c.b16 %v1812_v0, %v1811_v63  ;;  %v884_v7 = vadd.f32 %v5753_v29, %v883_v3 }
  0xad   :  { %4474 = vmatmul.msk.bf16.gmra.mxu0 %vm613_vm2, %v5387_v1  ;;  %4532 = vmatmul.msk.bf16.gmra.mxu2 %vm613_vm2, %v5445_v2  ;;  %v1282_v10 = vmax.f32 %v884_v7, 0.0  ;;  %v5390_v7 = vld [vmem:[%s7194_s0 + $0x68] sm:$0xff] }
  0xaf   :  { %v1444_v14 = vpack.c.bf16 %v1282_v10, %v1282_v10  ;;  %v5432_v10 = vld [vmem:[%s7194_s0 + $0x1b8] sm:$0xff] }
  0xb0   :  { %v5823_v8 = vpop.f32.mrf.mxu2  ;;  %4519 = vmatmul.msk.bf16.gmra.mxu1 %vm613_vm2, %v5432_v10 }
  0xb1   :  { %v1813_v19 = vunpack.c.l.b16 %v1444_v14 }
  0xb2   :  { %v885_v11 = vpop.f32.mrf.mxu0 }
  0xb3   :  { %v886_v12 = vadd.f32 %v5753_v29, %v885_v11 }
  0xb5   :  { %v1283_v15 = vmax.f32 %v886_v12, 0.0 }
  0xb7   :  { %v1445_v16 = vpack.c.bf16 %v1283_v15, %v1283_v15 }
  0xb8   :  { %v5832_v17 = vpop.f32.mrf.mxu2 }
  0xb9   :  { %v1814_v20 = vunpack.c.l.b16 %v1445_v16 }
  0xba   :  { %v888_v23 = vpop.f32.mrf.mxu0 }
  0xbb   :  { %v5846_v25 = vpack.c.b16 %v1814_v20, %v1813_v19  ;;  %v889_v26 = vadd.f32 %v5753_v29, %v888_v23 }
  0xbd   :  { %4475 = vmatmul.msk.bf16.gmra.mxu0 %vm613_vm2, %v5388_v21  ;;  %4533 = vmatmul.msk.bf16.gmra.mxu2 %vm613_vm2, %v5446_v22  ;;  %v1284_v30 = vmax.f32 %v889_v26, 0.0 }
  0xbf   :  { %v1446_v34 = vpack.c.bf16 %v1284_v30, %v1284_v30 }
  0xc0   :  { %v5852_v28 = vpop.f32.mrf.mxu2 }
  0xc1   :  { %v1815_v41 = vunpack.c.l.b16 %v1446_v34 }
  0xc2   :  { %v890_v32 = vpop.f32.mrf.mxu0 }
  0xc3   :  { %v891_v33 = vadd.f32 %v5753_v29, %v890_v32 }
  0xc5   :  { %v1285_v36 = vmax.f32 %v891_v33, 0.0  ;;  %v5433_v33 = vld [vmem:[%s7194_s0 + $0x1c0] sm:$0xff] }
  0xc6   :  { %4520 = vmatmul.msk.bf16.gmra.mxu1 %vm613_vm2, %v5433_v33 }
  0xc7   :  { %v1447_v38 = vpack.c.bf16 %v1285_v36, %v1285_v36  ;;  %v5475_v36 = vld [vmem:[%s7195_s3 + $0x78] sm:$0xff] }
  0xc8   :  { %v5856_v39 = vpop.f32.mrf.mxu2  ;;  %1737 = vmatpush.bf16.msrb.mxu1 %v5475_v36 }
  0xc9   :  { %v1816_v43 = vunpack.c.l.b16 %v1447_v38 }
  0xca   :  { %v893_v49 = vpop.f32.mrf.mxu0 }
  0xcb   :  { %v5868_v53 = vpack.c.b16 %v1816_v43, %v1815_v41  ;;  %v894_v54 = vadd.f32 %v5753_v29, %v893_v49  ;;  %v5474_v43 = vld [vmem:[%s7195_s3 + $0x70] sm:$0xff]  ;;  %v5473_v49 = vld [vmem:[%s7195_s3 + $0x68] sm:$0xff] }
  0xcc   :  { %1738 = vmatpush.bf16.msrb.mxu1 %v5474_v43  ;;  %v5450_v43 = vld [vmem:[%s7194_s0 + $0x248] sm:$0xff] }
  0xcd   :  { %4476 = vmatmul.msk.bf16.gmra.mxu0 %vm613_vm2, %v5389_v44  ;;  %4534 = vmatmul.msk.bf16.gmra.mxu2 %vm613_vm2, %v5447_v45  ;;  %v1286_v59 = vmax.f32 %v894_v54, 0.0  ;;  %v5472_v54 = vld [vmem:[%s7195_s3 + $0x60] sm:$0xff] }
  0xcf   :  { %v1448_v0 = vpack.c.bf16 %v1286_v59, %v1286_v59 }
  0xd0   :  { %v5874_v58 = vpop.f32.mrf.mxu2  ;;  %1739 = vmatpush.bf16.msrb.mxu1 %v5473_v49 }
  0xd1   :  { %v1817_v4 = vunpack.c.l.b16 %v1448_v0 }
  0xd2   :  { %v895_v62 = vpop.f32.mrf.mxu0 }
  0xd3   :  { %v896_v63 = vadd.f32 %v5753_v29, %v895_v62  ;;  %v5434_v62 = vld [vmem:[%s7194_s0 + $0x1c8] sm:$0xff] }
  0xd4   :  { %1740 = vmatpush.bf16.msrb.mxu1 %v5472_v54 }
  0xd5   :  { %v1287_v1 = vmax.f32 %v896_v63, 0.0  ;;  %v5448_v63 = vld [vmem:[%s7194_s0 + $0x238] sm:$0xff] }
  0xd6   :  { %4521 = vmatmul.msk.bf16.gmra.mxu1 %vm613_vm2, %v5434_v62  ;;  %4535 = vmatmul.msk.bf16.vlgmr.msra.gmra.mxu3 %vm613_vm2, %v5448_v63 }
  0xd7   :  { %v1449_v2 = vpack.c.bf16 %v1287_v1, %v1287_v1  ;;  %v5471_v1 = vld [vmem:[%s7195_s3 + $0x58] sm:$0xff] }
  0xd8   :  { %v5879_v3 = vpop.f32.mrf.mxu2  ;;  %1741 = vmatpush.bf16.msrb.mxu1 %v5471_v1 }
  0xd9   :  { %v1818_v6 = vunpack.c.l.b16 %v1449_v2 }
  0xda   :  { %v898_v9 = vpop.f32.mrf.mxu0 }
  0xdb   :  { %v5887_v11 = vpack.c.b16 %v1818_v6, %v1817_v4  ;;  %v899_v12 = vadd.f32 %v5753_v29, %v898_v9  ;;  %v5470_v4 = vld [vmem:[%s7195_s3 + $0x50] sm:$0xff]  ;;  %v5945_v9 = vpop.f32.mrf.mxu1 }
  0xdc   :  { %1742 = vmatpush.bf16.msrb.mxu1 %v5470_v4 }
  0xdd   :  { %4477 = vmatmul.msk.bf16.gmra.mxu0 %vm613_vm2, %v5390_v7  ;;  %1901 = vmatmul.bf16.vlgmr.msrb.gmra.mxu2 %v5779_v48  ;;  %v1288_v14 = vmax.f32 %v899_v12, 0.0  ;;  %v5391_v48 = vld [vmem:[%s7194_s0 + $0x70] sm:$0xff] }
  0xdf   :  { %v1450_v19 = vpack.c.bf16 %v1288_v14, %v1288_v14 }
  0xe0   :  { %v1188_v13 = vpop.f32.mrf.mxu2 }
  0xe1   :  { %v1189_v15 = vadd.f32 %v5753_v29, %v1188_v13  ;;  %v1819_v24 = vunpack.c.l.b16 %v1450_v19  ;;  %v5393_v19 = vld [vmem:[%s7194_s0 + $0x80] sm:$0xff] }
  0xe2   :  { %v900_v16 = vpop.f32.mrf.mxu0 }
  0xe3   :  { %v901_v18 = vadd.f32 %v5753_v29, %v900_v16  ;;  %v1404_v20 = vmax.f32 %v1189_v15, 0.0  ;;  %v5468_v15 = vld [vmem:[%s7195_s3 + $0x40] sm:$0xff] }
  0xe5   :  { %v1289_v21 = vmax.f32 %v901_v18, 0.0  ;;  %v1566_v26 = vpack.c.bf16 %v1404_v20, %v1404_v20 }
  0xe7   :  { %v1451_v22 = vpack.c.bf16 %v1289_v21, %v1289_v21  ;;  %v2937_v37 = vunpack.c.l.b16 %v1566_v26  ;;  %v5449_v21 = vld [vmem:[%s7194_s0 + $0x240] sm:$0xff] }
  0xe8   :  { %v1190_v23 = vpop.f32.mrf.mxu2  ;;  %4536 = vmatmul.msk.bf16.gmra.mxu3 %vm613_vm2, %v5449_v21  ;;  %v5452_v21 = vld [vmem:[%s7194_s0 + $0x258] sm:$0xff] }
  0xe9   :  { %v1820_v27 = vunpack.c.l.b16 %v1451_v22  ;;  %v1191_v30 = vadd.f32 %v5753_v29, %v1190_v23  ;;  %v5962_v23 = vpop.f32.mrf.mxu1 }
  0xea   :  { %v903_v31 = vpop.f32.mrf.mxu0 }
  0xeb   :  { %v1405_v32 = vmax.f32 %v1191_v30, 0.0  ;;  %v5902_v34 = vpack.c.b16 %v1820_v27, %v1819_v24  ;;  %v904_v40 = vadd.f32 %v5753_v29, %v903_v31 }
  0xed   :  { %v1567_v38 = vpack.c.bf16 %v1405_v32, %v1405_v32  ;;  %4478 = vmatmul.msk.bf16.gmra.mxu0 %vm613_vm2, %v5391_v48  ;;  %1906 = vmatmul.bf16.gmra.mxu2 %v5814_v5  ;;  %v1290_v45 = vmax.f32 %v904_v40, 0.0  ;;  %v5394_v40 = vld [vmem:[%s7194_s0 + $0x88] sm:$0xff] }
  0xef   :  { %v2938_v41 = vunpack.c.l.b16 %v1567_v38  ;;  %v1452_v5 = vpack.c.bf16 %v1290_v45, %v1290_v45 }
  0xf0   :  { %v5971_v36 = vpop.f32.mrf.mxu2 }
  0xf1   :  { %v5914_v44 = vpack.c.b16 %v2938_v41, %v2937_v37  ;;  %v1821_v55 = vunpack.c.l.b16 %v1452_v5  ;;  %v5969_v32 = vpop.f32.mrf.mxu1 }
  0xf2   :  { %v905_v46 = vpop.f32.mrf.mxu0 }
  0xf3   :  { %7200 = vst [vmem:[#allocation2_spill] sm:$0xff] %v5914_v44  ;;  %v906_v47 = vadd.f32 %v5753_v29, %v905_v46 }
  0xf5   :  { %v1291_v50 = vmax.f32 %v906_v47, 0.0 }
  0xf7   :  { %v1453_v51 = vpack.c.bf16 %v1291_v50, %v1291_v50 }
  0xf8   :  { %4537 = vmatmul.msk.bf16.gmra.mxu3 %vm613_vm2, %v5450_v43  ;;  %v5987_v49 = vpop.f32.mrf.mxu2 }
  0xf9   :  { %v1822_v56 = vunpack.c.l.b16 %v1453_v51  ;;  %v5985_v46 = vpop.f32.mrf.mxu1 }
  0xfa   :  { %v908_v59 = vpop.f32.mrf.mxu0 }
  0xfb   :  { %v5932_v0 = vpack.c.b16 %v1822_v56, %v1821_v55  ;;  %v909_v2 = vadd.f32 %v5753_v29, %v908_v59  ;;  %v5395_v59 = vld [vmem:[%s7194_s0 + $0x90] sm:$0xff] }
  0xfd   :  { %4479 = vmatmul.msk.bf16.gmra.mxu0 %vm613_vm2, %v5392_v57  ;;  %1911 = vmatmul.bf16.gmra.mxu2 %v5846_v25  ;;  %v1292_v6 = vmax.f32 %v909_v2, 0.0  ;;  %v5469_v25 = vld [vmem:[%s7195_s3 + $0x48] sm:$0xff]  ;;  %v5451_v2 = vld [vmem:[%s7194_s0 + $0x250] sm:$0xff] }
  0xfe   :  { %1743 = vmatpush.bf16.msrb.mxu1 %v5469_v25 }
  0xff   :  { %v1454_v12 = vpack.c.bf16 %v1292_v6, %v1292_v6 }
 0x100   :  { %v5995_v1 = vpop.f32.mrf.mxu2 }
 0x101   :  { %v1823_v16 = vunpack.c.l.b16 %v1454_v12  ;;  %v5993_v62 = vpop.f32.mrf.mxu1 }
 0x102   :  { %v910_v7 = vpop.f32.mrf.mxu0  ;;  %1744 = vmatpush.bf16.msrb.mxu1 %v5468_v15 }
 0x103   :  { %v911_v10 = vadd.f32 %v5753_v29, %v910_v7 }
 0x105   :  { %v1293_v13 = vmax.f32 %v911_v10, 0.0 }
 0x107   :  { %v1455_v14 = vpack.c.bf16 %v1293_v13, %v1293_v13 }
 0x108   :  { %4538 = vmatmul.msk.bf16.gmra.mxu3 %vm613_vm2, %v5451_v2 }
 0x109   :  { %v1824_v18 = vunpack.c.l.b16 %v1455_v14  ;;  %v6005_v25 = vpop.f32.mrf.mxu1  ;;  %v6007_v14 = vpop.f32.mrf.mxu2 }
 0x10a   :  { %v913_v20 = vpop.f32.mrf.mxu0 }
 0x10b   :  { %v5960_v22 = vpack.c.b16 %v1824_v18, %v1823_v16  ;;  %v914_v24 = vadd.f32 %v5753_v29, %v913_v20 }
 0x10d   :  { %4480 = vmatmul.msk.bf16.gmra.mxu0 %vm613_vm2, %v5393_v19  ;;  %1916 = vmatmul.bf16.gmra.mxu2 %v5868_v53  ;;  %v1294_v26 = vmax.f32 %v914_v24, 0.0  ;;  %v5396_v19 = vld [vmem:[%s7194_s0 + $0x98] sm:$0xff] }
 0x10f   :  { %v1456_v48 = vpack.c.bf16 %v1294_v26, %v1294_v26 }
 0x111   :  { %v1825_v37 = vunpack.c.l.b16 %v1456_v48  ;;  %v6019_v26 = vpop.f32.mrf.mxu1 }
 0x112   :  { %v915_v27 = vpop.f32.mrf.mxu0 }
 0x113   :  { %v916_v30 = vadd.f32 %v5753_v29, %v915_v27  ;;  %v6021_v27 = vpop.f32.mrf.mxu2 }
 0x115   :  { %v1295_v31 = vmax.f32 %v916_v30, 0.0 }
 0x117   :  { %v1457_v33 = vpack.c.bf16 %v1295_v31, %v1295_v31 }
 0x118   :  { %4539 = vmatmul.msk.bf16.gmra.mxu3 %vm613_vm2, %v5452_v21 }
 0x119   :  { %v1826_v38 = vunpack.c.l.b16 %v1457_v33 }
 0x11a   :  { %v918_v53 = vpop.f32.mrf.mxu0 }
 0x11b   :  { %v5976_v41 = vpack.c.b16 %v1826_v38, %v1825_v37  ;;  %v919_v45 = vadd.f32 %v5753_v29, %v918_v53 }
 0x11d   :  { %4481 = vmatmul.msk.bf16.gmra.mxu0 %vm613_vm2, %v5394_v40  ;;  %1921 = vmatmul.bf16.gmra.mxu2 %v5887_v11  ;;  %v1296_v47 = vmax.f32 %v919_v45, 0.0  ;;  %v6024_v40 = vpop.f32.mrf.mxu1  ;;  %v6029_v45 = vpop.f32.mrf.mxu2 }
 0x11f   :  { %v1458_v51 = vpack.c.bf16 %v1296_v47, %v1296_v47 }
 0x121   :  { %v1653_v56 = vunpack.c.l.b16 %v1458_v51 }
 0x122   :  { %v920_v5 = vpop.f32.mrf.mxu0 }
 0x123   :  { %v921_v50 = vadd.f32 %v5753_v29, %v920_v5 }
 0x125   :  { %v1297_v54 = vmax.f32 %v921_v50, 0.0  ;;  %v5453_v50 = vld [vmem:[%s7194_s0 + $0x260] sm:$0xff] }
 0x127   :  { %v1459_v55 = vpack.c.bf16 %v1297_v54, %v1297_v54 }
 0x128   :  { %4540 = vmatmul.msk.bf16.gmra.mxu3 %vm613_vm2, %v5453_v50 }
 0x129   :  { %v1654_v57 = vunpack.c.l.b16 %v1459_v55 }
 0x12a   :  { %v923_v11 = vpop.f32.mrf.mxu0 }
 0x12b   :  { %v1671_v63 = vpack.c.b16 %v1654_v57, %v1653_v56  ;;  %v924_v4 = vadd.f32 %v5753_v29, %v923_v11  ;;  %v6038_v56 = vpop.f32.mrf.mxu1 }
 0x12d   :  { %4482 = vmatmul.msk.bf16.gmra.mxu0 %vm613_vm2, %v5395_v59  ;;  %1745 = vmatmul.bf16.vlgmr.msrb.gmra.mxu1 %v1671_v63  ;;  %v1298_v6 = vmax.f32 %v924_v4, 0.0  ;;  %v6041_v59 = vpop.f32.mrf.mxu2 }
 0x12e   :  { %1926 = vmatmul.bf16.gmra.mxu2 %v5902_v34 }
 0x12f   :  { %v1460_v12 = vpack.c.bf16 %v1298_v6, %v1298_v6 }
 0x131   :  { %v1655_v16 = vunpack.c.l.b16 %v1460_v12  ;;  %v5454_v12 = vld [vmem:[%s7194_s0 + $0x268] sm:$0xff] }
 0x132   :  { %v925_v7 = vpop.f32.mrf.mxu0 }
 0x133   :  { %v926_v10 = vadd.f32 %v5753_v29, %v925_v7  ;;  %v5398_v7 = vld [vmem:[%s7194_s0 + $0xa8] sm:$0xff] }
 0x135   :  { %v1299_v13 = vmax.f32 %v926_v10, 0.0 }
 0x137   :  { %v1461_v15 = vpack.c.bf16 %v1299_v13, %v1299_v13  ;;  %v6049_v13 = vpop.f32.mrf.mxu1 }
 0x138   :  { %4541 = vmatmul.msk.bf16.gmra.mxu3 %vm613_vm2, %v5454_v12 }
 0x139   :  { %v1656_v18 = vunpack.c.l.b16 %v1461_v15 }
 0x13a   :  { %v928_v34 = vpop.f32.mrf.mxu0 }
 0x13b   :  { %v1672_v20 = vpack.c.b16 %v1656_v18, %v1655_v16  ;;  %v929_v24 = vadd.f32 %v5753_v29, %v928_v34  ;;  %v6053_v16 = vpop.f32.mrf.mxu2 }
 0x13d   :  { %4483 = vmatmul.msk.bf16.gmra.mxu0 %vm613_vm2, %v5396_v19  ;;  %1750 = vmatmul.bf16.gmra.mxu1 %v1672_v20  ;;  %v1300_v30 = vmax.f32 %v929_v24, 0.0 }
 0x13e   :  { %1931 = vmatmul.bf16.gmra.mxu2 %v5932_v0  ;;  %v5397_v0 = vld [vmem:[%s7194_s0 + $0xa0] sm:$0xff] }
 0x13f   :  { %v1462_v33 = vpack.c.bf16 %v1300_v30, %v1300_v30  ;;  %v6058_v24 = vpop.f32.mrf.mxu1 }
 0x141   :  { %v1657_v53 = vunpack.c.l.b16 %v1462_v33  ;;  %v5399_v33 = vld [vmem:[%s7194_s0 + $0xb0] sm:$0xff] }
 0x142   :  { %v930_v48 = vpop.f32.mrf.mxu0 }
 0x143   :  { %v931_v31 = vadd.f32 %v5753_v29, %v930_v48 }
 0x145   :  { %v1301_v37 = vmax.f32 %v931_v31, 0.0 }
 0x147   :  { %v1463_v38 = vpack.c.bf16 %v1301_v37, %v1301_v37 }
 0x149   :  { %v1658_v43 = vunpack.c.l.b16 %v1463_v38 }
 0x14a   :  { %v933_v47 = vpop.f32.mrf.mxu0 }
 0x14b   :  { %v1673_v5 = vpack.c.b16 %v1658_v43, %v1657_v53  ;;  %v934_v51 = vadd.f32 %v5753_v29, %v933_v47  ;;  %v6069_v43 = vpop.f32.mrf.mxu1 }
 0x14d   :  { %4484 = vmatmul.msk.bf16.gmra.mxu0 %vm613_vm2, %v5397_v0  ;;  %1755 = vmatmul.bf16.gmra.mxu1 %v1673_v5  ;;  %v1302_v54 = vmax.f32 %v934_v51, 0.0 }
 0x14e   :  { %1936 = vmatmul.bf16.gmra.mxu2 %v5960_v22 }
 0x14f   :  { %v1464_v11 = vpack.c.bf16 %v1302_v54, %v1302_v54 }
 0x151   :  { %v1659_v4 = vunpack.c.l.b16 %v1464_v11  ;;  %v5400_v11 = vld [vmem:[%s7194_s0 + $0xb8] sm:$0xff] }
 0x152   :  { %v935_v55 = vpop.f32.mrf.mxu0 }
 0x153   :  { %v936_v57 = vadd.f32 %v5753_v29, %v935_v55 }
 0x155   :  { %v1303_v63 = vmax.f32 %v936_v57, 0.0 }
 0x157   :  { %v1465_v2 = vpack.c.bf16 %v1303_v63, %v1303_v63 }
 0x159   :  { %v1660_v6 = vunpack.c.l.b16 %v1465_v2  ;;  %v6075_v2 = vpop.f32.mrf.mxu1  ;;  %v6086_v12 = vpop.f32.mrf.mxu3 }
 0x15a   :  { %v938_v22 = vpop.f32.mrf.mxu0  ;;  %7201 = vst [vmem:[#allocation3_spill] sm:$0xff] %v6086_v12 }
 0x15b   :  { %v1674_v10 = vpack.c.b16 %v1660_v6, %v1659_v4  ;;  %v939_v15 = vadd.f32 %v5753_v29, %v938_v22  ;;  %v5456_v6 = vld [vmem:[%s7194_s0 + $0x278] sm:$0xff] }
 0x15c   :  { %v5483_v22 = vld [vmem:[%s7195_s3 + $0xb8] sm:$0xff] }
 0x15d   :  { %4485 = vmatmul.msk.bf16.gmra.mxu0 %vm613_vm2, %v5398_v7  ;;  %1760 = vmatmul.bf16.gmra.mxu1 %v1674_v10  ;;  %v1304_v18 = vmax.f32 %v939_v15, 0.0  ;;  %v5482_v15 = vld [vmem:[%s7195_s3 + $0xb0] sm:$0xff] }
 0x15e   :  { %1941 = vmatmul.bf16.gmra.mxu2 %v5976_v41  ;;  %v5455_v41 = vld [vmem:[%s7194_s0 + $0x270] sm:$0xff]  ;;  %2066 = vmatpush.bf16.msrb.mxu3 %v5483_v22 }
 0x15f   :  { %v1466_v20 = vpack.c.bf16 %v1304_v18, %v1304_v18  ;;  %4542 = vmatmul.msk.bf16.gmra.mxu3 %vm613_vm2, %v5455_v41  ;;  %v5480_v41 = vld [vmem:[%s7195_s3 + $0xa0] sm:$0xff] }
 0x161   :  { %v1661_v48 = vunpack.c.l.b16 %v1466_v20 }
 0x162   :  { %v940_v19 = vpop.f32.mrf.mxu0  ;;  %2067 = vmatpush.bf16.msrb.mxu3 %v5482_v15 }
 0x163   :  { %v941_v34 = vadd.f32 %v5753_v29, %v940_v19 }
 0x165   :  { %v1305_v21 = vmax.f32 %v941_v34, 0.0  ;;  %v6092_v34 = vpop.f32.mrf.mxu1 }
 0x167   :  { %v1467_v30 = vpack.c.bf16 %v1305_v21, %v1305_v21 }
 0x169   :  { %v1662_v31 = vunpack.c.l.b16 %v1467_v30  ;;  %v5481_v30 = vld [vmem:[%s7195_s3 + $0xa8] sm:$0xff] }
 0x16a   :  { %v943_v37 = vpop.f32.mrf.mxu0  ;;  %2068 = vmatpush.bf16.msrb.mxu3 %v5481_v30 }
 0x16b   :  { %v1675_v38 = vpack.c.b16 %v1662_v31, %v1661_v48  ;;  %v944_v53 = vadd.f32 %v5753_v29, %v943_v37  ;;  %v5401_v37 = vld [vmem:[%s7194_s0 + $0xc0] sm:$0xff] }
 0x16d   :  { %4486 = vmatmul.msk.bf16.gmra.mxu0 %vm613_vm2, %v5399_v33  ;;  %1765 = vmatmul.bf16.gmra.mxu1 %v1675_v38  ;;  %v1306_v0 = vmax.f32 %v944_v53, 0.0  ;;  %v6100_v38 = vpop.f32.mrf.mxu3 }
 0x16e   :  { %7202 = vst [vmem:[#allocation4_spill] sm:$0xff] %v6100_v38  ;;  %2069 = vmatpush.bf16.msrb.mxu3 %v5480_v41 }
 0x16f   :  { %v1468_v50 = vpack.c.bf16 %v1306_v0, %v1306_v0  ;;  %4543 = vmatmul.msk.bf16.gmra.mxu3 %vm613_vm2, %v5456_v6 }
 0x171   :  { %v1663_v55 = vunpack.c.l.b16 %v1468_v50  ;;  %v5479_v50 = vld [vmem:[%s7195_s3 + $0x98] sm:$0xff] }
 0x172   :  { %v945_v47 = vpop.f32.mrf.mxu0  ;;  %2070 = vmatpush.bf16.msrb.mxu3 %v5479_v50 }
 0x173   :  { %v946_v5 = vadd.f32 %v5753_v29, %v945_v47  ;;  %v5457_v47 = vld [vmem:[%s7194_s0 + $0x280] sm:$0xff] }
 0x175   :  { %v1307_v51 = vmax.f32 %v946_v5, 0.0 }
 0x177   :  { %v1469_v54 = vpack.c.bf16 %v1307_v51, %v1307_v51  ;;  %v6114_v51 = vpop.f32.mrf.mxu1 }
 0x179   :  { %v1664_v57 = vunpack.c.l.b16 %v1469_v54 }
 0x17a   :  { %v948_v63 = vpop.f32.mrf.mxu0 }
 0x17b   :  { %v1676_v4 = vpack.c.b16 %v1664_v57, %v1663_v55  ;;  %v949_v7 = vadd.f32 %v5753_v29, %v948_v63  ;;  %v6116_v55 = vpop.f32.mrf.mxu3  ;;  %v5478_v57 = vld [vmem:[%s7195_s3 + $0x90] sm:$0xff] }
 0x17c   :  { %2071 = vmatpush.bf16.msrb.mxu3 %v5478_v57 }
 0x17d   :  { %4487 = vmatmul.msk.bf16.gmra.mxu0 %vm613_vm2, %v5400_v11  ;;  %1770 = vmatmul.bf16.gmra.mxu1 %v1676_v4  ;;  %v1308_v10 = vmax.f32 %v949_v7, 0.0  ;;  %v5477_v7 = vld [vmem:[%s7195_s3 + $0x88] sm:$0xff] }
 0x17f   :  { %v1470_v20 = vpack.c.bf16 %v1308_v10, %v1308_v10  ;;  %4544 = vmatmul.msk.bf16.gmra.mxu3 %vm613_vm2, %v5457_v47  ;;  %v6125_v10 = vpop.f32.mrf.mxu1 }
 0x180   :  { %2072 = vmatpush.bf16.msrb.mxu3 %v5477_v7 }
 0x181   :  { %v1665_v31 = vunpack.c.l.b16 %v1470_v20 }
 0x182   :  { %v950_v18 = vpop.f32.mrf.mxu0 }
 0x183   :  { %v951_v19 = vadd.f32 %v5753_v29, %v950_v18  ;;  %v6130_v20 = vpop.f32.mrf.mxu3 }
 0x185   :  { %v1309_v21 = vmax.f32 %v951_v19, 0.0  ;;  %v5402_v19 = vld [vmem:[%s7194_s0 + $0xc8] sm:$0xff] }
 0x187   :  { %v1471_v48 = vpack.c.bf16 %v1309_v21, %v1309_v21  ;;  %v5476_v21 = vld [vmem:[%s7195_s3 + $0x80] sm:$0xff] }
 0x188   :  { %2073 = vmatpush.bf16.msrb.mxu3 %v5476_v21 }
 0x189   :  { %v1666_v33 = vunpack.c.l.b16 %v1471_v48 }
 0x18a   :  { %v953_v53 = vpop.f32.mrf.mxu0 }
 0x18b   :  { %v1677_v0 = vpack.c.b16 %v1666_v33, %v1665_v31  ;;  %v954_v5 = vadd.f32 %v5753_v29, %v953_v53  ;;  %v6139_v53 = vpop.f32.mrf.mxu1 }
 0x18d   :  { %4488 = vmatmul.msk.bf16.gmra.mxu0 %vm613_vm2, %v5401_v37  ;;  %1775 = vmatmul.bf16.gmra.mxu1 %v1677_v0  ;;  %v1310_v54 = vmax.f32 %v954_v5, 0.0  ;;  %v6137_v37 = vpop.f32.mrf.mxu3 }
 0x18f   :  { %v1472_v4 = vpack.c.bf16 %v1310_v54, %v1310_v54 }
 0x191   :  { %v1667_v15 = vunpack.c.l.b16 %v1472_v4 }
 0x192   :  { %v955_v11 = vpop.f32.mrf.mxu0 }
 0x193   :  { %v956_v63 = vadd.f32 %v5753_v29, %v955_v11  ;;  %v5403_v11 = vld [vmem:[%s7194_s0 + $0xd0] sm:$0xff]  ;;  %v6147_v7 = vpop.f32.mrf.mxu1 }
 0x195   :  { %v1311_v6 = vmax.f32 %v956_v63, 0.0  ;;  %v6145_v4 = vpop.f32.mrf.mxu3 }
 0x197   :  { %v1473_v22 = vpack.c.bf16 %v1311_v6, %v1311_v6 }
 0x199   :  { %v1668_v18 = vunpack.c.l.b16 %v1473_v22 }
 0x19a   :  { %v958_v30 = vpop.f32.mrf.mxu0 }
 0x19b   :  { %v1678_v48 = vpack.c.b16 %v1668_v18, %v1667_v15  ;;  %v959_v31 = vadd.f32 %v5753_v29, %v958_v30 }
 0x19d   :  { %4489 = vmatmul.msk.bf16.gmra.mxu0 %vm613_vm2, %v5402_v19  ;;  %1780 = vmatmul.bf16.gmra.mxu1 %v1678_v48  ;;  %v1312_v33 = vmax.f32 %v959_v31, 0.0  ;;  %v6152_v21 = vpop.f32.mrf.mxu3 }
 0x19f   :  { %v1474_v47 = vpack.c.bf16 %v1312_v33, %v1312_v33 }
 0x1a1   :  { %v1669_v54 = vunpack.c.l.b16 %v1474_v47 }
 0x1a2   :  { %v960_v41 = vpop.f32.mrf.mxu0 }
 0x1a3   :  { %v961_v0 = vadd.f32 %v5753_v29, %v960_v41 }
 0x1a5   :  { %v1313_v5 = vmax.f32 %v961_v0, 0.0  ;;  %v5404_v0 = vld [vmem:[%s7194_s0 + $0xd8] sm:$0xff] }
 0x1a7   :  { %v1475_v50 = vpack.c.bf16 %v1313_v5, %v1313_v5 }
 0x1a9   :  { %v1670_v57 = vunpack.c.l.b16 %v1475_v50 }
 0x1aa   :  { %v963_v63 = vpop.f32.mrf.mxu0 }
 0x1ab   :  { %v1679_v6 = vpack.c.b16 %v1670_v57, %v1669_v54  ;;  %v964_v22 = vadd.f32 %v5753_v29, %v963_v63  ;;  %v6159_v54 = vpop.f32.mrf.mxu3 }
 0x1ad   :  { %4490 = vmatmul.msk.bf16.gmra.mxu0 %vm613_vm2, %v5403_v11  ;;  %1785 = vmatmul.bf16.gmra.mxu1 %v1679_v6  ;;  %v1314_v15 = vmax.f32 %v964_v22, 0.0 }
 0x1af   :  { %v1476_v30 = vpack.c.bf16 %v1314_v15, %v1314_v15 }
 0x1b1   :  { %v1982_v33 = vunpack.c.l.b16 %v1476_v30 }
 0x1b2   :  { %v965_v18 = vpop.f32.mrf.mxu0 }
 0x1b3   :  { %v966_v19 = vadd.f32 %v5753_v29, %v965_v18  ;;  %v6162_v18 = vpop.f32.mrf.mxu3 }
 0x1b4   :  { %7203 = vst [vmem:[#allocation5_spill] sm:$0xff] %v6162_v18 }
 0x1b5   :  { %v1315_v48 = vmax.f32 %v966_v19, 0.0 }
 0x1b7   :  { %v1477_v31 = vpack.c.bf16 %v1315_v48, %v1315_v48  ;;  %v5405_v48 = vld [vmem:[%s7194_s0 + $0xe0] sm:$0xff] }
 0x1b9   :  { %v1983_v41 = vunpack.c.l.b16 %v1477_v31 }
 0x1ba   :  { %v968_v47 = vpop.f32.mrf.mxu0 }
 0x1bb   :  { %v2000_v5 = vpack.c.b16 %v1983_v41, %v1982_v33  ;;  %v969_v50 = vadd.f32 %v5753_v29, %v968_v47 }
 0x1bd   :  { %4491 = vmatmul.msk.bf16.gmra.mxu0 %vm613_vm2, %v5404_v0  ;;  %2074 = vmatmul.bf16.vlgmr.msrb.gmra.mxu3 %v2000_v5  ;;  %v1316_v57 = vmax.f32 %v969_v50, 0.0  ;;  %v6169_v5 = vpop.f32.mrf.mxu3 }
 0x1be   :  { %7204 = vst [vmem:[#allocation6_spill] sm:$0xff] %v6169_v5 }
 0x1bf   :  { %v1478_v6 = vpack.c.bf16 %v1316_v57, %v1316_v57 }
 0x1c1   :  { %v1984_v19 = vunpack.c.l.b16 %v1478_v6 }
 0x1c2   :  { %v970_v11 = vpop.f32.mrf.mxu0 }
 0x1c3   :  { %v971_v63 = vadd.f32 %v5753_v29, %v970_v11 }
 0x1c5   :  { %v1317_v22 = vmax.f32 %v971_v63, 0.0 }
 0x1c7   :  { %v1479_v15 = vpack.c.bf16 %v1317_v22, %v1317_v22 }
 0x1c9   :  { %v1985_v30 = vunpack.c.l.b16 %v1479_v15  ;;  %v5406_v15 = vld [vmem:[%s7194_s0 + $0xe8] sm:$0xff] }
 0x1ca   :  { %v973_v31 = vpop.f32.mrf.mxu0 }
 0x1cb   :  { %v2001_v33 = vpack.c.b16 %v1985_v30, %v1984_v19  ;;  %v974_v41 = vadd.f32 %v5753_v29, %v973_v31  ;;  %v1164_v19 = vadd.f32 %v5753_v29, %v5768_v35  ;;  %v1166_v30 = vadd.f32 %v5753_v29, %v5771_v42  ;;  %v6179_v31 = vpop.f32.mrf.mxu1  ;;  %v6185_v35 = vpop.f32.mrf.mxu2 }
 0x1cc   :  { %7206 = vst [vmem:[#allocation8_spill] sm:$0xff] %v6185_v35 }
 0x1cd   :  { %4492 = vmatmul.msk.bf16.gmra.mxu0 %vm613_vm2, %v5405_v48  ;;  %2079 = vmatmul.bf16.gmra.mxu3 %v2001_v33  ;;  %v1318_v0 = vmax.f32 %v974_v41, 0.0  ;;  %v6181_v41 = vpop.f32.mrf.mxu3 }
 0x1ce   :  { %7205 = vst [vmem:[#allocation7_spill] sm:$0xff] %v6181_v41 }
 0x1cf   :  { %v1480_v57 = vpack.c.bf16 %v1318_v0, %v1318_v0 }
 0x1d1   :  { %v1986_v6 = vunpack.c.l.b16 %v1480_v57 }
 0x1d2   :  { %v975_v47 = vpop.f32.mrf.mxu0 }
 0x1d3   :  { %v976_v50 = vadd.f32 %v5753_v29, %v975_v47  ;;  %v1394_v47 = vmax.f32 %v1164_v19, 0.0  ;;  %v6188_v12 = vpop.f32.mrf.mxu1 }
 0x1d5   :  { %v1319_v11 = vmax.f32 %v976_v50, 0.0  ;;  %v1395_v50 = vmax.f32 %v1166_v30, 0.0  ;;  %v5407_v30 = vld [vmem:[%s7194_s0 + $0xf0] sm:$0xff] }
 0x1d7   :  { %v1481_v63 = vpack.c.bf16 %v1319_v11, %v1319_v11  ;;  %v1556_v11 = vpack.c.bf16 %v1394_v47, %v1394_v47 }
 0x1d9   :  { %v1987_v22 = vunpack.c.l.b16 %v1481_v63  ;;  %v1557_v63 = vpack.c.bf16 %v1395_v50, %v1395_v50  ;;  %v2754_v44 = vunpack.c.l.b16 %v1556_v11  ;;  %v6201_v11 = vpop.f32.mrf.mxu2 }
 0x1da   :  { %v978_v48 = vpop.f32.mrf.mxu0  ;;  %7209 = vst [vmem:[#allocation11_spill] sm:$0xff] %v6201_v11 }
 0x1db   :  { %v2002_v33 = vpack.c.b16 %v1987_v22, %v1986_v6  ;;  %v979_v0 = vadd.f32 %v5753_v29, %v978_v48  ;;  %v2755_v41 = vunpack.c.l.b16 %v1557_v63  ;;  %v6190_v48 = vpop.f32.mrf.mxu3 }
 0x1dc   :  { %7207 = vst [vmem:[#allocation9_spill] sm:$0xff] %v6190_v48 }
 0x1dd   :  { %4493 = vmatmul.msk.bf16.gmra.mxu0 %vm613_vm2, %v5406_v15  ;;  %2084 = vmatmul.bf16.gmra.mxu3 %v2002_v33  ;;  %v1320_v57 = vmax.f32 %v979_v0, 0.0  ;;  %v1169_v0 = vadd.f32 %v5753_v29, %v5791_v52  ;;  %v6199_v50 = vpack.c.b16 %v2755_v41, %v2754_v44 }
 0x1df   :  { %v1482_v6 = vpack.c.bf16 %v1320_v57, %v1320_v57  ;;  %7208 = vst [vmem:[#allocation10_spill] sm:$0xff] %v6199_v50 }
 0x1e1   :  { %v1988_v33 = vunpack.c.l.b16 %v1482_v6 }
 0x1e2   :  { %v980_v38 = vpop.f32.mrf.mxu0 }
 0x1e3   :  { %v981_v42 = vadd.f32 %v5753_v29, %v980_v38  ;;  %v1171_v38 = vadd.f32 %v5753_v29, %v5800_v61 }
 0x1e5   :  { %v1321_v22 = vmax.f32 %v981_v42, 0.0  ;;  %v1396_v42 = vmax.f32 %v1169_v0, 0.0  ;;  %v1397_v6 = vmax.f32 %v1171_v38, 0.0 }
 0x1e7   :  { %v1483_v15 = vpack.c.bf16 %v1321_v22, %v1321_v22  ;;  %v6205_v22 = vpop.f32.mrf.mxu1  ;;  %v1558_v35 = vpack.c.bf16 %v1396_v42, %v1396_v42  ;;  %v1559_v61 = vpack.c.bf16 %v1397_v6, %v1397_v6  ;;  %v6220_v42 = vld [vmem:[%s7193_s2] ss:$0 sm:$0xff] }
 0x1e9   :  { %v1989_v19 = vunpack.c.l.b16 %v1483_v15  ;;  %v6207_v15 = vpop.f32.mrf.mxu3  ;;  %v2757_v11 = vunpack.c.l.b16 %v1559_v61 }
 0x1ea   :  { %v983_v47 = vpop.f32.mrf.mxu0  ;;  %7210 = vst [vmem:[#allocation12_spill] sm:$0xff] %v6207_v15 }
 0x1eb   :  { %v2003_v57 = vpack.c.b16 %v1989_v19, %v1988_v33  ;;  %v984_v63 = vadd.f32 %v5753_v29, %v983_v47  ;;  %v2756_v19 = vunpack.c.l.b16 %v1558_v35  ;;  %v6210_v47 = vpop.f32.mrf.mxu2  ;;  %v1176_v35 = vadd.f32 %v6220_v42, %v5832_v17 }
 0x1ec   :  { %7211 = vst [vmem:[#allocation13_spill] sm:$0xff] %v6210_v47 }
 0x1ed   :  { %4494 = vmatmul.msk.bf16.gmra.mxu0 %vm613_vm2, %v5407_v30  ;;  %2089 = vmatmul.bf16.gmra.mxu3 %v2003_v57  ;;  %v1322_v52 = vmax.f32 %v984_v63, 0.0  ;;  %v5408_v63 = vld [vmem:[%s7194_s0 + $0xf8] sm:$0xff] }
 0x1ef   :  { %v1484_v41 = vpack.c.bf16 %v1322_v52, %v1322_v52  ;;  %v6212_v57 = vpop.f32.mrf.mxu1  ;;  %v6228_v52 = vpack.c.b16 %v2757_v11, %v2756_v19 }
 0x1f1   :  { %v1990_v0 = vunpack.c.l.b16 %v1484_v41  ;;  %v6226_v6 = vpop.f32.mrf.mxu3  ;;  %7213 = vst [vmem:[#allocation15_spill] sm:$0xff] %v6228_v52 }
 0x1f2   :  { %v985_v48 = vpop.f32.mrf.mxu0  ;;  %7212 = vst [vmem:[#allocation14_spill] sm:$0xff] %v6226_v6 }
 0x1f3   :  { %v986_v44 = vadd.f32 %v5753_v29, %v985_v48  ;;  %v1174_v29 = vadd.f32 %v6220_v42, %v5823_v8 }
 0x1f5   :  { %v1323_v33 = vmax.f32 %v986_v44, 0.0  ;;  %v1398_v41 = vmax.f32 %v1174_v29, 0.0 }
 0x1f7   :  { %v1485_v30 = vpack.c.bf16 %v1323_v33, %v1323_v33  ;;  %v1399_v33 = vmax.f32 %v1176_v35, 0.0  ;;  %v1560_v8 = vpack.c.bf16 %v1398_v41, %v1398_v41  ;;  %v6234_v17 = vpop.f32.mrf.mxu1  ;;  %v5409_v35 = vld [vmem:[%s7194_s0 + $0x100] sm:$0xff]  ;;  %v1181_v41 = vadd.f32 %v6220_v42, %v5856_v39  ;;  %v5507_v39 = vld [vmem:[%s7195_s3 + $0x178] sm:$0xff] }
 0x1f8   :  { %7215 = vst [vmem:[#allocation17_spill] sm:$0xff] %v6234_v17  ;;  %2639 = vmatpush.bf16.msra.mxu3 %v5507_v39  ;;  %v5505_v39 = vld [vmem:[%s7195_s3 + $0x168] sm:$0xff] }
 0x1f9   :  { %v1991_v38 = vunpack.c.l.b16 %v1485_v30  ;;  %v6232_v30 = vpop.f32.mrf.mxu2  ;;  %v1561_v50 = vpack.c.bf16 %v1399_v33, %v1399_v33  ;;  %v6237_v11 = vpop.f32.mrf.mxu3 }
 0x1fa   :  { %v988_v48 = vpop.f32.mrf.mxu0  ;;  %7214 = vst [vmem:[#allocation16_spill] sm:$0xff] %v6232_v30 }
 0x1fb   :  { %v2004_v61 = vpack.c.b16 %v1991_v38, %v1990_v0  ;;  %v989_v44 = vadd.f32 %v6220_v42, %v988_v48  ;;  %7216 = vst [vmem:[#allocation18_spill] sm:$0xff] %v6237_v11  ;;  %v2758_v38 = vunpack.c.l.b16 %v1560_v8  ;;  %v2759_v48 = vunpack.c.l.b16 %v1561_v50 }
 0x1fd   :  { %4495 = vmatmul.msk.bf16.gmra.mxu0 %vm613_vm2, %v5408_v63  ;;  %2094 = vmatmul.bf16.gmra.mxu3 %v2004_v61  ;;  %v1324_v47 = vmax.f32 %v989_v44, 0.0  ;;  %v1179_v44 = vadd.f32 %v6220_v42, %v5852_v28  ;;  %v5491_v28 = vld [vmem:[%s7195_s3 + $0xf8] sm:$0xff] }
 0x1fe   :  { %2257 = vmatpush.bf16.msra.mxu1 %v5491_v28 }
 0x1ff   :  { %v1486_v19 = vpack.c.bf16 %v1324_v47, %v1324_v47  ;;  %v6248_v47 = vpack.c.b16 %v2759_v48, %v2758_v38  ;;  %v6250_v50 = vpop.f32.mrf.mxu1 }
 0x200   :  { %7219 = vst [vmem:[#allocation21_spill] sm:$0xff] %v6250_v50 }
 0x201   :  { %v1992_v61 = vunpack.c.l.b16 %v1486_v19  ;;  %7218 = vst [vmem:[#allocation20_spill] sm:$0xff] %v6248_v47  ;;  %v1400_v19 = vmax.f32 %v1179_v44, 0.0  ;;  %v6260_v38 = vpop.f32.mrf.mxu3 }
 0x202   :  { %v990_v15 = vpop.f32.mrf.mxu0  ;;  %7220 = vst [vmem:[#allocation22_spill] sm:$0xff] %v6260_v38 }
 0x203   :  { %v991_v6 = vadd.f32 %v6220_v42, %v990_v15  ;;  %v6246_v15 = vpop.f32.mrf.mxu2 }
 0x204   :  { %7217 = vst [vmem:[#allocation19_spill] sm:$0xff] %v6246_v15 }
 0x205   :  { %v1325_v0 = vmax.f32 %v991_v6, 0.0 }
 0x207   :  { %v1487_v63 = vpack.c.bf16 %v1325_v0, %v1325_v0  ;;  %v1401_v0 = vmax.f32 %v1181_v41, 0.0 }
 0x209   :  { %v1993_v29 = vunpack.c.l.b16 %v1487_v63  ;;  %v5490_v63 = vld [vmem:[%s7195_s3 + $0xf0] sm:$0xff] }
 0x20a   :  { %v993_v33 = vpop.f32.mrf.mxu0  ;;  %2258 = vmatpush.bf16.msra.mxu1 %v5490_v63  ;;  %v6279_v63 = vpop.f32.mrf.mxu3 }
 0x20b   :  { %v2005_v6 = vpack.c.b16 %v1993_v29, %v1992_v61  ;;  %v994_v8 = vadd.f32 %v6220_v42, %v993_v33  ;;  %v5506_v61 = vld [vmem:[%s7195_s3 + $0x170] sm:$0xff]  ;;  %v1562_v29 = vpack.c.bf16 %v1400_v19, %v1400_v19  ;;  %v6269_v44 = vpop.f32.mrf.mxu2  ;;  %7222 = vst [vmem:[#allocation24_spill] sm:$0xff] %v6279_v63  ;;  %v5499_v63 = vld [vmem:[%s7195_s3 + $0x138] sm:$0xff] }
 0x20c   :  { %2640 = vmatpush.bf16.msra.mxu3 %v5506_v61  ;;  %7221 = vst [vmem:[#allocation23_spill] sm:$0xff] %v6269_v44  ;;  %v5487_v44 = vld [vmem:[%s7195_s3 + $0xd8] sm:$0xff]  ;;  %2448 = vmatpush.bf16.msra.mxu2 %v5499_v63 }
 0x20d   :  { %4496 = vmatmul.msk.bf16.gmra.mxu0 %vm613_vm2, %v5409_v35  ;;  %2099 = vmatmul.bf16.gmra.mxu3 %v2005_v6  ;;  %v1326_v48 = vmax.f32 %v994_v8, 0.0  ;;  %v1563_v35 = vpack.c.bf16 %v1401_v0, %v1401_v0  ;;  %v5489_v8 = vld [vmem:[%s7195_s3 + $0xe8] sm:$0xff]  ;;  %v2760_v15 = vunpack.c.l.b16 %v1562_v29  ;;  %v6277_v0 = vpop.f32.mrf.mxu1  ;;  %v5504_v29 = vld [vmem:[%s7195_s3 + $0x160] sm:$0xff] }
 0x20e   :  { %2259 = vmatpush.bf16.msra.mxu1 %v5489_v8 }
 0x20f   :  { %v1488_v41 = vpack.c.bf16 %v1326_v48, %v1326_v48  ;;  %v2761_v19 = vunpack.c.l.b16 %v1563_v35  ;;  %v1184_v35 = vadd.f32 %v6220_v42, %v5874_v58  ;;  %v5503_v58 = vld [vmem:[%s7195_s3 + $0x158] sm:$0xff] }
 0x210   :  { %2641 = vmatpush.bf16.msra.mxu3 %v5505_v39 }
 0x211   :  { %v1994_v61 = vunpack.c.l.b16 %v1488_v41 }
 0x212   :  { %v995_v33 = vpop.f32.mrf.mxu0 }
 0x213   :  { %v996_v6 = vadd.f32 %v6220_v42, %v995_v33  ;;  %v5410_v33 = vld [vmem:[%s7194_s0 + $0x108] sm:$0xff] }
 0x214   :  { %2642 = vmatpush.bf16.msra.mxu3 %v5504_v29 }
 0x215   :  { %v1327_v28 = vmax.f32 %v996_v6, 0.0  ;;  %v5488_v6 = vld [vmem:[%s7195_s3 + $0xe0] sm:$0xff] }
 0x216   :  { %2260 = vmatpush.bf16.msra.mxu1 %v5488_v6 }
 0x217   :  { %v1489_v30 = vpack.c.bf16 %v1327_v28, %v1327_v28  ;;  %v1186_v28 = vadd.f32 %v6220_v42, %v5879_v3  ;;  %v1402_v3 = vmax.f32 %v1184_v35, 0.0  ;;  %v6314_v35 = vpop.f32.mrf.mxu3 }
 0x218   :  { %2643 = vmatpush.bf16.msra.mxu3 %v5503_v58  ;;  %7224 = vst [vmem:[#allocation26_spill] sm:$0xff] %v6314_v35  ;;  %v5501_v58 = vld [vmem:[%s7195_s3 + $0x148] sm:$0xff] }
 0x219   :  { %v1995_v48 = vunpack.c.l.b16 %v1489_v30  ;;  %v6294_v30 = vpack.c.b16 %v2761_v19, %v2760_v15  ;;  %v1403_v47 = vmax.f32 %v1186_v28, 0.0  ;;  %v6304_v15 = vpop.f32.mrf.mxu2  ;;  %v6306_v19 = vpop.f32.mrf.mxu1  ;;  %v1564_v6 = vpack.c.bf16 %v1402_v3, %v1402_v3 }
 0x21a   :  { %v998_v41 = vpop.f32.mrf.mxu0  ;;  %2261 = vmatpush.bf16.msra.mxu1 %v5487_v44 }
 0x21b   :  { %7223 = vst [vmem:[#allocation25_spill] sm:$0xff] %v6294_v30  ;;  %v2006_v8 = vpack.c.b16 %v1995_v48, %v1994_v61  ;;  %v999_v39 = vadd.f32 %v6220_v42, %v998_v41  ;;  %v5486_v48 = vld [vmem:[%s7195_s3 + $0xd0] sm:$0xff]  ;;  %v1565_v29 = vpack.c.bf16 %v1403_v47, %v1403_v47  ;;  %v2762_v30 = vunpack.c.l.b16 %v1564_v6  ;;  %v5500_v6 = vld [vmem:[%s7195_s3 + $0x140] sm:$0xff] }
 0x21d   :  { %4497 = vmatmul.msk.bf16.gmra.mxu0 %vm613_vm2, %v5410_v33  ;;  %2104 = vmatmul.bf16.gmra.mxu3 %v2006_v8  ;;  %v1328_v61 = vmax.f32 %v999_v39, 0.0  ;;  %v5502_v33 = vld [vmem:[%s7195_s3 + $0x150] sm:$0xff]  ;;  %v5485_v39 = vld [vmem:[%s7195_s3 + $0xc8] sm:$0xff]  ;;  %v2763_v3 = vunpack.c.l.b16 %v1565_v29 }
 0x21e   :  { %2262 = vmatpush.bf16.msra.mxu1 %v5486_v48  ;;  %2644 = vmatpush.bf16.msra.mxu3 %v5502_v33  ;;  %v5484_v33 = vld [vmem:[%s7195_s3 + $0xc0] sm:$0xff] }
 0x21f   :  { %v1490_v44 = vpack.c.bf16 %v1328_v61, %v1328_v61  ;;  %v5411_v61 = vld [vmem:[%s7194_s0 + $0x110] sm:$0xff] }
 0x221   :  { %v6323_v35 = vpop.f32.mrf.mxu2 }
 0x222   :  { %v1000_v41 = vpop.f32.mrf.mxu0  ;;  %2263 = vmatpush.bf16.msra.mxu1 %v5485_v39  ;;  %2645 = vmatpush.bf16.msra.mxu3 %v5501_v58  ;;  %v6338_v39 = vpop.f32.mrf.mxu3 }
 0x223   :  { %v1001_v28 = vadd.f32 %v6220_v42, %v1000_v41  ;;  %v1996_v41 = vunpack.c.l.b16 %v1490_v44  ;;  %v6336_v44 = vpop.f32.mrf.mxu1  ;;  %7226 = vst [vmem:[#allocation28_spill] sm:$0xff] %v6338_v39 }
 0x225   :  { %v1329_v8 = vmax.f32 %v1001_v28, 0.0  ;;  %v6334_v28 = vpack.c.b16 %v2763_v3, %v2762_v30 }
 0x226   :  { %2264 = vmatpush.bf16.msra.mxu1 %v5484_v33  ;;  %2646 = vmatpush.bf16.msra.mxu3 %v5500_v6 }
 0x227   :  { %v1491_v47 = vpack.c.bf16 %v1329_v8, %v1329_v8  ;;  %7225 = vst [vmem:[#allocation27_spill] sm:$0xff] %v6334_v28 }
 0x229   :  { %v1997_v48 = vunpack.c.l.b16 %v1491_v47  ;;  %v1907_v52 = vpop.f32.mrf.mxu2 }
 0x22a   :  { %v1003_v29 = vpop.f32.mrf.mxu0  ;;  %v6348_v6 = vpop.f32.mrf.mxu3 }
 0x22b   :  { %v2007_v8 = vpack.c.b16 %v1997_v48, %v1996_v41  ;;  %v1004_v58 = vadd.f32 %v6220_v42, %v1003_v29  ;;  %v6346_v33 = vpop.f32.mrf.mxu1  ;;  %7227 = vst [vmem:[#allocation29_spill] sm:$0xff] %v6348_v6 }
 0x22d   :  { %4498 = vmatmul.msk.bf16.gmra.mxu0 %vm613_vm2, %v5411_v61  ;;  %2109 = vmatmul.bf16.gmra.mxu3 %v2007_v8  ;;  %v1330_v47 = vmax.f32 %v1004_v58, 0.0  ;;  %v5412_v8 = vld [vmem:[%s7194_s0 + $0x118] sm:$0xff]  ;;  %v1194_v58 = vadd.f32 %v6220_v42, %v5971_v36 }
 0x22f   :  { %v1492_v41 = vpack.c.bf16 %v1330_v47, %v1330_v47 }
 0x231   :  { %v1998_v28 = vunpack.c.l.b16 %v1492_v41  ;;  %v1406_v41 = vmax.f32 %v1194_v58, 0.0 }
 0x232   :  { %v1005_v30 = vpop.f32.mrf.mxu0 }
 0x233   :  { %v1006_v3 = vadd.f32 %v6220_v42, %v1005_v30  ;;  %v1196_v30 = vadd.f32 %v6220_v42, %v5987_v49  ;;  %v6363_v6 = vpop.f32.mrf.mxu1  ;;  %v5498_v49 = vld [vmem:[%s7195_s3 + $0x130] sm:$0xff] }
 0x234   :  { %2449 = vmatpush.bf16.msra.mxu2 %v5498_v49 }
 0x235   :  { %v1331_v48 = vmax.f32 %v1006_v3, 0.0  ;;  %v6357_v3 = vpop.f32.mrf.mxu2 }
 0x237   :  { %v1493_v29 = vpack.c.bf16 %v1331_v48, %v1331_v48  ;;  %v1407_v48 = vmax.f32 %v1196_v30, 0.0 }
 0x239   :  { %v1999_v61 = vunpack.c.l.b16 %v1493_v29  ;;  %v1903_v29 = vadd.f32 %v6304_v15, %v6277_v0 }
 0x23a   :  { %v1008_v63 = vpop.f32.mrf.mxu0 }
 0x23b   :  { %v2008_v47 = vpack.c.b16 %v1999_v61, %v1998_v28  ;;  %v1009_v39 = vadd.f32 %v6220_v42, %v1008_v63  ;;  %v1568_v28 = vpack.c.bf16 %v1406_v41, %v1406_v41  ;;  %v1569_v61 = vpack.c.bf16 %v1407_v48, %v1407_v48  ;;  %v5413_v41 = vld [vmem:[%s7194_s0 + $0x120] sm:$0xff]  ;;  %v6382_v49 = vpop.f32.mrf.mxu1 }
 0x23c   :  { %v1199_v48 = vadd.f32 %v6220_v42, %v5995_v1 }
 0x23d   :  { %4499 = vmatmul.msk.bf16.gmra.mxu0 %vm613_vm2, %v5412_v8  ;;  %2114 = vmatmul.bf16.gmra.mxu3 %v2008_v47  ;;  %v1332_v38 = vmax.f32 %v1009_v39, 0.0  ;;  %v2939_v47 = vunpack.c.l.b16 %v1568_v28  ;;  %v2940_v0 = vunpack.c.l.b16 %v1569_v61  ;;  %v6371_v15 = vpop.f32.mrf.mxu2 }
 0x23e   :  { %v1408_v1 = vmax.f32 %v1199_v48, 0.0 }
 0x23f   :  { %v1494_v58 = vpack.c.bf16 %v1332_v38, %v1332_v38  ;;  %v1201_v38 = vadd.f32 %v6220_v42, %v6007_v14  ;;  %v6384_v61 = vpack.c.b16 %v2940_v0, %v2939_v47  ;;  %v1908_v14 = vadd.f32 %v1907_v52, %v6336_v44 }
 0x240   :  { %v2075_v36 = vpop.f32.mrf.mxu3 }
 0x241   :  { %v6365_v11 = vadd.f32 %v2075_v36, %v1903_v29  ;;  %v2173_v29 = vunpack.c.l.b16 %v1494_v58  ;;  %7228 = vst [vmem:[#allocation30_spill] sm:$0xff] %v6384_v61 }
 0x242   :  { %v1010_v63 = vpop.f32.mrf.mxu0 }
 0x243   :  { %v1011_v8 = vadd.f32 %v6220_v42, %v1010_v63  ;;  %v6402_v44 = vpop.f32.mrf.mxu1 }
 0x245   :  { %v1333_v30 = vmax.f32 %v1011_v8, 0.0  ;;  %v1104_v8 = vadd.f32 %v6220_v42, %v5945_v9 }
 0x247   :  { %v1495_v5 = vpack.c.bf16 %v1333_v30, %v1333_v30  ;;  %v1409_v30 = vmax.f32 %v1201_v38, 0.0  ;;  %v1370_v47 = vmax.f32 %v1104_v8, 0.0 }
 0x248   :  { %v6373_v39 = vpop.f32.mrf.mxu3 }
 0x249   :  { %v2174_v36 = vunpack.c.l.b16 %v1495_v5  ;;  %v1106_v5 = vadd.f32 %v6220_v42, %v5962_v23  ;;  %v5497_v23 = vld [vmem:[%s7195_s3 + $0x128] sm:$0xff] }
 0x24a   :  { %v1013_v28 = vpop.f32.mrf.mxu0  ;;  %2450 = vmatpush.bf16.msra.mxu2 %v5497_v23 }
 0x24b   :  { %v2191_v63 = vpack.c.b16 %v2174_v36, %v2173_v29  ;;  %v1014_v58 = vadd.f32 %v6220_v42, %v1013_v28  ;;  %v1371_v0 = vmax.f32 %v1106_v5, 0.0  ;;  %v6394_v29 = vpop.f32.mrf.mxu2  ;;  %v1571_v28 = vpack.c.bf16 %v1409_v30, %v1409_v30  ;;  %v5414_v30 = vld [vmem:[%s7194_s0 + $0x128] sm:$0xff] }
 0x24d   :  { %4500 = vmatmul.msk.bf16.gmra.mxu0 %vm613_vm2, %v5413_v41  ;;  %2265 = vmatmul.bf16.vlgmr.msra.gmra.mxu1 %v2191_v63  ;;  %v1334_v9 = vmax.f32 %v1014_v58, 0.0  ;;  %v1570_v41 = vpack.c.bf16 %v1408_v1, %v1408_v1  ;;  %v1533_v52 = vpack.c.bf16 %v1371_v0, %v1371_v0  ;;  %v2942_v58 = vunpack.c.l.b16 %v1571_v28 }
 0x24e   :  { %2647 = vmatmul.bf16.vlgmr.msra.gmra.mxu3 %v5876_v60  ;;  %v1532_v60 = vpack.c.bf16 %v1370_v47, %v1370_v47  ;;  %v1204_v47 = vadd.f32 %v6220_v42, %v6021_v27  ;;  %v1206_v0 = vadd.f32 %v6220_v42, %v6029_v45  ;;  %v6421_v45 = vpop.f32.mrf.mxu1 }
 0x24f   :  { %v1496_v63 = vpack.c.bf16 %v1334_v9, %v1334_v9  ;;  %v2941_v5 = vunpack.c.l.b16 %v1570_v41  ;;  %v2558_v18 = vunpack.c.l.b16 %v1533_v52 }
 0x250   :  { %v2080_v36 = vpop.f32.mrf.mxu3  ;;  %v1410_v27 = vmax.f32 %v1204_v47, 0.0 }
 0x251   :  { %v6396_v61 = vadd.f32 %v2080_v36, %v1908_v14  ;;  %v2557_v36 = vunpack.c.l.b16 %v1532_v60  ;;  %v2175_v17 = vunpack.c.l.b16 %v1496_v63  ;;  %v6413_v41 = vpack.c.b16 %v2942_v58, %v2941_v5 }
 0x252   :  { %v1015_v48 = vpop.f32.mrf.mxu0  ;;  %v1411_v63 = vmax.f32 %v1206_v0, 0.0 }
 0x253   :  { %v1016_v38 = vadd.f32 %v6220_v42, %v1015_v48  ;;  %v1917_v9 = vpop.f32.mrf.mxu2  ;;  %7229 = vst [vmem:[#allocation31_spill] sm:$0xff] %v6413_v41  ;;  %v1109_v48 = vadd.f32 %v6220_v42, %v5969_v32  ;;  %v2574_v60 = vpack.c.b16 %v2558_v18, %v2557_v36 }
 0x254   :  { %v1573_v18 = vpack.c.bf16 %v1411_v63, %v1411_v63  ;;  %v5415_v63 = vld [vmem:[%s7194_s0 + $0x130] sm:$0xff] }
 0x255   :  { %v1335_v8 = vmax.f32 %v1016_v38, 0.0  ;;  %v1111_v38 = vadd.f32 %v6220_v42, %v5985_v46  ;;  %v1572_v46 = vpack.c.bf16 %v1410_v27, %v1410_v27 }
 0x256   :  { %v2944_v41 = vunpack.c.l.b16 %v1573_v18 }
 0x257   :  { %v1497_v14 = vpack.c.bf16 %v1335_v8, %v1335_v8  ;;  %v1372_v8 = vmax.f32 %v1109_v48, 0.0  ;;  %v1373_v5 = vmax.f32 %v1111_v38, 0.0  ;;  %v1766_v38 = vpop.f32.mrf.mxu1 }
 0x258   :  { %v6404_v50 = vpop.f32.mrf.mxu3 }
 0x259   :  { %v2176_v1 = vunpack.c.l.b16 %v1497_v14  ;;  %v1535_v47 = vpack.c.bf16 %v1373_v5, %v1373_v5  ;;  %v1209_v5 = vadd.f32 %v6220_v42, %v6041_v59 }
 0x25a   :  { %v1018_v23 = vpop.f32.mrf.mxu0 }
 0x25b   :  { %v2192_v28 = vpack.c.b16 %v2176_v1, %v2175_v17  ;;  %v1019_v52 = vadd.f32 %v6220_v42, %v1018_v23  ;;  %v1913_v17 = vadd.f32 %v6371_v15, %v6363_v6  ;;  %v6428_v0 = vpop.f32.mrf.mxu2  ;;  %v2560_v48 = vunpack.c.l.b16 %v1535_v47 }
 0x25c   :  { %v1412_v59 = vmax.f32 %v1209_v5, 0.0 }
 0x25d   :  { %4501 = vmatmul.msk.bf16.gmra.mxu0 %vm613_vm2, %v5414_v30  ;;  %2270 = vmatmul.bf16.gmra.mxu1 %v2192_v28  ;;  %v1336_v58 = vmax.f32 %v1019_v52, 0.0  ;;  %v1534_v30 = vpack.c.bf16 %v1372_v8, %v1372_v8  ;;  %v5496_v8 = vld [vmem:[%s7195_s3 + $0x120] sm:$0xff] }
 0x25e   :  { %2652 = vmatmul.bf16.gmra.mxu3 %v2574_v60  ;;  %v2943_v60 = vunpack.c.l.b16 %v1572_v46  ;;  %2451 = vmatpush.bf16.msra.mxu2 %v5496_v8 }
 0x25f   :  { %v1498_v23 = vpack.c.bf16 %v1336_v58, %v1336_v58  ;;  %v2559_v15 = vunpack.c.l.b16 %v1534_v30 }
 0x260   :  { %v2085_v32 = vpop.f32.mrf.mxu3  ;;  %v6442_v46 = vpack.c.b16 %v2944_v41, %v2943_v60  ;;  %v1918_v41 = vadd.f32 %v1917_v9, %v6402_v44 }
 0x261   :  { %v6425_v14 = vadd.f32 %v2085_v32, %v1913_v17  ;;  %v2177_v17 = vunpack.c.l.b16 %v1498_v23  ;;  %v1211_v32 = vadd.f32 %v6220_v42, %v6053_v16  ;;  %v2575_v30 = vpack.c.b16 %v2560_v48, %v2559_v15  ;;  %v6453_v15 = vpop.f32.mrf.mxu1 }
 0x262   :  { %v1020_v36 = vpop.f32.mrf.mxu0  ;;  %7230 = vst [vmem:[#allocation32_spill] sm:$0xff] %v6442_v46 }
 0x263   :  { %v1021_v1 = vadd.f32 %v6220_v42, %v1020_v36  ;;  %v1114_v36 = vadd.f32 %v6220_v42, %v5993_v62  ;;  %v1413_v23 = vmax.f32 %v1211_v32, 0.0  ;;  %v1922_v16 = vpop.f32.mrf.mxu2 }
 0x265   :  { %v1337_v28 = vmax.f32 %v1021_v1, 0.0  ;;  %v1116_v1 = vadd.f32 %v6220_v42, %v6005_v25  ;;  %v1575_v25 = vpack.c.bf16 %v1413_v23, %v1413_v23 }
 0x267   :  { %v1499_v6 = vpack.c.bf16 %v1337_v28, %v1337_v28  ;;  %v1374_v28 = vmax.f32 %v1114_v36, 0.0  ;;  %v1375_v60 = vmax.f32 %v1116_v1, 0.0 }
 0x268   :  { %v6430_v52 = vpop.f32.mrf.mxu3 }
 0x269   :  { %v2178_v27 = vunpack.c.l.b16 %v1499_v6  ;;  %v1536_v8 = vpack.c.bf16 %v1374_v28, %v1374_v28  ;;  %v1537_v5 = vpack.c.bf16 %v1375_v60, %v1375_v60  ;;  %v5495_v28 = vld [vmem:[%s7195_s3 + $0x118] sm:$0xff] }
 0x26a   :  { %v1023_v58 = vpop.f32.mrf.mxu0  ;;  %2452 = vmatpush.bf16.msra.mxu2 %v5495_v28 }
 0x26b   :  { %v2193_v18 = vpack.c.b16 %v2178_v27, %v2177_v17  ;;  %v1024_v47 = vadd.f32 %v6220_v42, %v1023_v58  ;;  %v1574_v27 = vpack.c.bf16 %v1412_v59, %v1412_v59  ;;  %v2561_v9 = vunpack.c.l.b16 %v1536_v8  ;;  %v6456_v1 = vpop.f32.mrf.mxu2 }
 0x26c   :  { %v2562_v36 = vunpack.c.l.b16 %v1537_v5  ;;  %v1923_v5 = vadd.f32 %v1922_v16, %v1766_v38 }
 0x26d   :  { %4502 = vmatmul.msk.bf16.gmra.mxu0 %vm613_vm2, %v5415_v63  ;;  %2275 = vmatmul.bf16.gmra.mxu1 %v2193_v18  ;;  %v1338_v17 = vmax.f32 %v1024_v47, 0.0  ;;  %v2945_v18 = vunpack.c.l.b16 %v1574_v27  ;;  %v1119_v27 = vadd.f32 %v6220_v42, %v6019_v26 }
 0x26e   :  { %2657 = vmatmul.bf16.gmra.mxu3 %v2575_v30  ;;  %v2946_v30 = vunpack.c.l.b16 %v1575_v25  ;;  %v1121_v25 = vadd.f32 %v6220_v42, %v6024_v40 }
 0x26f   :  { %v1500_v32 = vpack.c.bf16 %v1338_v17, %v1338_v17 }
 0x270   :  { %v2090_v6 = vpop.f32.mrf.mxu3 }
 0x271   :  { %v6451_v62 = vadd.f32 %v2090_v6, %v1918_v41  ;;  %v2179_v59 = vunpack.c.l.b16 %v1500_v32  ;;  %v5416_v41 = vld [vmem:[%s7194_s0 + $0x138] sm:$0xff]  ;;  %v6466_v6 = vpack.c.b16 %v2946_v30, %v2945_v18  ;;  %v1376_v32 = vmax.f32 %v1119_v27, 0.0 }
 0x272   :  { %v1025_v48 = vpop.f32.mrf.mxu0 }
 0x273   :  { %v1026_v63 = vadd.f32 %v6220_v42, %v1025_v48  ;;  %7231 = vst [vmem:[#allocation33_spill] sm:$0xff] %v6466_v6  ;;  %v1771_v48 = vpop.f32.mrf.mxu1  ;;  %v1538_v40 = vpack.c.bf16 %v1376_v32, %v1376_v32 }
 0x275   :  { %v1339_v58 = vmax.f32 %v1026_v63, 0.0  ;;  %v2576_v63 = vpack.c.b16 %v2562_v36, %v2561_v9 }
 0x277   :  { %v1501_v44 = vpack.c.bf16 %v1339_v58, %v1339_v58  ;;  %v1377_v58 = vmax.f32 %v1121_v25, 0.0  ;;  %v5417_v25 = vld [vmem:[%s7194_s0 + $0x140] sm:$0xff] }
 0x278   :  { %v6458_v47 = vpop.f32.mrf.mxu3 }
 0x279   :  { %v2180_v23 = vunpack.c.l.b16 %v1501_v44  ;;  %v1539_v28 = vpack.c.bf16 %v1377_v58, %v1377_v58  ;;  %v1124_v58 = vadd.f32 %v6220_v42, %v6038_v56 }
 0x27a   :  { %v1028_v60 = vpop.f32.mrf.mxu0 }
 0x27b   :  { %v2194_v17 = vpack.c.b16 %v2180_v23, %v2179_v59  ;;  %v1029_v8 = vadd.f32 %v6220_v42, %v1028_v60  ;;  %v1927_v59 = vpop.f32.mrf.mxu2  ;;  %v6477_v60 = vpop.f32.mrf.mxu1 }
 0x27d   :  { %4503 = vmatmul.msk.bf16.gmra.mxu0 %vm613_vm2, %v5416_v41  ;;  %2280 = vmatmul.bf16.gmra.mxu1 %v2194_v17  ;;  %v1340_v30 = vmax.f32 %v1029_v8, 0.0  ;;  %v2563_v17 = vunpack.c.l.b16 %v1538_v40  ;;  %v5494_v8 = vld [vmem:[%s7195_s3 + $0x110] sm:$0xff]  ;;  %v1928_v40 = vadd.f32 %v1927_v59, %v1771_v48 }
 0x27e   :  { %2662 = vmatmul.bf16.gmra.mxu3 %v2576_v63  ;;  %v2564_v63 = vunpack.c.l.b16 %v1539_v28  ;;  %2453 = vmatpush.bf16.msra.mxu2 %v5494_v8  ;;  %v1378_v28 = vmax.f32 %v1124_v58, 0.0  ;;  %v5418_v58 = vld [vmem:[%s7194_s0 + $0x148] sm:$0xff] }
 0x27f   :  { %v1502_v9 = vpack.c.bf16 %v1340_v30, %v1340_v30 }
 0x280   :  { %v2095_v18 = vpop.f32.mrf.mxu3  ;;  %v1540_v8 = vpack.c.bf16 %v1378_v28, %v1378_v28 }
 0x281   :  { %v6474_v44 = vadd.f32 %v2095_v18, %v1923_v5  ;;  %v2181_v16 = vunpack.c.l.b16 %v1502_v9  ;;  %v1126_v18 = vadd.f32 %v6220_v42, %v6049_v13 }
 0x282   :  { %v1030_v26 = vpop.f32.mrf.mxu0 }
 0x283   :  { %v1031_v23 = vadd.f32 %v6220_v42, %v1030_v26  ;;  %v6491_v30 = vpop.f32.mrf.mxu2  ;;  %v2577_v26 = vpack.c.b16 %v2564_v63, %v2563_v17  ;;  %v1379_v9 = vmax.f32 %v1126_v18, 0.0  ;;  %v5493_v18 = vld [vmem:[%s7195_s3 + $0x108] sm:$0xff] }
 0x284   :  { %2454 = vmatpush.bf16.msra.mxu2 %v5493_v18 }
 0x285   :  { %v1341_v36 = vmax.f32 %v1031_v23, 0.0  ;;  %v1541_v6 = vpack.c.bf16 %v1379_v9, %v1379_v9  ;;  %v1131_v9 = vadd.f32 %v6220_v42, %v6069_v43 }
 0x287   :  { %v1503_v41 = vpack.c.bf16 %v1341_v36, %v1341_v36  ;;  %v1776_v36 = vpop.f32.mrf.mxu1  ;;  %v1381_v43 = vmax.f32 %v1131_v9, 0.0  ;;  %v5529_v9 = vld [vmem:[%s7195_s3 + $0x228] sm:$0xff] }
 0x288   :  { %v6479_v38 = vpop.f32.mrf.mxu3 }
 0x289   :  { %v2182_v27 = vunpack.c.l.b16 %v1503_v41 }
 0x28a   :  { %v1033_v5 = vpop.f32.mrf.mxu0 }
 0x28b   :  { %v2195_v32 = vpack.c.b16 %v2182_v27, %v2181_v16  ;;  %v1034_v23 = vadd.f32 %v6220_v42, %v1033_v5  ;;  %v1932_v5 = vpop.f32.mrf.mxu2 }
 0x28d   :  { %4504 = vmatmul.msk.bf16.gmra.mxu0 %vm613_vm2, %v5417_v25  ;;  %2285 = vmatmul.bf16.gmra.mxu1 %v2195_v32  ;;  %v1342_v16 = vmax.f32 %v1034_v23, 0.0  ;;  %v2565_v25 = vunpack.c.l.b16 %v1540_v8  ;;  %v2566_v32 = vunpack.c.l.b16 %v1541_v6  ;;  %v1129_v6 = vadd.f32 %v6220_v42, %v6058_v24 }
 0x28e   :  { %2667 = vmatmul.bf16.gmra.mxu3 %v2577_v26 }
 0x28f   :  { %v1504_v17 = vpack.c.bf16 %v1342_v16, %v1342_v16  ;;  %v6506_v23 = vpop.f32.mrf.mxu1  ;;  %v5515_v16 = vld [vmem:[%s7195_s3 + $0x1b8] sm:$0xff]  ;;  %v1380_v24 = vmax.f32 %v1129_v6, 0.0  ;;  %v5513_v6 = vld [vmem:[%s7195_s3 + $0x1a8] sm:$0xff] }
 0x290   :  { %v2100_v41 = vpop.f32.mrf.mxu3  ;;  %2830 = vmatpush.bf16.msrb.mxu1 %v5515_v16 }
 0x291   :  { %v6495_v27 = vadd.f32 %v2100_v41, %v1928_v40  ;;  %v2183_v48 = vunpack.c.l.b16 %v1504_v17 }
 0x292   :  { %v1035_v56 = vpop.f32.mrf.mxu0 }
 0x293   :  { %v1036_v13 = vadd.f32 %v6220_v42, %v1035_v56  ;;  %v5531_v56 = vld [vmem:[%s7195_s3 + $0x238] sm:$0xff]  ;;  %v6520_v8 = vpop.f32.mrf.mxu2 }
 0x294   :  { %3212 = vmatpush.bf16.msrb.mxu3 %v5531_v56 }
 0x295   :  { %v1343_v63 = vmax.f32 %v1036_v13, 0.0  ;;  %v1933_v13 = vadd.f32 %v1932_v5, %v1776_v36  ;;  %v1542_v5 = vpack.c.bf16 %v1380_v24, %v1380_v24 }
 0x297   :  { %v1505_v46 = vpack.c.bf16 %v1343_v63, %v1343_v63  ;;  %v1781_v18 = vpop.f32.mrf.mxu1 }
 0x298   :  { %v6498_v26 = vpop.f32.mrf.mxu3 }
 0x299   :  { %v2184_v59 = vunpack.c.l.b16 %v1505_v46  ;;  %v2578_v46 = vpack.c.b16 %v2566_v32, %v2565_v25  ;;  %v5514_v32 = vld [vmem:[%s7195_s3 + $0x1b0] sm:$0xff] }
 0x29a   :  { %v1038_v40 = vpop.f32.mrf.mxu0  ;;  %2831 = vmatpush.bf16.msrb.mxu1 %v5514_v32 }
 0x29b   :  { %v2196_v28 = vpack.c.b16 %v2184_v59, %v2183_v48  ;;  %v1039_v41 = vadd.f32 %v6220_v42, %v1038_v40  ;;  %v5530_v48 = vld [vmem:[%s7195_s3 + $0x230] sm:$0xff]  ;;  %v1937_v32 = vpop.f32.mrf.mxu2 }
 0x29c   :  { %3213 = vmatpush.bf16.msrb.mxu3 %v5530_v48 }
 0x29d   :  { %4505 = vmatmul.msk.bf16.gmra.mxu0 %vm613_vm2, %v5418_v58  ;;  %2290 = vmatmul.bf16.gmra.mxu1 %v2196_v28  ;;  %v1344_v63 = vmax.f32 %v1039_v41, 0.0  ;;  %v1543_v58 = vpack.c.bf16 %v1381_v43, %v1381_v43  ;;  %v2567_v41 = vunpack.c.l.b16 %v1542_v5  ;;  %v5419_v43 = vld [vmem:[%s7194_s0 + $0x150] sm:$0xff]  ;;  %v1136_v5 = vadd.f32 %v6220_v42, %v6092_v34 }
 0x29e   :  { %2672 = vmatmul.bf16.gmra.mxu3 %v2578_v46  ;;  %2832 = vmatpush.bf16.msrb.mxu1 %v5513_v6  ;;  %v5527_v6 = vld [vmem:[%s7195_s3 + $0x218] sm:$0xff] }
 0x29f   :  { %v1506_v40 = vpack.c.bf16 %v1344_v63, %v1344_v63  ;;  %v2568_v16 = vunpack.c.l.b16 %v1543_v58  ;;  %v5528_v63 = vld [vmem:[%s7195_s3 + $0x220] sm:$0xff] }
 0x2a0   :  { %v2105_v17 = vpop.f32.mrf.mxu3  ;;  %3214 = vmatpush.bf16.msrb.mxu3 %v5529_v9  ;;  %v6560_v9 = vpop.f32.mrf.mxu1 }
 0x2a1   :  { %v6522_v25 = vadd.f32 %v2105_v17, %v1933_v13  ;;  %v2185_v13 = vunpack.c.l.b16 %v1506_v40  ;;  %v5512_v17 = vld [vmem:[%s7195_s3 + $0x1a0] sm:$0xff]  ;;  %v2579_v58 = vpack.c.b16 %v2568_v16, %v2567_v41 }
 0x2a2   :  { %v1040_v59 = vpop.f32.mrf.mxu0  ;;  %2833 = vmatpush.bf16.msrb.mxu1 %v5512_v17 }
 0x2a3   :  { %v1041_v36 = vadd.f32 %v6220_v42, %v1040_v59 }
 0x2a4   :  { %3215 = vmatpush.bf16.msrb.mxu3 %v5528_v63 }
 0x2a5   :  { %v1345_v28 = vmax.f32 %v1041_v36, 0.0  ;;  %v1134_v36 = vadd.f32 %v6220_v42, %v6075_v2  ;;  %v1938_v2 = vadd.f32 %v1937_v32, %v1781_v18  ;;  %v5526_v18 = vld [vmem:[%s7195_s3 + $0x210] sm:$0xff] }
 0x2a7   :  { %v1507_v46 = vpack.c.bf16 %v1345_v28, %v1345_v28  ;;  %v5511_v28 = vld [vmem:[%s7195_s3 + $0x198] sm:$0xff]  ;;  %v1382_v34 = vmax.f32 %v1134_v36, 0.0 }
 0x2a8   :  { %v6537_v56 = vpop.f32.mrf.mxu3  ;;  %2834 = vmatpush.bf16.msrb.mxu1 %v5511_v28  ;;  %3216 = vmatpush.bf16.msrb.mxu3 %v5527_v6 }
 0x2a9   :  { %v2186_v24 = vunpack.c.l.b16 %v1507_v46  ;;  %v1383_v46 = vmax.f32 %v1136_v5, 0.0  ;;  %v1544_v32 = vpack.c.bf16 %v1382_v34, %v1382_v34 }
 0x2aa   :  { %v1043_v48 = vpop.f32.mrf.mxu0 }
 0x2ab   :  { %v2197_v59 = vpack.c.b16 %v2186_v24, %v2185_v13  ;;  %v1044_v40 = vadd.f32 %v6220_v42, %v1043_v48  ;;  %v5492_v24 = vld [vmem:[%s7195_s3 + $0x100] sm:$0xff]  ;;  %v1545_v48 = vpack.c.bf16 %v1383_v46, %v1383_v46  ;;  %v2569_v6 = vunpack.c.l.b16 %v1544_v32 }
 0x2ac   :  { %2455 = vmatpush.bf16.msra.mxu2 %v5492_v24  ;;  %3217 = vmatpush.bf16.msrb.mxu3 %v5526_v18  ;;  %v5524_v18 = vld [vmem:[%s7195_s3 + $0x200] sm:$0xff]  ;;  %v1139_v32 = vadd.f32 %v6220_v42, %v6114_v51  ;;  %v5523_v51 = vld [vmem:[%s7195_s3 + $0x1f8] sm:$0xff] }
 0x2ad   :  { %4506 = vmatmul.msk.bf16.gmra.mxu0 %vm613_vm2, %v5419_v43  ;;  %2295 = vmatmul.bf16.gmra.mxu1 %v2197_v59  ;;  %v1346_v16 = vmax.f32 %v1044_v40, 0.0  ;;  %v5510_v43 = vld [vmem:[%s7195_s3 + $0x190] sm:$0xff]  ;;  %v6574_v59 = vpop.f32.mrf.mxu2  ;;  %v5525_v40 = vld [vmem:[%s7195_s3 + $0x208] sm:$0xff] }
 0x2ae   :  { %2677 = vmatmul.bf16.gmra.mxu3 %v2579_v58  ;;  %2835 = vmatpush.bf16.msrb.mxu1 %v5510_v43  ;;  %v5509_v58 = vld [vmem:[%s7195_s3 + $0x188] sm:$0xff]  ;;  %v5508_v43 = vld [vmem:[%s7195_s3 + $0x180] sm:$0xff] }
 0x2af   :  { %v1508_v36 = vpack.c.bf16 %v1346_v16, %v1346_v16  ;;  %v5420_v16 = vld [vmem:[%s7194_s0 + $0x158] sm:$0xff] }
 0x2b0   :  { %v2110_v41 = vpop.f32.mrf.mxu3  ;;  %3218 = vmatpush.bf16.msrb.mxu3 %v5525_v40  ;;  %3021 = vmatpush.bf16.msrb.mxu2 %v5523_v51 }
 0x2b1   :  { %v6562_v13 = vadd.f32 %v2110_v41, %v1938_v2  ;;  %v2570_v2 = vunpack.c.l.b16 %v1545_v48  ;;  %v1786_v41 = vpop.f32.mrf.mxu1  ;;  %v2187_v46 = vunpack.c.l.b16 %v1508_v36  ;;  %v1141_v48 = vadd.f32 %v6220_v42, %v6125_v10 }
 0x2b2   :  { %v1045_v17 = vpop.f32.mrf.mxu0  ;;  %2836 = vmatpush.bf16.msrb.mxu1 %v5509_v58 }
 0x2b3   :  { %v1046_v63 = vadd.f32 %v6220_v42, %v1045_v17  ;;  %v2580_v36 = vpack.c.b16 %v2570_v2, %v2569_v6 }
 0x2b4   :  { %3219 = vmatpush.bf16.msrb.mxu3 %v5524_v18 }
 0x2b5   :  { %v1347_v5 = vmax.f32 %v1046_v63, 0.0  ;;  %v1942_v58 = vpop.f32.mrf.mxu2 }
 0x2b6   :  { %2837 = vmatpush.bf16.msrb.mxu1 %v5508_v43  ;;  %v1943_v40 = vadd.f32 %v1942_v58, %v1786_v41  ;;  %v5421_v58 = vld [vmem:[%s7194_s0 + $0x160] sm:$0xff] }
 0x2b7   :  { %v1509_v28 = vpack.c.bf16 %v1347_v5, %v1347_v5 }
 0x2b8   :  { %v6582_v34 = vpop.f32.mrf.mxu3 }
 0x2b9   :  { %7232 = vst [vmem:[#allocation34_spill] sm:$0xff] %v6582_v34  ;;  %v2188_v24 = vunpack.c.l.b16 %v1509_v28  ;;  %v1384_v28 = vmax.f32 %v1139_v32, 0.0  ;;  %v1385_v34 = vmax.f32 %v1141_v48, 0.0  ;;  %v6604_v10 = vpop.f32.mrf.mxu1 }
 0x2ba   :  { %v1048_v17 = vpop.f32.mrf.mxu0 }
 0x2bb   :  { %v2198_v63 = vpack.c.b16 %v2188_v24, %v2187_v46  ;;  %v1049_v5 = vadd.f32 %v6220_v42, %v1048_v17  ;;  %v1547_v18 = vpack.c.bf16 %v1385_v34, %v1385_v34 }
 0x2bd   :  { %4507 = vmatmul.msk.bf16.gmra.mxu0 %vm613_vm2, %v5420_v16  ;;  %2300 = vmatmul.bf16.gmra.mxu1 %v2198_v63  ;;  %v1348_v24 = vmax.f32 %v1049_v5, 0.0  ;;  %v1546_v16 = vpack.c.bf16 %v1384_v28, %v1384_v28  ;;  %v2572_v48 = vunpack.c.l.b16 %v1547_v18 }
 0x2be   :  { %2682 = vmatmul.bf16.gmra.mxu3 %v2580_v36 }
 0x2bf   :  { %v1510_v17 = vpack.c.bf16 %v1348_v24, %v1348_v24  ;;  %v2571_v32 = vunpack.c.l.b16 %v1546_v16 }
 0x2c0   :  { %v2115_v46 = vpop.f32.mrf.mxu3 }
 0x2c1   :  { %v6599_v43 = vadd.f32 %v2115_v46, %v1943_v40  ;;  %v2189_v36 = vunpack.c.l.b16 %v1510_v17  ;;  %v1144_v40 = vadd.f32 %v6220_v42, %v6139_v53  ;;  %v1146_v46 = vadd.f32 %v6220_v42, %v6147_v7 }
 0x2c2   :  { %v1050_v6 = vpop.f32.mrf.mxu0  ;;  %v2581_v16 = vpack.c.b16 %v2572_v48, %v2571_v32 }
 0x2c3   :  { %v1051_v2 = vadd.f32 %v6220_v42, %v1050_v6  ;;  %v1234_v6 = vadd.f32 %v6220_v42, %v6116_v55  ;;  %v1386_v53 = vmax.f32 %v1144_v40, 0.0  ;;  %v1387_v7 = vmax.f32 %v1146_v46, 0.0 }
 0x2c5   :  { %v1349_v41 = vmax.f32 %v1051_v2, 0.0  ;;  %v1236_v2 = vadd.f32 %v6220_v42, %v6130_v20  ;;  %v1422_v17 = vmax.f32 %v1234_v6, 0.0  ;;  %v5522_v20 = vld [vmem:[%s7195_s3 + $0x1f0] sm:$0xff]  ;;  %v1548_v32 = vpack.c.bf16 %v1386_v53, %v1386_v53 }
 0x2c6   :  { %3022 = vmatpush.bf16.msrb.mxu2 %v5522_v20 }
 0x2c7   :  { %v1511_v63 = vpack.c.bf16 %v1349_v41, %v1349_v41  ;;  %v1423_v41 = vmax.f32 %v1236_v2, 0.0 }
 0x2c9   :  { %v2190_v5 = vunpack.c.l.b16 %v1511_v63 }
 0x2ca   :  { %v1053_v51 = vpop.f32.mrf.mxu0  ;;  %v2266_v28 = vpop.f32.mrf.mxu1 }
 0x2cb   :  { %v6615_v34 = vadd.f32 %v2266_v28, %v6365_v11  ;;  %v2199_v24 = vpack.c.b16 %v2190_v5, %v2189_v36  ;;  %v1054_v18 = vadd.f32 %v6220_v42, %v1053_v51  ;;  %v1905_v11 = vadd.f32 %v6323_v35, %v6306_v19  ;;  %v6632_v5 = vld [vmem:[%s7193_s2] ss:$0 sm:$0xff] }
 0x2cc   :  { %v1549_v42 = vpack.c.bf16 %v1387_v7, %v1387_v7  ;;  %v2746_v51 = vunpack.c.l.b16 %v1548_v32  ;;  %v1239_v20 = vadd.f32 %v6632_v5, %v6137_v37  ;;  %v1241_v32 = vadd.f32 %v6632_v5, %v6145_v4  ;;  %v5521_v37 = vld [vmem:[%s7195_s3 + $0x1e8] sm:$0xff] }
 0x2cd   :  { %4508 = vmatmul.msk.bf16.gmra.mxu0 %vm613_vm2, %v5421_v58  ;;  %2305 = vmatmul.bf16.gmra.mxu1 %v2199_v24  ;;  %v2121_v63 = vadd.f32 %v6373_v39, %v1905_v11  ;;  %v1350_v55 = vmax.f32 %v1054_v18, 0.0  ;;  %v1584_v39 = vpack.c.bf16 %v1422_v17, %v1422_v17  ;;  %v1585_v58 = vpack.c.bf16 %v1423_v41, %v1423_v41 }
 0x2ce   :  { %2687 = vmatmul.bf16.gmra.mxu3 %v2581_v16  ;;  %v2747_v28 = vunpack.c.l.b16 %v1549_v42  ;;  %3023 = vmatpush.bf16.msrb.mxu2 %v5521_v37 }
 0x2cf   :  { %v1512_v40 = vpack.c.bf16 %v1350_v55, %v1350_v55  ;;  %v3128_v6 = vunpack.c.l.b16 %v1584_v39  ;;  %v3129_v2 = vunpack.c.l.b16 %v1585_v58 }
 0x2d0   :  { %v2764_v53 = vpack.c.b16 %v2747_v28, %v2746_v51 }
 0x2d1   :  { %v2364_v16 = vunpack.c.l.b16 %v1512_v40  ;;  %v3146_v55 = vpack.c.b16 %v3129_v2, %v3128_v6 }
 0x2d2   :  { %v1055_v48 = vpop.f32.mrf.mxu0  ;;  %v2268_v36 = vpop.f32.mrf.mxu1 }
 0x2d3   :  { %v1056_v19 = vadd.f32 %v6632_v5, %v1055_v48  ;;  %v6635_v35 = vadd.f32 %v2268_v36, %v2121_v63  ;;  %v1149_v48 = vadd.f32 %v6632_v5, %v6179_v31  ;;  %v1151_v63 = vadd.f32 %v6632_v5, %v6188_v12 }
 0x2d4   :  { %v1910_v12 = vadd.f32 %v6357_v3, %v6346_v33  ;;  %v6658_v3 = vpop.f32.mrf.mxu3 }
 0x2d5   :  { %v1351_v46 = vmax.f32 %v1056_v19, 0.0  ;;  %v1388_v31 = vmax.f32 %v1149_v48, 0.0  ;;  %v1389_v36 = vmax.f32 %v1151_v63, 0.0  ;;  %v1424_v19 = vmax.f32 %v1239_v20, 0.0 }
 0x2d6   :  { %v2123_v39 = vadd.f32 %v6404_v50, %v1910_v12  ;;  %v1244_v12 = vadd.f32 %v6632_v5, %v6152_v21 }
 0x2d7   :  { %v1513_v24 = vpack.c.bf16 %v1351_v46, %v1351_v46  ;;  %v1550_v46 = vpack.c.bf16 %v1388_v31, %v1388_v31  ;;  %v1551_v51 = vpack.c.bf16 %v1389_v36, %v1389_v36  ;;  %v1586_v6 = vpack.c.bf16 %v1424_v19, %v1424_v19 }
 0x2d8   :  { %v1246_v19 = vadd.f32 %v6632_v5, %v6159_v54  ;;  %v1426_v37 = vmax.f32 %v1244_v12, 0.0 }
 0x2d9   :  { %v2365_v18 = vunpack.c.l.b16 %v1513_v24 }
 0x2da   :  { %v1058_v7 = vpop.f32.mrf.mxu0  ;;  %v2271_v11 = vpop.f32.mrf.mxu1 }
 0x2db   :  { %v2382_v17 = vpack.c.b16 %v2365_v18, %v2364_v16  ;;  %v6642_v41 = vadd.f32 %v2271_v11, %v6396_v61  ;;  %v1059_v42 = vadd.f32 %v6632_v5, %v1058_v7  ;;  %v1425_v61 = vmax.f32 %v1241_v32, 0.0 }
 0x2dc   :  { %v2748_v16 = vunpack.c.l.b16 %v1550_v46  ;;  %v2749_v18 = vunpack.c.l.b16 %v1551_v51  ;;  %v3130_v7 = vunpack.c.l.b16 %v1586_v6  ;;  %v1156_v32 = vadd.f32 %v6632_v5, %v6212_v57 }
 0x2dd   :  { %2456 = vmatmul.bf16.vlgmr.msra.gmra.mxu2 %v2382_v17  ;;  %2838 = vmatmul.bf16.vlgmr.msrb.gmra.mxu1 %v2764_v53  ;;  %v1352_v58 = vmax.f32 %v1059_v42, 0.0  ;;  %v1587_v33 = vpack.c.bf16 %v1425_v61, %v1425_v61  ;;  %v1154_v17 = vadd.f32 %v6632_v5, %v6205_v22  ;;  %v1915_v57 = vadd.f32 %v6394_v29, %v6382_v49 }
 0x2de   :  { %3220 = vmatmul.bf16.vlgmr.msrb.gmra.mxu3 %v3146_v55  ;;  %v2765_v36 = vpack.c.b16 %v2749_v18, %v2748_v16 }
 0x2df   :  { %v1514_v2 = vpack.c.bf16 %v1352_v58, %v1352_v58  ;;  %v3131_v11 = vunpack.c.l.b16 %v1587_v33  ;;  %v1390_v22 = vmax.f32 %v1154_v17, 0.0  ;;  %v1391_v58 = vmax.f32 %v1156_v32, 0.0  ;;  %v5520_v17 = vld [vmem:[%s7195_s3 + $0x1e0] sm:$0xff] }
 0x2e0   :  { %v2125_v21 = vadd.f32 %v6430_v52, %v1915_v57  ;;  %3024 = vmatpush.bf16.msrb.mxu2 %v5520_v17  ;;  %v7236_v57 = vld [vmem:[#allocation6_spill] sm:$0xff] }
 0x2e1   :  { %v2366_v48 = vunpack.c.l.b16 %v1514_v2  ;;  %v3147_v61 = vpack.c.b16 %v3131_v11, %v3130_v7  ;;  %v1552_v51 = vpack.c.bf16 %v1390_v22, %v1390_v22  ;;  %v1588_v2 = vpack.c.bf16 %v1426_v37, %v1426_v37  ;;  %v7235_v22 = vld [vmem:[#allocation5_spill] sm:$0xff] }
 0x2e2   :  { %v1060_v4 = vpop.f32.mrf.mxu0  ;;  %v2273_v40 = vpop.f32.mrf.mxu1  ;;  %v1251_v37 = vadd.f32 %v6632_v5, %v7236_v57 }
 0x2e3   :  { %v1061_v28 = vadd.f32 %v6632_v5, %v1060_v4  ;;  %v6656_v24 = vadd.f32 %v2273_v40, %v2123_v39  ;;  %v1427_v4 = vmax.f32 %v1246_v19, 0.0  ;;  %v2750_v49 = vunpack.c.l.b16 %v1552_v51 }
 0x2e4   :  { %v3132_v7 = vunpack.c.l.b16 %v1588_v2  ;;  %v1429_v51 = vmax.f32 %v1251_v37, 0.0  ;;  %v7238_v37 = vld [vmem:[#allocation9_spill] sm:$0xff] }
 0x2e5   :  { %v1353_v50 = vmax.f32 %v1061_v28, 0.0  ;;  %v1553_v28 = vpack.c.bf16 %v1391_v58, %v1391_v58  ;;  %v1249_v58 = vadd.f32 %v6632_v5, %v7235_v22 }
 0x2e7   :  { %v1515_v53 = vpack.c.bf16 %v1353_v50, %v1353_v50  ;;  %v1589_v50 = vpack.c.bf16 %v1427_v4, %v1427_v4  ;;  %v2751_v29 = vunpack.c.l.b16 %v1553_v28 }
 0x2e9   :  { %v2367_v63 = vunpack.c.l.b16 %v1515_v53  ;;  %v3133_v11 = vunpack.c.l.b16 %v1589_v50 }
 0x2ea   :  { %v1063_v55 = vpop.f32.mrf.mxu0  ;;  %v2276_v20 = vpop.f32.mrf.mxu1 }
 0x2eb   :  { %v6665_v42 = vadd.f32 %v2276_v20, %v6425_v14  ;;  %v2383_v31 = vpack.c.b16 %v2367_v63, %v2366_v48  ;;  %v1064_v39 = vadd.f32 %v6632_v5, %v1063_v55  ;;  %v6674_v14 = vpop.f32.mrf.mxu3  ;;  %v7233_v55 = vld [vmem:[#allocation17_spill] sm:$0xff]  ;;  %v3148_v4 = vpack.c.b16 %v3133_v11, %v3132_v7 }
 0x2ec   :  { %v1159_v20 = vadd.f32 %v6632_v5, %v7233_v55  ;;  %v1591_v11 = vpack.c.bf16 %v1429_v51, %v1429_v51 }
 0x2ed   :  { %2461 = vmatmul.bf16.gmra.mxu2 %v2383_v31  ;;  %2843 = vmatmul.bf16.gmra.mxu1 %v2765_v36  ;;  %v1354_v40 = vmax.f32 %v1064_v39, 0.0  ;;  %v7234_v36 = vld [vmem:[#allocation21_spill] sm:$0xff]  ;;  %v2766_v39 = vpack.c.b16 %v2751_v29, %v2750_v49 }
 0x2ee   :  { %3225 = vmatmul.bf16.gmra.mxu3 %v3147_v61  ;;  %v1161_v12 = vadd.f32 %v6632_v5, %v7234_v36 }
 0x2ef   :  { %v1516_v16 = vpack.c.bf16 %v1354_v40, %v1354_v40  ;;  %v1392_v40 = vmax.f32 %v1159_v20, 0.0 }
 0x2f1   :  { %v2368_v52 = vunpack.c.l.b16 %v1516_v16  ;;  %v1554_v16 = vpack.c.bf16 %v1392_v40, %v1392_v40 }
 0x2f2   :  { %v1065_v46 = vpop.f32.mrf.mxu0  ;;  %v2278_v54 = vpop.f32.mrf.mxu1 }
 0x2f3   :  { %v1066_v6 = vadd.f32 %v6632_v5, %v1065_v46  ;;  %v6678_v33 = vadd.f32 %v2278_v54, %v2125_v21  ;;  %v6680_v48 = vpop.f32.mrf.mxu3  ;;  %v1393_v46 = vmax.f32 %v1161_v12, 0.0  ;;  %v1428_v54 = vmax.f32 %v1249_v58, 0.0  ;;  %v7237_v58 = vld [vmem:[#allocation7_spill] sm:$0xff] }
 0x2f4   :  { %v1254_v57 = vadd.f32 %v6632_v5, %v7237_v58  ;;  %v7241_v58 = vld [vmem:[#allocation10_spill] sm:$0xff] }
 0x2f5   :  { %v1355_v18 = vmax.f32 %v1066_v6, 0.0  ;;  %v1590_v7 = vpack.c.bf16 %v1428_v54, %v1428_v54 }
 0x2f7   :  { %v1517_v53 = vpack.c.bf16 %v1355_v18, %v1355_v18  ;;  %v1555_v18 = vpack.c.bf16 %v1393_v46, %v1393_v46  ;;  %v3134_v55 = vunpack.c.l.b16 %v1590_v7 }
 0x2f9   :  { %v2369_v63 = vunpack.c.l.b16 %v1517_v53 }
 0x2fa   :  { %v1068_v32 = vpop.f32.mrf.mxu0  ;;  %v2281_v31 = vpop.f32.mrf.mxu1 }
 0x2fb   :  { %v6690_v19 = vadd.f32 %v2281_v31, %v6451_v62  ;;  %v2384_v61 = vpack.c.b16 %v2369_v63, %v2368_v52  ;;  %v1069_v21 = vadd.f32 %v6632_v5, %v1068_v32  ;;  %v1920_v62 = vadd.f32 %v6428_v0, %v6421_v45  ;;  %v6700_v49 = vpop.f32.mrf.mxu3  ;;  %v5519_v31 = vld [vmem:[%s7195_s3 + $0x1d8] sm:$0xff] }
 0x2fc   :  { %v2752_v45 = vunpack.c.l.b16 %v1554_v16  ;;  %v2753_v0 = vunpack.c.l.b16 %v1555_v18  ;;  %3025 = vmatpush.bf16.msrb.mxu2 %v5519_v31 }
 0x2fd   :  { %2466 = vmatmul.bf16.gmra.mxu2 %v2384_v61  ;;  %2848 = vmatmul.bf16.gmra.mxu1 %v2766_v39  ;;  %v2127_v28 = vadd.f32 %v6458_v47, %v1920_v62  ;;  %v1356_v6 = vmax.f32 %v1069_v21, 0.0  ;;  %v3135_v47 = vunpack.c.l.b16 %v1591_v11  ;;  %v1430_v62 = vmax.f32 %v1254_v57, 0.0 }
 0x2fe   :  { %3230 = vmatmul.bf16.gmra.mxu3 %v3148_v4  ;;  %v2767_v22 = vpack.c.b16 %v2753_v0, %v2752_v45  ;;  %v1256_v4 = vadd.f32 %v6632_v5, %v7238_v37  ;;  %v1930_v57 = vadd.f32 %v6491_v30, %v6477_v60 }
 0x2ff   :  { %v1518_v52 = vpack.c.bf16 %v1356_v6, %v1356_v6  ;;  %v3149_v21 = vpack.c.b16 %v3135_v47, %v3134_v55  ;;  %v1592_v18 = vpack.c.bf16 %v1430_v62, %v1430_v62 }
 0x300   :  { %v1431_v54 = vmax.f32 %v1256_v4, 0.0  ;;  %v2131_v4 = vadd.f32 %v6498_v26, %v1930_v57  ;;  %v5517_v26 = vld [vmem:[%s7195_s3 + $0x1c8] sm:$0xff] }
 0x301   :  { %v2370_v20 = vunpack.c.l.b16 %v1518_v52  ;;  %v3136_v45 = vunpack.c.l.b16 %v1592_v18 }
 0x302   :  { %v1070_v2 = vpop.f32.mrf.mxu0  ;;  %v2283_v50 = vpop.f32.mrf.mxu1 }
 0x303   :  { %v1071_v29 = vadd.f32 %v6632_v5, %v1070_v2  ;;  %v6703_v53 = vadd.f32 %v2283_v50, %v2127_v28  ;;  %v6715_v40 = vpop.f32.mrf.mxu3 }
 0x305   :  { %v1357_v63 = vmax.f32 %v1071_v29, 0.0  ;;  %v1593_v29 = vpack.c.bf16 %v1431_v54, %v1431_v54 }
 0x307   :  { %v1519_v17 = vpack.c.bf16 %v1357_v63, %v1357_v63 }
 0x309   :  { %v2371_v32 = vunpack.c.l.b16 %v1519_v17 }
 0x30a   :  { %v1073_v36 = vpop.f32.mrf.mxu0  ;;  %v2286_v12 = vpop.f32.mrf.mxu1 }
 0x30b   :  { %v6709_v61 = vadd.f32 %v2286_v12, %v6474_v44  ;;  %v2385_v39 = vpack.c.b16 %v2371_v32, %v2370_v20  ;;  %v1074_v46 = vadd.f32 %v6632_v5, %v1073_v36  ;;  %v1925_v44 = vadd.f32 %v6456_v1, %v6453_v15  ;;  %v6724_v52 = vpop.f32.mrf.mxu3  ;;  %v7239_v32 = vld [vmem:[#allocation12_spill] sm:$0xff]  ;;  %v7240_v36 = vld [vmem:[#allocation14_spill] sm:$0xff] }
 0x30c   :  { %v3137_v15 = vunpack.c.l.b16 %v1593_v29  ;;  %v1259_v31 = vadd.f32 %v6632_v5, %v7239_v32  ;;  %v1261_v12 = vadd.f32 %v6632_v5, %v7240_v36 }
 0x30d   :  { %2471 = vmatmul.bf16.gmra.mxu2 %v2385_v39  ;;  %2853 = vmatmul.bf16.gmra.mxu1 %v2767_v22  ;;  %v2129_v51 = vadd.f32 %v6479_v38, %v1925_v44  ;;  %v1358_v28 = vmax.f32 %v1074_v46, 0.0  ;;  %v5518_v38 = vld [vmem:[%s7195_s3 + $0x1d0] sm:$0xff] }
 0x30e   :  { %3235 = vmatmul.bf16.gmra.mxu3 %v3149_v21  ;;  %3026 = vmatpush.bf16.msrb.mxu2 %v5518_v38  ;;  %v3150_v39 = vpack.c.b16 %v3137_v15, %v3136_v45  ;;  %v1433_v37 = vmax.f32 %v1261_v12, 0.0 }
 0x30f   :  { %v1520_v7 = vpack.c.bf16 %v1358_v28, %v1358_v28 }
 0x311   :  { %v2372_v1 = vunpack.c.l.b16 %v1520_v7 }
 0x312   :  { %v1075_v6 = vpop.f32.mrf.mxu0  ;;  %v2288_v2 = vpop.f32.mrf.mxu1  ;;  %3027 = vmatpush.bf16.msrb.mxu2 %v5517_v26  ;;  %v7246_v26 = vld [vmem:[#allocation26_spill] sm:$0xff] }
 0x313   :  { %v1076_v50 = vadd.f32 %v6632_v5, %v1075_v6  ;;  %v6722_v16 = vadd.f32 %v2288_v2, %v2129_v51  ;;  %v6741_v21 = vpop.f32.mrf.mxu3  ;;  %v1595_v6 = vpack.c.bf16 %v1433_v37, %v1433_v37 }
 0x315   :  { %v1359_v11 = vmax.f32 %v1076_v50, 0.0  ;;  %v3139_v60 = vunpack.c.l.b16 %v1595_v6 }
 0x317   :  { %v1521_v63 = vpack.c.bf16 %v1359_v11, %v1359_v11 }
 0x319   :  { %v2373_v0 = vunpack.c.l.b16 %v1521_v63 }
 0x31a   :  { %v1078_v17 = vpop.f32.mrf.mxu0  ;;  %v2291_v55 = vpop.f32.mrf.mxu1 }
 0x31b   :  { %v6730_v47 = vadd.f32 %v2291_v55, %v6495_v27  ;;  %v2386_v20 = vpack.c.b16 %v2373_v0, %v2372_v1  ;;  %v1079_v22 = vadd.f32 %v6632_v5, %v1078_v17  ;;  %v1432_v27 = vmax.f32 %v1259_v31, 0.0  ;;  %v6749_v45 = vpop.f32.mrf.mxu3  ;;  %v7242_v0 = vld [vmem:[#allocation18_spill] sm:$0xff]  ;;  %v7244_v31 = vld [vmem:[#allocation15_spill] sm:$0xff] }
 0x31c   :  { %v1264_v38 = vadd.f32 %v6632_v5, %v7242_v0  ;;  %v7243_v17 = vld [vmem:[#allocation22_spill] sm:$0xff]  ;;  %v7247_v0 = vld [vmem:[#allocation20_spill] sm:$0xff] }
 0x31d   :  { %2476 = vmatmul.bf16.gmra.mxu2 %v2386_v20  ;;  %2858 = vmatmul.bf16.gmra.mxu1 %v7241_v58  ;;  %v1360_v46 = vmax.f32 %v1079_v22, 0.0  ;;  %v1594_v28 = vpack.c.bf16 %v1432_v27, %v1432_v27  ;;  %v1266_v55 = vadd.f32 %v6632_v5, %v7243_v17 }
 0x31e   :  { %3240 = vmatmul.bf16.gmra.mxu3 %v3150_v39  ;;  %v1434_v36 = vmax.f32 %v1264_v38, 0.0 }
 0x31f   :  { %v1522_v2 = vpack.c.bf16 %v1360_v46, %v1360_v46  ;;  %v3138_v29 = vunpack.c.l.b16 %v1594_v28  ;;  %v1435_v12 = vmax.f32 %v1266_v55, 0.0 }
 0x320   :  { %v1596_v57 = vpack.c.bf16 %v1434_v36, %v1434_v36 }
 0x321   :  { %v2374_v30 = vunpack.c.l.b16 %v1522_v2  ;;  %v3151_v20 = vpack.c.b16 %v3139_v60, %v3138_v29  ;;  %v1597_v27 = vpack.c.bf16 %v1435_v12, %v1435_v12 }
 0x322   :  { %v1080_v44 = vpop.f32.mrf.mxu0  ;;  %v2293_v62 = vpop.f32.mrf.mxu1 }
 0x323   :  { %v1081_v54 = vadd.f32 %v6632_v5, %v1080_v44  ;;  %v6744_v51 = vadd.f32 %v2293_v62, %v2131_v4  ;;  %v6763_v37 = vpop.f32.mrf.mxu3  ;;  %v3140_v62 = vunpack.c.l.b16 %v1596_v57 }
 0x325   :  { %v1361_v50 = vmax.f32 %v1081_v54, 0.0  ;;  %v3141_v54 = vunpack.c.l.b16 %v1597_v27 }
 0x327   :  { %v1523_v18 = vpack.c.bf16 %v1361_v50, %v1361_v50 }
 0x329   :  { %v2375_v7 = vunpack.c.l.b16 %v1523_v18  ;;  %v5516_v18 = vld [vmem:[%s7195_s3 + $0x1c0] sm:$0xff] }
 0x32a   :  { %v1083_v11 = vpop.f32.mrf.mxu0  ;;  %v2296_v63 = vpop.f32.mrf.mxu1  ;;  %3028 = vmatpush.bf16.msrb.mxu2 %v5516_v18  ;;  %v7249_v18 = vld [vmem:[#allocation29_spill] sm:$0xff] }
 0x32b   :  { %v6752_v15 = vadd.f32 %v2296_v63, %v6522_v25  ;;  %v2387_v1 = vpack.c.b16 %v2375_v7, %v2374_v30  ;;  %v1084_v32 = vadd.f32 %v6632_v5, %v1083_v11  ;;  %v7245_v30 = vld [vmem:[#allocation24_spill] sm:$0xff]  ;;  %v1271_v11 = vadd.f32 %v6632_v5, %v7246_v26  ;;  %v6777_v38 = vpop.f32.mrf.mxu3  ;;  %v7250_v26 = vld [vmem:[#allocation25_spill] sm:$0xff] }
 0x32c   :  { %v1269_v7 = vadd.f32 %v6632_v5, %v7245_v30  ;;  %v3152_v63 = vpack.c.b16 %v3141_v54, %v3140_v62 }
 0x32d   :  { %2481 = vmatmul.bf16.gmra.mxu2 %v2387_v1  ;;  %2863 = vmatmul.bf16.gmra.mxu1 %v7244_v31  ;;  %v1362_v39 = vmax.f32 %v1084_v32, 0.0 }
 0x32e   :  { %3245 = vmatmul.bf16.gmra.mxu3 %v3151_v20  ;;  %v1436_v17 = vmax.f32 %v1269_v7, 0.0 }
 0x32f   :  { %v1524_v4 = vpack.c.bf16 %v1362_v39, %v1362_v39 }
 0x330   :  { %v1598_v36 = vpack.c.bf16 %v1436_v17, %v1436_v17 }
 0x331   :  { %v2376_v28 = vunpack.c.l.b16 %v1524_v4 }
 0x332   :  { %v1085_v25 = vpop.f32.mrf.mxu0  ;;  %v6760_v22 = vpop.f32.mrf.mxu1  ;;  %v3142_v57 = vunpack.c.l.b16 %v1598_v36 }
 0x333   :  { %v1086_v58 = vadd.f32 %v6632_v5, %v1085_v25  ;;  %v6782_v4 = vpop.f32.mrf.mxu3 }
 0x335   :  { %v1363_v46 = vmax.f32 %v1086_v58, 0.0 }
 0x337   :  { %v1525_v44 = vpack.c.bf16 %v1363_v46, %v1363_v46 }
 0x339   :  { %v2377_v6 = vunpack.c.l.b16 %v1525_v44 }
 0x33a   :  { %v1088_v2 = vpop.f32.mrf.mxu0  ;;  %v2301_v50 = vpop.f32.mrf.mxu1 }
 0x33b   :  { %v6769_v29 = vadd.f32 %v2301_v50, %v6562_v13  ;;  %v2388_v60 = vpack.c.b16 %v2377_v6, %v2376_v28  ;;  %v1089_v1 = vadd.f32 %v6632_v5, %v1088_v2  ;;  %v1437_v13 = vmax.f32 %v1271_v11, 0.0  ;;  %v7248_v2 = vld [vmem:[#allocation28_spill] sm:$0xff] }
 0x33c   :  { %v1274_v50 = vadd.f32 %v6632_v5, %v7248_v2 }
 0x33d   :  { %2486 = vmatmul.bf16.gmra.mxu2 %v2388_v60  ;;  %2868 = vmatmul.bf16.gmra.mxu1 %v7247_v0  ;;  %v1364_v55 = vmax.f32 %v1089_v1, 0.0  ;;  %v1599_v12 = vpack.c.bf16 %v1437_v13, %v1437_v13  ;;  %v1276_v60 = vadd.f32 %v6632_v5, %v7249_v18  ;;  %v7252_v18 = vld [vmem:[#allocation2_spill] sm:$0xff] }
 0x33e   :  { %3250 = vmatmul.bf16.gmra.mxu3 %v3152_v63  ;;  %v1438_v11 = vmax.f32 %v1274_v50, 0.0 }
 0x33f   :  { %v1526_v39 = vpack.c.bf16 %v1364_v55, %v1364_v55  ;;  %v3143_v27 = vunpack.c.l.b16 %v1599_v12  ;;  %v1439_v63 = vmax.f32 %v1276_v60, 0.0  ;;  %v6794_v55 = vpop.f32.mrf.mxu3  ;;  %v6796_v12 = vpop.f32.mrf.mxu2 }
 0x340   :  { %v1600_v17 = vpack.c.bf16 %v1438_v11, %v1438_v11  ;;  %v7253_v11 = vld [vmem:[#allocation30_spill] sm:$0xff] }
 0x341   :  { %v2378_v46 = vunpack.c.l.b16 %v1526_v39  ;;  %v3153_v30 = vpack.c.b16 %v3143_v27, %v3142_v57  ;;  %v1601_v13 = vpack.c.bf16 %v1439_v63, %v1439_v63 }
 0x342   :  { %v1090_v20 = vpop.f32.mrf.mxu0  ;;  %v6779_v32 = vpop.f32.mrf.mxu1  ;;  %v3144_v39 = vunpack.c.l.b16 %v1600_v17 }
 0x343   :  { %v1091_v31 = vadd.f32 %v6632_v5, %v1090_v20 }
 0x345   :  { %v1365_v25 = vmax.f32 %v1091_v31, 0.0 }
 0x347   :  { %v1527_v58 = vpack.c.bf16 %v1365_v25, %v1365_v25  ;;  %v3145_v25 = vunpack.c.l.b16 %v1601_v13 }
 0x349   :  { %v2379_v44 = vunpack.c.l.b16 %v1527_v58 }
 0x34a   :  { %v1093_v62 = vpop.f32.mrf.mxu0  ;;  %v2306_v54 = vpop.f32.mrf.mxu1 }
 0x34b   :  { %v6785_v28 = vadd.f32 %v2306_v54, %v6599_v43  ;;  %v2389_v6 = vpack.c.b16 %v2379_v44, %v2378_v46  ;;  %v1094_v7 = vadd.f32 %v6632_v5, %v1093_v62  ;;  %v3154_v46 = vpack.c.b16 %v3145_v25, %v3144_v39  ;;  %v7251_v44 = vld [vmem:[#allocation27_spill] sm:$0xff]  ;;  %v6799_v62 = vpop.f32.mrf.mxu3  ;;  %v7256_v25 = vld [vmem:[#allocation8_spill] sm:$0xff] }
 0x34d   :  { %2491 = vmatmul.bf16.gmra.mxu2 %v2389_v6  ;;  %2873 = vmatmul.bf16.gmra.mxu1 %v7250_v26  ;;  %v1366_v1 = vmax.f32 %v1094_v7, 0.0 }
 0x34e   :  { %3255 = vmatmul.bf16.gmra.mxu3 %v3153_v30 }
 0x34f   :  { %v1528_v20 = vpack.c.bf16 %v1366_v1, %v1366_v1 }
 0x351   :  { %v2380_v58 = vunpack.c.l.b16 %v1528_v20  ;;  %v7255_v20 = vld [vmem:[#allocation32_spill] sm:$0xff] }
 0x352   :  { %v1095_v0 = vpop.f32.mrf.mxu0 }
 0x353   :  { %v1096_v43 = vadd.f32 %v6632_v5, %v1095_v0  ;;  %v7254_v0 = vld [vmem:[#allocation31_spill] sm:$0xff]  ;;  %v6825_v17 = vpop.f32.mrf.mxu3 }
 0x355   :  { %v1367_v31 = vmax.f32 %v1096_v43, 0.0 }
 0x357   :  { %v1529_v36 = vpack.c.bf16 %v1367_v31, %v1367_v31 }
 0x359   :  { %v2381_v57 = vunpack.c.l.b16 %v1529_v36 }
 0x35b   :  { %v2390_v27 = vpack.c.b16 %v2381_v57, %v2380_v58  ;;  %v1214_v58 = vadd.f32 %v6632_v5, %v7256_v25  ;;  %v7257_v57 = vld [vmem:[#allocation11_spill] sm:$0xff] }
 0x35d   :  { %2496 = vmatmul.bf16.gmra.mxu2 %v2390_v27  ;;  %2878 = vmatmul.bf16.gmra.mxu1 %v7251_v44  ;;  %v7258_v27 = vld [vmem:[#allocation33_spill] sm:$0xff] }
 0x35e   :  { %3260 = vmatmul.bf16.gmra.mxu3 %v3154_v46  ;;  %v1414_v46 = vmax.f32 %v1214_v58, 0.0 }
 0x360   :  { %v2457_v54 = vpop.f32.mrf.mxu2 }
 0x361   :  { %v6802_v6 = vadd.f32 %v2457_v54, %v6615_v34 }
 0x368   :  { %v2459_v2 = vpop.f32.mrf.mxu2 }
 0x369   :  { %v6805_v50 = vadd.f32 %v2459_v2, %v6635_v35 }
 0x36d   :  { %3029 = vmatmul.bf16.vlgmr.msrb.gmra.mxu2 %v7252_v18  ;;  %v1576_v18 = vpack.c.bf16 %v1414_v46, %v1414_v46 }
 0x370   :  { %v2462_v60 = vpop.f32.mrf.mxu2 }
 0x371   :  { %v6809_v30 = vadd.f32 %v2462_v60, %v6642_v41 }
 0x378   :  { %v2464_v7 = vpop.f32.mrf.mxu2 }
 0x379   :  { %v6812_v26 = vadd.f32 %v2464_v7, %v6656_v24  ;;  %v5555_v7 = vld [vmem:[%s7197_s5 + $0xb8] sm:$0xff] }
 0x37a   :  { %3582 = vmatpush.bf16.msra.mxu3 %v5555_v7 }
 0x37d   :  { %3034 = vmatmul.bf16.gmra.mxu2 %v7253_v11  ;;  %v2947_v11 = vunpack.c.l.b16 %v1576_v18  ;;  %v5538_v18 = vld [vmem:[%s7197_s5 + $0x30] sm:$0xff] }
 0x380   :  { %v2467_v63 = vpop.f32.mrf.mxu2 }
 0x381   :  { %v6816_v34 = vadd.f32 %v2467_v63, %v6665_v42  ;;  %v6831_v42 = vpop.f32.mrf.mxu3 }
 0x388   :  { %v2469_v1 = vpop.f32.mrf.mxu2 }
 0x389   :  { %v6819_v35 = vadd.f32 %v2469_v1, %v6678_v33  ;;  %v6836_v36 = vpop.f32.mrf.mxu3 }
 0x38d   :  { %3039 = vmatmul.bf16.gmra.mxu2 %v7254_v0  ;;  %v7259_v0 = vld [vmem:[#allocation13_spill] sm:$0xff] }
 0x390   :  { %v2472_v43 = vpop.f32.mrf.mxu2 }
 0x391   :  { %v6823_v41 = vadd.f32 %v2472_v43, %v6690_v19  ;;  %v6849_v2 = vpop.f32.mrf.mxu3  ;;  %v1219_v43 = vadd.f32 %v6632_v5, %v7259_v0  ;;  %v7261_v0 = vld [vmem:[#allocation19_spill] sm:$0xff] }
 0x393   :  { %v1416_v58 = vmax.f32 %v1219_v43, 0.0  ;;  %v1224_v43 = vadd.f32 %v6632_v5, %v7261_v0  ;;  %v7263_v0 = vld [vmem:[#allocation3_spill] sm:$0xff] }
 0x395   :  { %v1578_v46 = vpack.c.bf16 %v1416_v58, %v1416_v58  ;;  %v5537_v58 = vld [vmem:[%s7197_s5 + $0x28] sm:$0xff] }
 0x397   :  { %v2949_v7 = vunpack.c.l.b16 %v1578_v46 }
 0x398   :  { %v2474_v24 = vpop.f32.mrf.mxu2 }
 0x399   :  { %v6828_v13 = vadd.f32 %v2474_v24, %v6703_v53  ;;  %v1216_v53 = vadd.f32 %v6632_v5, %v7257_v57  ;;  %v7260_v24 = vld [vmem:[#allocation16_spill] sm:$0xff]  ;;  %v6867_v25 = vpop.f32.mrf.mxu3 }
 0x39b   :  { %v1415_v44 = vmax.f32 %v1216_v53, 0.0 }
 0x39d   :  { %3044 = vmatmul.bf16.gmra.mxu2 %v7255_v20  ;;  %v1577_v60 = vpack.c.bf16 %v1415_v44, %v1415_v44  ;;  %v1221_v20 = vadd.f32 %v6632_v5, %v7260_v24 }
 0x39f   :  { %v2948_v63 = vunpack.c.l.b16 %v1577_v60  ;;  %v1417_v57 = vmax.f32 %v1221_v20, 0.0  ;;  %v5546_v20 = vld [vmem:[%s7197_s5 + $0x70] sm:$0xff] }
 0x3a0   :  { %v2477_v31 = vpop.f32.mrf.mxu2 }
 0x3a1   :  { %v6834_v33 = vadd.f32 %v2477_v31, %v6709_v61  ;;  %v2960_v31 = vpack.c.b16 %v2948_v63, %v2947_v11  ;;  %v1579_v44 = vpack.c.bf16 %v1417_v57, %v1417_v57 }
 0x3a3   :  { %v2950_v11 = vunpack.c.l.b16 %v1579_v44 }
 0x3a5   :  { %v2961_v24 = vpack.c.b16 %v2950_v11, %v2949_v7 }
 0x3a8   :  { %v2479_v39 = vpop.f32.mrf.mxu2 }
 0x3a9   :  { %v6839_v19 = vadd.f32 %v2479_v39, %v6722_v16  ;;  %v5539_v16 = vld [vmem:[%s7197_s5 + $0x38] sm:$0xff] }
 0x3aa   :  { %3497 = vmatpush.bf16.msra.mxu2 %v5539_v16  ;;  %v5547_v39 = vld [vmem:[%s7197_s5 + $0x78] sm:$0xff]  ;;  %v6880_v16 = vpop.f32.mrf.mxu3 }
 0x3ab   :  { %3429 = vmatpush.bf16.msra.mxu1 %v5547_v39 }
 0x3ad   :  { %3049 = vmatmul.bf16.gmra.mxu2 %v7258_v27  ;;  %v6872_v27 = vpop.f32.mrf.mxu1 }
 0x3ae   :  { %3498 = vmatpush.bf16.msra.mxu2 %v5538_v18  ;;  %v5536_v18 = vld [vmem:[%s7197_s5 + $0x20] sm:$0xff] }
 0x3af   :  { %3430 = vmatpush.bf16.msra.mxu1 %v5546_v20 }
 0x3b0   :  { %v2482_v54 = vpop.f32.mrf.mxu2 }
 0x3b1   :  { %v6847_v61 = vadd.f32 %v2482_v54, %v6730_v47  ;;  %v1935_v54 = vadd.f32 %v6520_v8, %v6506_v23  ;;  %v7262_v23 = vld [vmem:[#allocation23_spill] sm:$0xff] }
 0x3b2   :  { %v1226_v8 = vadd.f32 %v6632_v5, %v7262_v23  ;;  %v3221_v57 = vpop.f32.mrf.mxu3  ;;  %3499 = vmatpush.bf16.msra.mxu2 %v5537_v58  ;;  %v7264_v23 = vld [vmem:[#allocation4_spill] sm:$0xff]  ;;  %v5533_v58 = vld [vmem:[%s7197_s5 + $0x8] sm:$0xff] }
 0x3b3   :  { %v2133_v60 = vadd.f32 %v6537_v56, %v1935_v54  ;;  %v5554_v56 = vld [vmem:[%s7197_s5 + $0xb0] sm:$0xff] }
 0x3b4   :  { %3583 = vmatpush.bf16.msra.mxu3 %v5554_v56  ;;  %v1419_v39 = vmax.f32 %v1226_v8, 0.0  ;;  %v1231_v8 = vadd.f32 %v6632_v5, %v7264_v23  ;;  %v5534_v56 = vld [vmem:[%s7197_s5 + $0x10] sm:$0xff]  ;;  %v5543_v23 = vld [vmem:[%s7197_s5 + $0x58] sm:$0xff] }
 0x3b6   :  { %v1581_v54 = vpack.c.bf16 %v1419_v39, %v1419_v39  ;;  %3500 = vmatpush.bf16.msra.mxu2 %v5536_v18  ;;  %v5545_v39 = vld [vmem:[%s7197_s5 + $0x68] sm:$0xff] }
 0x3b7   :  { %3431 = vmatpush.bf16.msra.mxu1 %v5545_v39 }
 0x3b8   :  { %v2484_v1 = vpop.f32.mrf.mxu2  ;;  %v2952_v11 = vunpack.c.l.b16 %v1581_v54 }
 0x3b9   :  { %v6858_v47 = vadd.f32 %v2484_v1, %v6744_v51 }
 0x3bd   :  { %3054 = vmatmul.bf16.gmra.mxu2 %v2960_v31  ;;  %v2839_v31 = vpop.f32.mrf.mxu1 }
 0x3c0   :  { %v2487_v53 = vpop.f32.mrf.mxu2 }
 0x3c1   :  { %v6870_v51 = vadd.f32 %v2487_v53, %v6752_v15  ;;  %v2324_v15 = vadd.f32 %v6760_v22, %v2133_v60  ;;  %v1418_v22 = vmax.f32 %v1224_v43, 0.0  ;;  %v1229_v43 = vadd.f32 %v6632_v5, %v7263_v0  ;;  %v5553_v0 = vld [vmem:[%s7197_s5 + $0xa8] sm:$0xff] }
 0x3c2   :  { %3584 = vmatpush.bf16.msra.mxu3 %v5553_v0 }
 0x3c3   :  { %v1580_v44 = vpack.c.bf16 %v1418_v22, %v1418_v22  ;;  %v1420_v20 = vmax.f32 %v1229_v43, 0.0  ;;  %v1421_v22 = vmax.f32 %v1231_v8, 0.0 }
 0x3c5   :  { %v2841_v60 = vpop.f32.mrf.mxu1  ;;  %v2951_v7 = vunpack.c.l.b16 %v1580_v44  ;;  %v1582_v54 = vpack.c.bf16 %v1420_v20, %v1420_v20  ;;  %v1583_v18 = vpack.c.bf16 %v1421_v22, %v1421_v22  ;;  %v5542_v22 = vld [vmem:[%s7197_s5 + $0x50] sm:$0xff] }
 0x3c7   :  { %v2954_v43 = vunpack.c.l.b16 %v1583_v18 }
 0x3c8   :  { %v2489_v63 = vpop.f32.mrf.mxu2 }
 0x3c9   :  { %v6883_v1 = vadd.f32 %v2489_v63, %v2324_v15  ;;  %v5535_v15 = vld [vmem:[%s7197_s5 + $0x18] sm:$0xff] }
 0x3ca   :  { %3501 = vmatpush.bf16.msra.mxu2 %v5535_v15 }
 0x3cd   :  { %3059 = vmatmul.bf16.gmra.mxu2 %v2961_v24  ;;  %v2962_v24 = vpack.c.b16 %v2952_v11, %v2951_v7  ;;  %v5544_v7 = vld [vmem:[%s7197_s5 + $0x60] sm:$0xff] }
 0x3ce   :  { %3502 = vmatpush.bf16.msra.mxu2 %v5534_v56  ;;  %v5532_v11 = vld [vmem:[%s7197_s5] sm:$0xff]  ;;  %3432 = vmatpush.bf16.msra.mxu1 %v5544_v7  ;;  %v2693_v56 = vadd.f32 %v6674_v14, %v6802_v6  ;;  %v2694_v14 = vadd.f32 %v6680_v48, %v6805_v50  ;;  %v5551_v50 = vld [vmem:[%s7197_s5 + $0x98] sm:$0xff] }
 0x3cf   :  { %v6954_v7 = vld [vmem:[%s7196_s4] ss:$0 sm:$0xff] }
 0x3d0   :  { %v2492_v53 = vpop.f32.mrf.mxu2  ;;  %v2885_v48 = vadd.f32 %v2841_v60, %v2694_v14  ;;  %v5550_v60 = vld [vmem:[%s7197_s5 + $0x90] sm:$0xff] }
 0x3d1   :  { %v6899_v46 = vadd.f32 %v2492_v53, %v6769_v29  ;;  %v3223_v29 = vpop.f32.mrf.mxu3  ;;  %v2844_v53 = vpop.f32.mrf.mxu1 }
 0x3d2   :  { %3503 = vmatpush.bf16.msra.mxu2 %v5533_v58  ;;  %3433 = vmatpush.bf16.msra.mxu1 %v5543_v23  ;;  %v2884_v58 = vadd.f32 %v2839_v31, %v2693_v56  ;;  %v5552_v31 = vld [vmem:[%s7197_s5 + $0xa0] sm:$0xff] }
 0x3d3   :  { %3585 = vmatpush.bf16.msra.mxu3 %v5552_v31 }
 0x3d6   :  { %3504 = vmatpush.bf16.msra.mxu2 %v5532_v11  ;;  %3434 = vmatpush.bf16.msra.mxu1 %v5542_v22  ;;  %v5540_v11 = vld [vmem:[%s7197_s5 + $0x40] sm:$0xff] }
 0x3d7   :  { %3586 = vmatpush.bf16.msra.mxu3 %v5551_v50  ;;  %v2696_v50 = vadd.f32 %v6715_v40, %v6812_v26  ;;  %v5559_v40 = vld [vmem:[%s7197_s5 + $0xd8] sm:$0xff] }
 0x3d8   :  { %v6907_v63 = vpop.f32.mrf.mxu2  ;;  %v5571_v26 = vld [vmem:[%s7197_s5 + $0x138] sm:$0xff] }
 0x3d9   :  { %v3226_v15 = vpop.f32.mrf.mxu3 }
 0x3da   :  { %3756 = vmatpush.bf16.msrb.mxu2 %v5571_v26 }
 0x3db   :  { %3587 = vmatpush.bf16.msra.mxu3 %v5550_v60 }
 0x3dd   :  { %3064 = vmatmul.bf16.gmra.mxu2 %v2962_v24  ;;  %v2846_v24 = vpop.f32.mrf.mxu1 }
 0x3de   :  { %v2887_v60 = vadd.f32 %v2846_v24, %v2696_v50  ;;  %v5558_v24 = vld [vmem:[%s7197_s5 + $0xd0] sm:$0xff] }
 0x3e0   :  { %v2497_v44 = vpop.f32.mrf.mxu2 }
 0x3e1   :  { %v6923_v5 = vadd.f32 %v2497_v44, %v6785_v28  ;;  %v2953_v28 = vunpack.c.l.b16 %v1582_v54  ;;  %v6944_v39 = vpop.f32.mrf.mxu3  ;;  %v5541_v44 = vld [vmem:[%s7197_s5 + $0x48] sm:$0xff] }
 0x3e2   :  { %3435 = vmatpush.bf16.msra.mxu1 %v5541_v44  ;;  %v5562_v44 = vld [vmem:[%s7197_s5 + $0xf0] sm:$0xff] }
 0x3e3   :  { %v2963_v20 = vpack.c.b16 %v2954_v43, %v2953_v28 }
 0x3e5   :  { %v2849_v0 = vpop.f32.mrf.mxu1 }
 0x3e6   :  { %3436 = vmatpush.bf16.msra.mxu1 %v5540_v11 }
 0x3e8   :  { %v6937_v8 = vpop.f32.mrf.mxu2 }
 0x3e9   :  { %v6969_v43 = vpop.f32.mrf.mxu3 }
 0x3ed   :  { %3069 = vmatmul.bf16.gmra.mxu2 %v2963_v20  ;;  %v2695_v20 = vadd.f32 %v6700_v49, %v6809_v30  ;;  %v5549_v49 = vld [vmem:[%s7197_s5 + $0x88] sm:$0xff] }
 0x3ee   :  { %v5561_v30 = vld [vmem:[%s7197_s5 + $0xe8] sm:$0xff]  ;;  %3588 = vmatpush.bf16.msra.mxu3 %v5549_v49  ;;  %v5570_v49 = vld [vmem:[%s7197_s5 + $0x130] sm:$0xff] }
 0x3ef   :  { %v2886_v31 = vadd.f32 %v2844_v53, %v2695_v20  ;;  %v5560_v20 = vld [vmem:[%s7197_s5 + $0xe0] sm:$0xff]  ;;  %3757 = vmatpush.bf16.msrb.mxu2 %v5570_v49  ;;  %v5578_v49 = vld [vmem:[%s7197_s5 + $0x170] sm:$0xff] }
 0x3f0   :  { %v3030_v54 = vpop.f32.mrf.mxu2 }
 0x3f1   :  { %v3075_v18 = vadd.f32 %v3030_v54, %v2884_v58 }
 0x3f3   :  { %v3266_v6 = vadd.f32 %v3221_v57, %v3075_v18  ;;  %v5563_v57 = vld [vmem:[%s7197_s5 + $0xf8] sm:$0xff]  ;;  %v6980_v18 = vpop.f32.mrf.mxu1 }
 0x3f4   :  { %3669 = vmatpush.bf16.msrb.mxu1 %v5563_v57 }
 0x3f5   :  { %v3288_v28 = vadd.f32 %v6954_v7, %v3266_v6 }
 0x3f7   :  { %v3306_v22 = vmax.f32 %v3288_v28, 0.0 }
 0x3f8   :  { %v3032_v23 = vpop.f32.mrf.mxu2  ;;  %3670 = vmatpush.bf16.msrb.mxu1 %v5562_v44 }
 0x3f9   :  { %v3076_v56 = vadd.f32 %v3032_v23, %v2885_v48  ;;  %v3324_v14 = vpack.c.bf16 %v3306_v22, %v3306_v22  ;;  %v3233_v48 = vpop.f32.mrf.mxu3 }
 0x3fb   :  { %v3267_v58 = vadd.f32 %v3223_v29, %v3076_v56  ;;  %v3445_v57 = vunpack.c.l.b16 %v3324_v14  ;;  %v5548_v56 = vld [vmem:[%s7197_s5 + $0x80] sm:$0xff]  ;;  %v2697_v14 = vadd.f32 %v6724_v52, %v6816_v34  ;;  %v5557_v52 = vld [vmem:[%s7197_s5 + $0xc8] sm:$0xff] }
 0x3fc   :  { %3671 = vmatpush.bf16.msrb.mxu1 %v5561_v30  ;;  %3589 = vmatpush.bf16.msra.mxu3 %v5548_v56  ;;  %v5569_v34 = vld [vmem:[%s7197_s5 + $0x128] sm:$0xff]  ;;  %v2698_v56 = vadd.f32 %v6741_v21, %v6819_v35  ;;  %v5567_v35 = vld [vmem:[%s7197_s5 + $0x118] sm:$0xff] }
 0x3fd   :  { %v3289_v54 = vadd.f32 %v6954_v7, %v3267_v58  ;;  %v2888_v50 = vadd.f32 %v2849_v0, %v2697_v14  ;;  %3758 = vmatpush.bf16.msrb.mxu2 %v5569_v34 }
 0x3fe   :  { %v2889_v21 = vadd.f32 %v6980_v18, %v2698_v56  ;;  %v5566_v18 = vld [vmem:[%s7197_s5 + $0x110] sm:$0xff] }
 0x3ff   :  { %v3307_v6 = vmax.f32 %v3289_v54, 0.0 }
 0x400   :  { %v3035_v29 = vpop.f32.mrf.mxu2  ;;  %3672 = vmatpush.bf16.msrb.mxu1 %v5560_v20 }
 0x401   :  { %v3325_v11 = vpack.c.bf16 %v3307_v6, %v3307_v6  ;;  %v3077_v28 = vadd.f32 %v3035_v29, %v2886_v31  ;;  %v3236_v30 = vpop.f32.mrf.mxu3 }
 0x403   :  { %v3446_v23 = vunpack.c.l.b16 %v3325_v11  ;;  %v3268_v53 = vadd.f32 %v3226_v15, %v3077_v28  ;;  %v2854_v15 = vpop.f32.mrf.mxu1 }
 0x404   :  { %3673 = vmatpush.bf16.msrb.mxu1 %v5559_v40 }
 0x405   :  { %v3447_v22 = vpack.c.b16 %v3446_v23, %v3445_v57  ;;  %v3290_v58 = vadd.f32 %v6954_v7, %v3268_v53 }
 0x407   :  { %3505 = vmatmul.bf16.vlgmr.msra.gmra.mxu2 %v3447_v22  ;;  %v3308_v6 = vmax.f32 %v3290_v58, 0.0  ;;  %v5556_v58 = vld [vmem:[%s7197_s5 + $0xc0] sm:$0xff] }
 0x408   :  { %v3037_v44 = vpop.f32.mrf.mxu2  ;;  %3674 = vmatpush.bf16.msrb.mxu1 %v5558_v24 }
 0x409   :  { %v3078_v54 = vadd.f32 %v3037_v44, %v2887_v60  ;;  %v3326_v11 = vpack.c.bf16 %v3308_v6, %v3308_v6  ;;  %v5568_v60 = vld [vmem:[%s7197_s5 + $0x120] sm:$0xff]  ;;  %v3238_v26 = vpop.f32.mrf.mxu3  ;;  %v2699_v6 = vadd.f32 %v6749_v45, %v6823_v41  ;;  %v5565_v45 = vld [vmem:[%s7197_s5 + $0x108] sm:$0xff] }
 0x40a   :  { %3759 = vmatpush.bf16.msrb.mxu2 %v5568_v60  ;;  %v5577_v41 = vld [vmem:[%s7197_s5 + $0x168] sm:$0xff] }
 0x40b   :  { %v3269_v31 = vadd.f32 %v6944_v39, %v3078_v54  ;;  %v2856_v53 = vpop.f32.mrf.mxu1  ;;  %v3377_v20 = vunpack.c.l.b16 %v3326_v11 }
 0x40c   :  { %3675 = vmatpush.bf16.msrb.mxu1 %v5557_v52  ;;  %v2890_v52 = vadd.f32 %v2854_v15, %v2699_v6  ;;  %v5586_v6 = vld [vmem:[%s7197_s5 + $0x1b0] sm:$0xff] }
 0x40d   :  { %v3291_v29 = vadd.f32 %v6954_v7, %v3269_v31 }
 0x40e   :  { %3760 = vmatpush.bf16.msrb.mxu2 %v5567_v35 }
 0x40f   :  { %v3309_v28 = vmax.f32 %v3291_v29, 0.0 }
 0x410   :  { %v3040_v39 = vpop.f32.mrf.mxu2  ;;  %3676 = vmatpush.bf16.msrb.mxu1 %v5556_v58 }
 0x411   :  { %v3327_v57 = vpack.c.bf16 %v3309_v28, %v3309_v28  ;;  %v3079_v23 = vadd.f32 %v3040_v39, %v2888_v50 }
 0x412   :  { %3761 = vmatpush.bf16.msrb.mxu2 %v5566_v18 }
 0x413   :  { %v3378_v22 = vunpack.c.l.b16 %v3327_v57  ;;  %v3270_v0 = vadd.f32 %v6969_v43, %v3079_v23  ;;  %v5579_v43 = vld [vmem:[%s7197_s5 + $0x178] sm:$0xff]  ;;  %v2859_v29 = vpop.f32.mrf.mxu1  ;;  %v2700_v23 = vadd.f32 %v6763_v37, %v6828_v13 }
 0x414   :  { %3843 = vmatpush.bf16.msrb.mxu3 %v5579_v43  ;;  %v5575_v37 = vld [vmem:[%s7197_s5 + $0x158] sm:$0xff]  ;;  %v2701_v43 = vadd.f32 %v6777_v38, %v6834_v33  ;;  %v5573_v38 = vld [vmem:[%s7197_s5 + $0x148] sm:$0xff] }
 0x415   :  { %v3379_v40 = vpack.c.b16 %v3378_v22, %v3377_v20  ;;  %v3292_v44 = vadd.f32 %v6954_v7, %v3270_v0  ;;  %v5564_v22 = vld [vmem:[%s7197_s5 + $0x100] sm:$0xff]  ;;  %v5587_v13 = vld [vmem:[%s7197_s5 + $0x1b8] sm:$0xff]  ;;  %v5585_v33 = vld [vmem:[%s7197_s5 + $0x1a8] sm:$0xff] }
 0x416   :  { %3762 = vmatpush.bf16.msrb.mxu2 %v5565_v45  ;;  %v5576_v0 = vld [vmem:[%s7197_s5 + $0x160] sm:$0xff] }
 0x417   :  { %3437 = vmatmul.bf16.vlgmr.msra.gmra.mxu1 %v3379_v40  ;;  %v3310_v31 = vmax.f32 %v3292_v44, 0.0  ;;  %v2891_v44 = vadd.f32 %v2856_v53, %v2700_v23  ;;  %v5574_v53 = vld [vmem:[%s7197_s5 + $0x150] sm:$0xff] }
 0x418   :  { %v3042_v54 = vpop.f32.mrf.mxu2  ;;  %3844 = vmatpush.bf16.msrb.mxu3 %v5578_v49  ;;  %3930 = vmatpush.bf16.msra.mxu1 %v5587_v13  ;;  %v2892_v49 = vadd.f32 %v2859_v29, %v2701_v43 }
 0x419   :  { %v3080_v14 = vadd.f32 %v3042_v54, %v2889_v21  ;;  %v3328_v28 = vpack.c.bf16 %v3310_v31, %v3310_v31 }
 0x41a   :  { %3763 = vmatpush.bf16.msrb.mxu2 %v5564_v22 }
 0x41b   :  { %v3271_v24 = vadd.f32 %v3233_v48, %v3080_v14  ;;  %v3241_v48 = vpop.f32.mrf.mxu3  ;;  %v3530_v56 = vunpack.c.l.b16 %v3328_v28  ;;  %v2861_v60 = vpop.f32.mrf.mxu1 }
 0x41c   :  { %3845 = vmatpush.bf16.msrb.mxu3 %v5577_v41  ;;  %3931 = vmatpush.bf16.msra.mxu1 %v5586_v6 }
 0x41d   :  { %v3293_v11 = vadd.f32 %v6954_v7, %v3271_v24 }
 0x41f   :  { %v3311_v50 = vmax.f32 %v3293_v11, 0.0 }
 0x420   :  { %v3045_v34 = vpop.f32.mrf.mxu2  ;;  %3846 = vmatpush.bf16.msrb.mxu3 %v5576_v0  ;;  %3932 = vmatpush.bf16.msra.mxu1 %v5585_v33  ;;  %v2703_v0 = vadd.f32 %v6794_v55, %v6847_v61  ;;  %v5581_v55 = vld [vmem:[%s7197_s5 + $0x188] sm:$0xff] }
 0x421   :  { %v3329_v39 = vpack.c.bf16 %v3311_v50, %v3311_v50  ;;  %v3081_v57 = vadd.f32 %v3045_v34, %v2890_v52  ;;  %v2702_v52 = vadd.f32 %v6782_v4, %v6839_v19  ;;  %v5572_v34 = vld [vmem:[%s7197_s5 + $0x140] sm:$0xff]  ;;  %v5583_v4 = vld [vmem:[%s7197_s5 + $0x198] sm:$0xff]  ;;  %v5593_v61 = vld [vmem:[%s7197_s5 + $0x1e8] sm:$0xff] }
 0x422   :  { %v5595_v19 = vld [vmem:[%s7197_s5 + $0x1f8] sm:$0xff] }
 0x423   :  { %v3531_v20 = vunpack.c.l.b16 %v3329_v39  ;;  %v3272_v15 = vadd.f32 %v3236_v30, %v3081_v57  ;;  %v3243_v35 = vpop.f32.mrf.mxu3  ;;  %v5584_v39 = vld [vmem:[%s7197_s5 + $0x1a0] sm:$0xff]  ;;  %4017 = vmatpush.bf16.msra.mxu2 %v5595_v19 }
 0x424   :  { %3847 = vmatpush.bf16.msrb.mxu3 %v5575_v37  ;;  %3933 = vmatpush.bf16.msra.mxu1 %v5584_v39  ;;  %v5602_v39 = vld [vmem:[%s7197_s5 + $0x230] sm:$0xff] }
 0x425   :  { %v3532_v58 = vpack.c.b16 %v3531_v20, %v3530_v56  ;;  %v3294_v40 = vadd.f32 %v6954_v7, %v3272_v15  ;;  %v2893_v20 = vadd.f32 %v2861_v60, %v2702_v52  ;;  %v5582_v60 = vld [vmem:[%s7197_s5 + $0x190] sm:$0xff] }
 0x427   :  { %3590 = vmatmul.bf16.vlgmr.msra.gmra.mxu3 %v3532_v58  ;;  %v3312_v54 = vmax.f32 %v3294_v40, 0.0 }
 0x428   :  { %v3047_v30 = vpop.f32.mrf.mxu2  ;;  %3848 = vmatpush.bf16.msrb.mxu3 %v5574_v53  ;;  %3934 = vmatpush.bf16.msra.mxu1 %v5583_v4  ;;  %v2704_v53 = vadd.f32 %v6799_v62, %v6858_v47  ;;  %v5591_v62 = vld [vmem:[%s7197_s5 + $0x1d8] sm:$0xff] }
 0x429   :  { %v3082_v21 = vadd.f32 %v3047_v30, %v2891_v44  ;;  %v3330_v24 = vpack.c.bf16 %v3312_v54, %v3312_v54  ;;  %v5594_v44 = vld [vmem:[%s7197_s5 + $0x1f0] sm:$0xff]  ;;  %v5603_v47 = vld [vmem:[%s7197_s5 + $0x238] sm:$0xff] }
 0x42a   :  { %4018 = vmatpush.bf16.msra.mxu2 %v5594_v44  ;;  %v5588_v44 = vld [vmem:[%s7197_s5 + $0x1c0] sm:$0xff] }
 0x42b   :  { %v3273_v14 = vadd.f32 %v3238_v26, %v3082_v21  ;;  %v2864_v26 = vpop.f32.mrf.mxu1  ;;  %v3617_v45 = vunpack.c.l.b16 %v3330_v24  ;;  %v3246_v57 = vpop.f32.mrf.mxu3 }
 0x42c   :  { %3849 = vmatpush.bf16.msrb.mxu3 %v5573_v38  ;;  %3935 = vmatpush.bf16.msra.mxu1 %v5582_v60  ;;  %v2894_v43 = vadd.f32 %v2864_v26, %v2703_v0  ;;  %v2706_v0 = vadd.f32 %v6831_v42, %v6883_v1  ;;  %v5599_v42 = vld [vmem:[%s7197_s5 + $0x218] sm:$0xff] }
 0x42d   :  { %v3295_v31 = vadd.f32 %v6954_v7, %v3273_v14 }
 0x42e   :  { %4019 = vmatpush.bf16.msra.mxu2 %v5593_v61 }
 0x42f   :  { %v3313_v18 = vmax.f32 %v3295_v31, 0.0 }
 0x430   :  { %v3050_v11 = vpop.f32.mrf.mxu2  ;;  %3850 = vmatpush.bf16.msrb.mxu3 %v5572_v34  ;;  %3936 = vmatpush.bf16.msra.mxu1 %v5581_v55  ;;  %v5590_v34 = vld [vmem:[%s7197_s5 + $0x1d0] sm:$0xff]  ;;  %v1940_v55 = vadd.f32 %v6574_v59, %v6560_v9 }
 0x431   :  { %v3331_v28 = vpack.c.bf16 %v3313_v18, %v3313_v18  ;;  %v3083_v50 = vadd.f32 %v3050_v11, %v2892_v49  ;;  %v5580_v18 = vld [vmem:[%s7197_s5 + $0x180] sm:$0xff] }
 0x432   :  { %v5592_v49 = vld [vmem:[%s7197_s5 + $0x1e0] sm:$0xff] }
 0x433   :  { %v3618_v41 = vunpack.c.l.b16 %v3331_v28  ;;  %v3274_v29 = vadd.f32 %v3241_v48, %v3083_v50  ;;  %v2866_v22 = vpop.f32.mrf.mxu1  ;;  %v3248_v13 = vpop.f32.mrf.mxu3  ;;  %4020 = vmatpush.bf16.msra.mxu2 %v5592_v49 }
 0x434   :  { %3937 = vmatpush.bf16.msra.mxu1 %v5580_v18  ;;  %v2895_v11 = vadd.f32 %v2866_v22, %v2704_v53  ;;  %4104 = vmatpush.bf16.msra.mxu3 %v5603_v47 }
 0x435   :  { %v3619_v23 = vpack.c.b16 %v3618_v41, %v3617_v45  ;;  %v3296_v56 = vadd.f32 %v6954_v7, %v3274_v29  ;;  %v2705_v45 = vadd.f32 %v6825_v17, %v6870_v51  ;;  %v5589_v17 = vld [vmem:[%s7197_s5 + $0x1c8] sm:$0xff] }
 0x436   :  { %v5601_v51 = vld [vmem:[%s7197_s5 + $0x228] sm:$0xff] }
 0x437   :  { %3677 = vmatmul.bf16.vlgmr.msrb.gmra.mxu1 %v3619_v23  ;;  %v3314_v58 = vmax.f32 %v3296_v56, 0.0  ;;  %4021 = vmatpush.bf16.msra.mxu2 %v5591_v62 }
 0x438   :  { %v3052_v48 = vpop.f32.mrf.mxu2  ;;  %4105 = vmatpush.bf16.msra.mxu3 %v5602_v39  ;;  %v1945_v39 = vadd.f32 %v6796_v12, %v6604_v10 }
 0x439   :  { %v3084_v15 = vadd.f32 %v3052_v48, %v2893_v20  ;;  %v3332_v30 = vpack.c.bf16 %v3314_v58, %v3314_v58 }
 0x43b   :  { %v3275_v40 = vadd.f32 %v3243_v35, %v3084_v15  ;;  %v3704_v6 = vunpack.c.l.b16 %v3332_v30  ;;  %v2869_v38 = vpop.f32.mrf.mxu1  ;;  %v3251_v28 = vpop.f32.mrf.mxu3  ;;  %4022 = vmatpush.bf16.msra.mxu2 %v5590_v34 }
 0x43c   :  { %v2896_v4 = vadd.f32 %v2869_v38, %v2705_v45  ;;  %4106 = vmatpush.bf16.msra.mxu3 %v5601_v51 }
 0x43d   :  { %v3297_v37 = vadd.f32 %v6954_v7, %v3275_v40 }
 0x43f   :  { %v3315_v21 = vmax.f32 %v3297_v37, 0.0  ;;  %4023 = vmatpush.bf16.msra.mxu2 %v5589_v17  ;;  %v5600_v37 = vld [vmem:[%s7197_s5 + $0x220] sm:$0xff] }
 0x440   :  { %v3055_v35 = vpop.f32.mrf.mxu2  ;;  %4107 = vmatpush.bf16.msra.mxu3 %v5600_v37 }
 0x441   :  { %v3333_v54 = vpack.c.bf16 %v3315_v21, %v3315_v21  ;;  %v3085_v14 = vadd.f32 %v3055_v35, %v2894_v43  ;;  %v7265_v35 = vld [vmem:[#allocation34_spill] sm:$0xff] }
 0x443   :  { %v3705_v31 = vunpack.c.l.b16 %v3333_v54  ;;  %v3276_v24 = vadd.f32 %v3246_v57, %v3085_v14  ;;  %v2871_v23 = vpop.f32.mrf.mxu1  ;;  %v3253_v22 = vpop.f32.mrf.mxu3  ;;  %4024 = vmatpush.bf16.msra.mxu2 %v5588_v44  ;;  %v2135_v54 = vadd.f32 %v7265_v35, %v1940_v55  ;;  %v2707_v14 = vadd.f32 %v6836_v36, %v6899_v46  ;;  %v5597_v36 = vld [vmem:[%s7197_s5 + $0x208] sm:$0xff] }
 0x444   :  { %v2897_v21 = vadd.f32 %v2871_v23, %v2706_v0  ;;  %4108 = vmatpush.bf16.msra.mxu3 %v5599_v42  ;;  %v2709_v23 = vadd.f32 %v6867_v25, %v6923_v5 }
 0x445   :  { %v3706_v33 = vpack.c.b16 %v3705_v31, %v3704_v6  ;;  %v3298_v26 = vadd.f32 %v6954_v7, %v3276_v24  ;;  %v5598_v31 = vld [vmem:[%s7197_s5 + $0x210] sm:$0xff]  ;;  %v2326_v18 = vadd.f32 %v6779_v32, %v2135_v54 }
 0x447   :  { %3764 = vmatmul.bf16.vlgmr.msrb.gmra.mxu2 %v3706_v33  ;;  %v3316_v41 = vmax.f32 %v3298_v26, 0.0  ;;  %v2517_v9 = vadd.f32 %v6907_v63, %v2326_v18  ;;  %v5596_v63 = vld [vmem:[%s7197_s5 + $0x200] sm:$0xff] }
 0x448   :  { %v3057_v50 = vpop.f32.mrf.mxu2  ;;  %4109 = vmatpush.bf16.msra.mxu3 %v5598_v31 }
 0x449   :  { %v3086_v52 = vadd.f32 %v3057_v50, %v2895_v11  ;;  %v3334_v56 = vpack.c.bf16 %v3316_v41, %v3316_v41  ;;  %v2708_v47 = vadd.f32 %v6849_v2, %v2517_v9  ;;  %v2137_v2 = vadd.f32 %v6658_v3, %v1945_v39 }
 0x44b   :  { %v3277_v29 = vadd.f32 %v3248_v13, %v3086_v52  ;;  %v3791_v58 = vunpack.c.l.b16 %v3334_v56  ;;  %v2874_v1 = vpop.f32.mrf.mxu1  ;;  %v3256_v24 = vpop.f32.mrf.mxu3  ;;  %v2328_v17 = vadd.f32 %v6872_v27, %v2137_v2 }
 0x44c   :  { %v2898_v33 = vadd.f32 %v2874_v1, %v2707_v14  ;;  %4110 = vmatpush.bf16.msra.mxu3 %v5597_v36 }
 0x44d   :  { %v3299_v57 = vadd.f32 %v6954_v7, %v3277_v29 }
 0x44f   :  { %v3317_v20 = vmax.f32 %v3299_v57, 0.0 }
 0x450   :  { %v3060_v19 = vpop.f32.mrf.mxu2  ;;  %4111 = vmatpush.bf16.msra.mxu3 %v5596_v63 }
 0x451   :  { %v3335_v48 = vpack.c.bf16 %v3317_v20, %v3317_v20  ;;  %v3087_v15 = vadd.f32 %v3060_v19, %v2896_v4  ;;  %v2519_v19 = vadd.f32 %v6937_v8, %v2328_v17 }
 0x453   :  { %v3792_v40 = vunpack.c.l.b16 %v3335_v48  ;;  %v3278_v60 = vadd.f32 %v3251_v28, %v3087_v15  ;;  %v2876_v62 = vpop.f32.mrf.mxu1  ;;  %v3258_v45 = vpop.f32.mrf.mxu3  ;;  %v2710_v3 = vadd.f32 %v6880_v16, %v2519_v19 }
 0x454   :  { %v2899_v29 = vadd.f32 %v2876_v62, %v2708_v47 }
 0x455   :  { %v3793_v13 = vpack.c.b16 %v3792_v40, %v3791_v58  ;;  %v3300_v30 = vadd.f32 %v6954_v7, %v3278_v60 }
 0x457   :  { %3851 = vmatmul.bf16.vlgmr.msrb.gmra.mxu3 %v3793_v13  ;;  %v3318_v53 = vmax.f32 %v3300_v30, 0.0 }
 0x458   :  { %v3062_v43 = vpop.f32.mrf.mxu2 }
 0x459   :  { %v3088_v61 = vadd.f32 %v3062_v43, %v2897_v21  ;;  %v3336_v59 = vpack.c.bf16 %v3318_v53, %v3318_v53 }
 0x45b   :  { %v3279_v6 = vadd.f32 %v3253_v22, %v3088_v61  ;;  %v3878_v32 = vunpack.c.l.b16 %v3336_v59  ;;  %v2879_v4 = vpop.f32.mrf.mxu1  ;;  %v3261_v0 = vpop.f32.mrf.mxu3 }
 0x45c   :  { %v2900_v22 = vadd.f32 %v2879_v4, %v2709_v23 }
 0x45d   :  { %v3301_v49 = vadd.f32 %v6954_v7, %v3279_v6 }
 0x45f   :  { %v3319_v38 = vmax.f32 %v3301_v49, 0.0 }
 0x460   :  { %v3065_v46 = vpop.f32.mrf.mxu2 }
 0x461   :  { %v3337_v26 = vpack.c.bf16 %v3319_v38, %v3319_v38  ;;  %v3089_v11 = vadd.f32 %v3065_v46, %v2898_v33 }
 0x463   :  { %v3879_v28 = vunpack.c.l.b16 %v3337_v26  ;;  %v3280_v50 = vadd.f32 %v3256_v24, %v3089_v11  ;;  %v2881_v44 = vpop.f32.mrf.mxu1  ;;  %v3263_v30 = vpop.f32.mrf.mxu3 }
 0x464   :  { %v2901_v37 = vadd.f32 %v2881_v44, %v2710_v3 }
 0x465   :  { %v3880_v52 = vpack.c.b16 %v3879_v28, %v3878_v32  ;;  %v3302_v41 = vadd.f32 %v6954_v7, %v3280_v50 }
 0x467   :  { %3938 = vmatmul.bf16.vlgmr.msra.gmra.mxu1 %v3880_v52  ;;  %v3320_v56 = vmax.f32 %v3302_v41, 0.0  ;;  %v5613_v41 = vld [vmem:[%s7198_s6] ss:$0 sm:$0xff] }
 0x468   :  { %v3067_v34 = vpop.f32.mrf.mxu2 }
 0x469   :  { %v3090_v57 = vadd.f32 %v3067_v34, %v2899_v29  ;;  %v3338_v48 = vpack.c.bf16 %v3320_v56, %v3320_v56 }
 0x46b   :  { %v3281_v20 = vadd.f32 %v3258_v45, %v3090_v57  ;;  %v3965_v40 = vunpack.c.l.b16 %v3338_v48 }
 0x46d   :  { %v3303_v51 = vadd.f32 %v6954_v7, %v3281_v20 }
 0x46f   :  { %v3321_v15 = vmax.f32 %v3303_v51, 0.0 }
 0x470   :  { %v3070_v10 = vpop.f32.mrf.mxu2 }
 0x471   :  { %v3339_v12 = vpack.c.bf16 %v3321_v15, %v3321_v15  ;;  %v3091_v58 = vadd.f32 %v3070_v10, %v2900_v22 }
 0x473   :  { %v3966_v25 = vunpack.c.l.b16 %v3339_v12  ;;  %v3282_v5 = vadd.f32 %v3261_v0, %v3091_v58 }
 0x475   :  { %v3967_v60 = vpack.c.b16 %v3966_v25, %v3965_v40  ;;  %v3304_v27 = vadd.f32 %v6954_v7, %v3282_v5 }
 0x477   :  { %4025 = vmatmul.bf16.vlgmr.msra.gmra.mxu2 %v3967_v60  ;;  %v3322_v21 = vmax.f32 %v3304_v27, 0.0 }
 0x478   :  { %v3072_v13 = vpop.f32.mrf.mxu2 }
 0x479   :  { %v3092_v8 = vadd.f32 %v3072_v13, %v2901_v37  ;;  %v3340_v43 = vpack.c.bf16 %v3322_v21, %v3322_v21 }
 0x47b   :  { %v3283_v42 = vadd.f32 %v3263_v30, %v3092_v8  ;;  %v4052_v16 = vunpack.c.l.b16 %v3340_v43 }
 0x47d   :  { %v3305_v1 = vadd.f32 %v6954_v7, %v3283_v42 }
 0x47f   :  { %v3323_v55 = vmax.f32 %v3305_v1, 0.0 }
 0x481   :  { %v3341_v61 = vpack.c.bf16 %v3323_v55, %v3323_v55 }
 0x483   :  { %v4053_v35 = vunpack.c.l.b16 %v3341_v61 }
 0x485   :  { %v4054_v54 = vpack.c.b16 %v4053_v35, %v4052_v16 }
 0x487   :  { %4112 = vmatmul.bf16.vlgmr.msra.gmra.mxu3 %v4054_v54 }
 0x48a   :  { %v3506_v53 = vpop.f32.mrf.mxu2 }
 0x492   :  { %v3508_v24 = vpop.f32.mrf.mxu2 }
 0x494   :  { %v3438_v14 = vpop.f32.mrf.mxu1 }
 0x495   :  { %v3507_v36 = vadd.f32 %v3506_v53, %v3438_v14 }
 0x49c   :  { %v3440_v31 = vpop.f32.mrf.mxu1 }
 0x49d   :  { %v3509_v32 = vadd.f32 %v3508_v24, %v3440_v31 }
 0x4aa   :  { %v3591_v6 = vpop.f32.mrf.mxu3 }
 0x4ab   :  { %v3596_v7 = vadd.f32 %v3591_v6, %v3507_v36 }
 0x4b2   :  { %v3593_v18 = vpop.f32.mrf.mxu3 }
 0x4b3   :  { %v3597_v50 = vadd.f32 %v3593_v18, %v3509_v32 }
 0x4b4   :  { %v3678_v49 = vpop.f32.mrf.mxu1 }
 0x4b5   :  { %v3683_v46 = vadd.f32 %v3678_v49, %v3596_v7 }
 0x4bc   :  { %v3680_v38 = vpop.f32.mrf.mxu1 }
 0x4bd   :  { %v3684_v52 = vadd.f32 %v3680_v38, %v3597_v50 }
 0x4ca   :  { %v3765_v9 = vpop.f32.mrf.mxu2 }
 0x4cb   :  { %v3770_v62 = vadd.f32 %v3765_v9, %v3683_v46 }
 0x4d2   :  { %v3767_v33 = vpop.f32.mrf.mxu2 }
 0x4d3   :  { %v3771_v34 = vadd.f32 %v3767_v33, %v3684_v52 }
 0x4da   :  { %v3852_v59 = vpop.f32.mrf.mxu3 }
 0x4db   :  { %v3857_v28 = vadd.f32 %v3852_v59, %v3770_v62 }
 0x4e2   :  { %v3854_v26 = vpop.f32.mrf.mxu3 }
 0x4e3   :  { %v3858_v2 = vadd.f32 %v3854_v26, %v3771_v34 }
 0x4e4   :  { %v3939_v11 = vpop.f32.mrf.mxu1 }
 0x4e5   :  { %v3944_v63 = vadd.f32 %v3939_v11, %v3857_v28 }
 0x4ec   :  { %v3941_v57 = vpop.f32.mrf.mxu1 }
 0x4ed   :  { %v3945_v20 = vadd.f32 %v3941_v57, %v3858_v2 }
 0x4fa   :  { %v4026_v47 = vpop.f32.mrf.mxu2 }
 0x4fb   :  { %v4031_v45 = vadd.f32 %v4026_v47, %v3944_v63 }
 0x502   :  { %v4028_v56 = vpop.f32.mrf.mxu2 }
 0x503   :  { %v4032_v4 = vadd.f32 %v4028_v56, %v3945_v20 }
 0x50a   :  { %v4113_v29 = vpop.f32.mrf.mxu3 }
 0x50b   :  { %v4118_v39 = vadd.f32 %v4113_v29, %v4031_v45 }
 0x50d   :  { %v4124_v23 = vadd.f32 %v5613_v41, %v4118_v39 }
 0x50f   :  { %4126 = vst [vmem:[%s7199_s7] sm:$0xff] %v4124_v23 }
 0x512   :  { %v4115_v17 = vpop.f32.mrf.mxu3 }
 0x513   :  { %v4119_v51 = vadd.f32 %v4115_v17, %v4032_v4 }
 0x515   :  { %v4125_v19 = vadd.f32 %v5613_v41, %v4119_v51 }
 0x517   :  { %4127 = vst [vmem:[%s7199_s7 + $0x8] sm:$0xff] %v4125_v19 }

</bundles_post_ra>
